<compile_context>
chip_gen: v6e
topology: v6e:2x2x1
jax: 0.10.0
libtpu: 0.0.40
codegen_flags: <defaults>
</compile_context>

<pallas_src>
import math

import jax
import jax.numpy as jnp
from jax import lax
from jax.experimental import pallas as pl
from jax.experimental.pallas import tpu as pltpu

# ---- sizes (small but consistent with the module) -------------------------
DIN = 4 * 768          # first-layer Linear input size (hard-coded 4*768)
HIDDEN = 32            # model_config.gru_hidden_size
LINEAR_HIDDEN = 64     # model_config.linear_hidden_size
N_CLASSES = 4
BATCH = 2
SEQ = 8


# ===========================================================================
# Fused Pallas kernel: projection + fused bi-GRU + classifier + seq-sum
# ===========================================================================
def _fused_kernel(e_ref, wlin_ref, blin_ref,
                  wih3_ref, bih_ref,
                  whh_ref, bhh_ref,
                  w1_ref, b1_ref, w2_ref, b2_ref,
                  o_ref, hseq_ref):
    B = o_ref.shape[0]
    SB, H2 = hseq_ref.shape          # SB = S*B, H2 = 2*H
    S = SB // B
    H = H2 // 2
    H4, H6 = 4 * H, 6 * H
    C = w2_ref.shape[1]
    f32, bf16 = jnp.float32, jnp.bfloat16

    # ---- shared first-layer Linear: all 3 groups as one row-stacked matmul ----
    proj = (jnp.dot(e_ref[...], wlin_ref[...], preferred_element_type=f32)
            + blin_ref[...])                                       # (3*SB, 2H) f32

    # ---- GRU input projection: feature concat folded into 3 accumulated
    #      matmuls; fwd+rev fused; gate cols = [r_f r_r | z_f z_r | n_f n_r]
    gx = (jnp.dot(proj[0:SB].astype(bf16), wih3_ref[0],
                  preferred_element_type=f32)
          + jnp.dot(proj[SB:2 * SB].astype(bf16), wih3_ref[1],
                    preferred_element_type=f32)
          + jnp.dot(proj[2 * SB:3 * SB].astype(bf16), wih3_ref[2],
                    preferred_element_type=f32)
          + bih_ref[...])                                          # (SB, 6H)
    gx = gx.reshape(B, S, H6)

    whh = whh_ref[...]               # (2H, 6H) bf16, block-diagonal (fwd | rev rows)
    bhh = bhh_ref[...]               # (1, 6H)  f32

    # column mask: True where the gate column belongs to the forward direction
    col = lax.broadcasted_iota(jnp.int32, (B, H6), 1)
    is_fwd = (col < H) | ((col >= H2) & (col < 3 * H)) | ((col >= H4) & (col < 5 * H))

    h = jnp.zeros((B, H2), f32)      # carried [h_fwd | h_rev]
    # S is small and static -> fully unrolled, both directions per iteration.
    for t in range(S):
        tr = S - 1 - t
        # forward gates read time t, reverse gates read time tr (one vselect)
        g = jnp.where(is_fwd, gx[:, t, :], gx[:, tr, :])           # (B, 6H)
        gh = jnp.dot(h.astype(bf16), whh, preferred_element_type=f32) + bhh
        s = jax.nn.sigmoid(g[:, 0:H4] + gh[:, 0:H4])               # one 128-lane sigmoid
        r = s[:, 0:H2]                                             # [r_f r_r]
        z = s[:, H2:H4]                                            # [z_f z_r]
        n = jnp.tanh(g[:, H4:H6] + r * gh[:, H4:H6])               # one 64-lane tanh
        h = (1.0 - z) * n + z * h
        hseq_ref[t * B:(t + 1) * B, 0:H] = h[:, 0:H]               # h_fwd(t)
        hseq_ref[tr * B:(tr + 1) * B, H:H2] = h[:, H:H2]           # h_rev(tr)

    # ---- classifier (dropout = identity in eval) + sum over the sequence ----
    x = jnp.maximum(hseq_ref[...], 0.0)                            # (SB, 2H)
    h1 = jnp.maximum(
        jnp.dot(x.astype(bf16), w1_ref[...], preferred_element_type=f32)
        + b1_ref[...], 0.0)                                        # (SB, 64)
    y = (jnp.dot(h1.astype(bf16), w2_ref[...], preferred_element_type=f32)
         + b2_ref[...])                                            # (SB, C)
    o_ref[...] = jnp.sum(y.reshape(S, B, C), axis=0)               # (B, C)


@jax.jit
def forward_pallas(e_all, prep):
    logits = pl.pallas_call(
        _fused_kernel,
        out_shape=jax.ShapeDtypeStruct((BATCH, N_CLASSES), jnp.float32),
        scratch_shapes=[pltpu.VMEM((SEQ * BATCH, 2 * HIDDEN), jnp.float32)],
    )(e_all,
      prep["w_lin_t"], prep["b_lin"],
      prep["w_ih3"], prep["b_ih"],
      prep["w_hh"], prep["b_hh"],
      prep["w1_t"], prep["b1"], prep["w2_t"], prep["b2"])
    return {"logits": logits}


# ===========================================================================
# One-time input / parameter preparation (off the hot path)
# ===========================================================================
def prepare_embeddings(embeddings):
    """Stack the 3 embedding groups along rows and store them bf16 at rest."""
    B, S, F = embeddings[0].shape
    return jnp.concatenate([e.reshape(B * S, F) for e in embeddings],
                           axis=0).astype(jnp.bfloat16)            # (3*B*S, DIN)


def prepare_params(params):
    bf16 = jnp.bfloat16
    H = HIDDEN
    H2 = 2 * H
    w_lin, b_lin = params["lin"]                      # (2H, DIN), (2H,)
    wih_f, whh_f, bih_f, bhh_f = params["gru"][0]     # (3H,6H),(3H,H),(3H,),(3H,)
    wih_r, whh_r, bih_r, bhh_r = params["gru"][1]
    w1, b1, w2, b2 = params["cls"]

    def gate_cols(m_f, m_r):
        # m_f / m_r: (*, 3H) with columns [r | z | n]  ->  [r_f r_r | z_f z_r | n_f n_r]
        return jnp.concatenate(
            [m_f[:, 0:H], m_r[:, 0:H],
             m_f[:, H:H2], m_r[:, H:H2],
             m_f[:, H2:], m_r[:, H2:]], axis=-1)

    # GRU input projection: both directions fused, gate columns reordered,
    # split into 3 row blocks so the feature concat folds into an accumulation.
    wih = gate_cols(wih_f.T, wih_r.T)                 # (6H_in, 6H_gates)
    wih3 = wih.reshape(3, H2, 6 * H).astype(bf16)     # (3, 2H, 6H)

    b_ih = gate_cols(bih_f.reshape(1, -1), bih_r.reshape(1, -1))   # (1, 6H)
    b_hh = gate_cols(bhh_f.reshape(1, -1), bhh_r.reshape(1, -1))   # (1, 6H)

    # block-diagonal hidden->gates weight: rows 0:H act on h_fwd, H:2H on h_rev
    zeros = jnp.zeros((H, H), jnp.float32)
    wtf, wtr = whh_f.T, whh_r.T                       # (H, 3H)
    top = jnp.concatenate([wtf[:, 0:H], zeros, wtf[:, H:H2], zeros,
                           wtf[:, H2:], zeros], axis=1)
    bot = jnp.concatenate([zeros, wtr[:, 0:H], zeros, wtr[:, H:H2],
                           zeros, wtr[:, H2:]], axis=1)
    w_hh = jnp.concatenate([top, bot], axis=0).astype(bf16)        # (2H, 6H)

    return dict(
        w_lin_t=w_lin.T.astype(bf16),                 # (DIN, 2H)
        b_lin=b_lin.reshape(1, -1),                   # (1, 2H)  f32
        w_ih3=wih3,                                   # (3, 2H, 6H) bf16
        b_ih=b_ih,                                    # (1, 6H)  f32
        w_hh=w_hh,                                    # (2H, 6H) bf16
        b_hh=b_hh,                                    # (1, 6H)  f32
        w1_t=w1.T.astype(bf16), b1=b1.reshape(1, -1),
        w2_t=w2.T.astype(bf16), b2=b2.reshape(1, -1),
    )


# ===========================================================================
# Pure-JAX reference (same bf16-operand / f32-accumulate matmul convention)
# ===========================================================================
def _bf16_dot(x, w):
    return jnp.dot(x.astype(jnp.bfloat16), w.astype(jnp.bfloat16),
                   preferred_element_type=jnp.float32)


def _gru_ref_dir(x, wih, whh, bih, bhh, reverse):
    S, B, _ = x.shape
    H = whh.shape[1]
    gx = _bf16_dot(x, wih.T) + bih
    if reverse:
        gx = gx[::-1]

    def step(h, g):
        gh = _bf16_dot(h, whh.T) + bhh
        r = jax.nn.sigmoid(g[:, :H] + gh[:, :H])
        z = jax.nn.sigmoid(g[:, H:2 * H] + gh[:, H:2 * H])
        n = jnp.tanh(g[:, 2 * H:] + r * gh[:, 2 * H:])
        h_new = (1.0 - z) * n + z * h
        return h_new, h_new

    _, hs = lax.scan(step, jnp.zeros((B, H), jnp.float32), gx)
    return hs[::-1] if reverse else hs


def forward_ref(embeddings, params):
    w_lin, b_lin = params["lin"]
    xs = [jnp.transpose(e, (1, 0, 2)) for e in embeddings]        # (S, B, DIN)
    os = [_bf16_dot(x, w_lin.T) + b_lin for x in xs]              # (S, B, 2H)
    x1 = jnp.concatenate(os, axis=2)                              # (S, B, 6H)
    xg = jnp.concatenate(
        [_gru_ref_dir(x1, *params["gru"][d], reverse=(d == 1)) for d in range(2)],
        axis=-1)                                                  # (S, B, 2H)
    x = jnp.maximum(jnp.transpose(xg, (1, 0, 2)), 0.0)            # (B, S, 2H)
    w1, b1, w2, b2 = params["cls"]
    h = jnp.maximum(_bf16_dot(x, w1.T) + b1, 0.0)
    y = _bf16_dot(h, w2.T) + b2
    return y.sum(axis=1)                                          # (B, C)


# ===========================================================================
# Deterministic parameter init (PyTorch layouts)
# ===========================================================================
def init_params(key):
    keys = iter(jax.random.split(key, 16))

    def U(shape, scale):
        return jax.random.uniform(next(keys), shape, jnp.float32, -scale, scale)

    def xavier(shape):
        std = math.sqrt(2.0 / (shape[0] + shape[1]))
        return std * jax.random.normal(next(keys), shape, jnp.float32)

    s_h = 1.0 / math.sqrt(HIDDEN)
    s_in = 1.0 / math.sqrt(DIN)
    lin = (xavier((2 * HIDDEN, DIN)), U((2 * HIDDEN,), s_in))
    gru = [
        (U((3 * HIDDEN, 6 * HIDDEN), s_h), U((3 * HIDDEN, HIDDEN), s_h),
         U((3 * HIDDEN,), s_h), U((3 * HIDDEN,), s_h))
        for _ in range(2)  # forward / reverse direction
    ]
    cls = (xavier((LINEAR_HIDDEN, 2 * HIDDEN)), U((LINEAR_HIDDEN,), s_h),
           xavier((N_CLASSES, LINEAR_HIDDEN)), U((N_CLASSES,), s_h))
    return {"lin": lin, "gru": gru, "cls": cls}


if __name__ == "__main__":
    root = jax.random.PRNGKey(0)
    kp, k1, k2, k3 = jax.random.split(root, 4)
    params = init_params(kp)
    prep = prepare_params(params)
    embeddings = tuple(
        jax.random.normal(k, (BATCH, SEQ, DIN), jnp.float32) for k in (k1, k2, k3)
    )
    e_all = prepare_embeddings(embeddings)        # bf16 at rest, row-stacked

    out = forward_pallas(e_all, prep)
    logits = jax.block_until_ready(out["logits"])
    assert logits.shape == (BATCH, N_CLASSES), logits.shape

    ref = jax.block_until_ready(forward_ref(embeddings, params))
    max_diff = float(jnp.max(jnp.abs(logits - ref)))
    if not max_diff < 2e-3:
        raise AssertionError(f"Pallas/ref mismatch, max diff = {max_diff}")

    print("KERNEL_OK")
</pallas_src>

<mosaic_0001>
module attributes {stable_mosaic.version = 11 : i64} {
  func.func @_fused_kernel(%arg0: memref<48x3072xbf16, #tpu.memory_space<vmem>>, %arg1: memref<3072x64xbf16, #tpu.memory_space<vmem>>, %arg2: memref<1x64xf32, #tpu.memory_space<vmem>>, %arg3: memref<3x64x192xbf16, #tpu.memory_space<vmem>>, %arg4: memref<1x192xf32, #tpu.memory_space<vmem>>, %arg5: memref<64x192xbf16, #tpu.memory_space<vmem>>, %arg6: memref<1x192xf32, #tpu.memory_space<vmem>>, %arg7: memref<64x64xbf16, #tpu.memory_space<vmem>>, %arg8: memref<1x64xf32, #tpu.memory_space<vmem>>, %arg9: memref<64x4xbf16, #tpu.memory_space<vmem>>, %arg10: memref<1x4xf32, #tpu.memory_space<vmem>>, %arg11: memref<2x4xf32, #tpu.memory_space<vmem>>, %arg12: memref<16x64xf32, #tpu.memory_space<vmem>>) attributes {dimension_semantics = [], scalar_prefetch = 0 : i64, scratch_operands = 1 : i64, tpu.core_type = #tpu.core_type<tc>} {
    %c0 = arith.constant 0 : index
    %c0_0 = arith.constant 0 : index
    %0 = vector.load %arg0[%c0, %c0_0] : memref<48x3072xbf16, #tpu.memory_space<vmem>>, vector<48x3072xbf16>
    %c0_1 = arith.constant 0 : index
    %c0_2 = arith.constant 0 : index
    %1 = vector.load %arg1[%c0_1, %c0_2] : memref<3072x64xbf16, #tpu.memory_space<vmem>>, vector<3072x64xbf16>
    %cst = arith.constant dense<0.000000e+00> : vector<48x64xf32>
    %2 = tpu.matmul %0, %1, %cst {dimension_numbers = #tpu.dot_dimension_numbers<[1], [0], [0], [1], [0, 0, 1, 1], [], []>} : vector<48x3072xbf16>, vector<3072x64xbf16>, vector<48x64xf32> -> vector<48x64xf32>
    %c0_3 = arith.constant 0 : index
    %c0_4 = arith.constant 0 : index
    %3 = vector.load %arg2[%c0_3, %c0_4] : memref<1x64xf32, #tpu.memory_space<vmem>>, vector<1x64xf32>
    %4 = vector.broadcast %3 : vector<1x64xf32> to vector<48x64xf32>
    %5 = arith.addf %2, %4 : vector<48x64xf32>
    %6 = vector.extract_strided_slice %5 {offsets = [0, 0], sizes = [16, 64], strides = [1, 1]} : vector<48x64xf32> to vector<16x64xf32>
    %7 = arith.truncf %6 : vector<16x64xf32> to vector<16x64xbf16>
    %c0_5 = arith.constant 0 : index
    %c0_6 = arith.constant 0 : index
    %c0_7 = arith.constant 0 : index
    %8 = vector.load %arg3[%c0_5, %c0_6, %c0_7] : memref<3x64x192xbf16, #tpu.memory_space<vmem>>, vector<1x64x192xbf16>
    %9 = vector.shape_cast %8 : vector<1x64x192xbf16> to vector<64x192xbf16>
    %cst_8 = arith.constant dense<0.000000e+00> : vector<16x192xf32>
    %10 = tpu.matmul %7, %9, %cst_8 {dimension_numbers = #tpu.dot_dimension_numbers<[1], [0], [0], [1], [0, 0, 1, 1], [], []>} : vector<16x64xbf16>, vector<64x192xbf16>, vector<16x192xf32> -> vector<16x192xf32>
    %11 = vector.extract_strided_slice %5 {offsets = [16, 0], sizes = [16, 64], strides = [1, 1]} : vector<48x64xf32> to vector<16x64xf32>
    %12 = arith.truncf %11 : vector<16x64xf32> to vector<16x64xbf16>
    %c1 = arith.constant 1 : index
    %c0_9 = arith.constant 0 : index
    %c0_10 = arith.constant 0 : index
    %13 = vector.load %arg3[%c1, %c0_9, %c0_10] : memref<3x64x192xbf16, #tpu.memory_space<vmem>>, vector<1x64x192xbf16>
    %14 = vector.shape_cast %13 : vector<1x64x192xbf16> to vector<64x192xbf16>
    %cst_11 = arith.constant dense<0.000000e+00> : vector<16x192xf32>
    %15 = tpu.matmul %12, %14, %cst_11 {dimension_numbers = #tpu.dot_dimension_numbers<[1], [0], [0], [1], [0, 0, 1, 1], [], []>} : vector<16x64xbf16>, vector<64x192xbf16>, vector<16x192xf32> -> vector<16x192xf32>
    %16 = arith.addf %10, %15 : vector<16x192xf32>
    %17 = vector.extract_strided_slice %5 {offsets = [32, 0], sizes = [16, 64], strides = [1, 1]} : vector<48x64xf32> to vector<16x64xf32>
    %18 = arith.truncf %17 : vector<16x64xf32> to vector<16x64xbf16>
    %c2 = arith.constant 2 : index
    %c0_12 = arith.constant 0 : index
    %c0_13 = arith.constant 0 : index
    %19 = vector.load %arg3[%c2, %c0_12, %c0_13] : memref<3x64x192xbf16, #tpu.memory_space<vmem>>, vector<1x64x192xbf16>
    %20 = vector.shape_cast %19 : vector<1x64x192xbf16> to vector<64x192xbf16>
    %cst_14 = arith.constant dense<0.000000e+00> : vector<16x192xf32>
    %21 = tpu.matmul %18, %20, %cst_14 {dimension_numbers = #tpu.dot_dimension_numbers<[1], [0], [0], [1], [0, 0, 1, 1], [], []>} : vector<16x64xbf16>, vector<64x192xbf16>, vector<16x192xf32> -> vector<16x192xf32>
    %22 = arith.addf %16, %21 : vector<16x192xf32>
    %c0_15 = arith.constant 0 : index
    %c0_16 = arith.constant 0 : index
    %23 = vector.load %arg4[%c0_15, %c0_16] : memref<1x192xf32, #tpu.memory_space<vmem>>, vector<1x192xf32>
    %24 = vector.broadcast %23 : vector<1x192xf32> to vector<16x192xf32>
    %25 = arith.addf %22, %24 : vector<16x192xf32>
    %26 = vector.shape_cast %25 : vector<16x192xf32> to vector<2x8x192xf32>
    %c0_17 = arith.constant 0 : index
    %c0_18 = arith.constant 0 : index
    %27 = vector.load %arg5[%c0_17, %c0_18] : memref<64x192xbf16, #tpu.memory_space<vmem>>, vector<64x192xbf16>
    %c0_19 = arith.constant 0 : index
    %c0_20 = arith.constant 0 : index
    %28 = vector.load %arg6[%c0_19, %c0_20] : memref<1x192xf32, #tpu.memory_space<vmem>>, vector<1x192xf32>
    %29 = tpu.iota {dimensions = array<i32: 1>} : vector<2x192xi32>
    %c32_i32 = arith.constant 32 : i32
    %30 = vector.broadcast %c32_i32 : i32 to vector<2x192xi32>
    %31 = arith.cmpi slt, %29, %30 : vector<2x192xi32>
    %c64_i32 = arith.constant 64 : i32
    %32 = vector.broadcast %c64_i32 : i32 to vector<2x192xi32>
    %33 = arith.cmpi sge, %29, %32 : vector<2x192xi32>
    %c96_i32 = arith.constant 96 : i32
    %34 = vector.broadcast %c96_i32 : i32 to vector<2x192xi32>
    %35 = arith.cmpi slt, %29, %34 : vector<2x192xi32>
    %36 = arith.andi %33, %35 : vector<2x192xi1>
    %37 = arith.ori %31, %36 : vector<2x192xi1>
    %c128_i32 = arith.constant 128 : i32
    %38 = vector.broadcast %c128_i32 : i32 to vector<2x192xi32>
    %39 = arith.cmpi sge, %29, %38 : vector<2x192xi32>
    %c160_i32 = arith.constant 160 : i32
    %40 = vector.broadcast %c160_i32 : i32 to vector<2x192xi32>
    %41 = arith.cmpi slt, %29, %40 : vector<2x192xi32>
    %42 = arith.andi %39, %41 : vector<2x192xi1>
    %43 = arith.ori %37, %42 : vector<2x192xi1>
    %cst_21 = arith.constant 0.000000e+00 : f32
    %44 = vector.broadcast %cst_21 : f32 to vector<2x64xf32>
    %45 = vector.extract_strided_slice %26 {offsets = [0, 0, 0], sizes = [2, 1, 192], strides = [1, 1, 1]} : vector<2x8x192xf32> to vector<2x1x192xf32>
    %46 = vector.shape_cast %45 : vector<2x1x192xf32> to vector<2x192xf32>
    %47 = vector.extract_strided_slice %26 {offsets = [0, 7, 0], sizes = [2, 1, 192], strides = [1, 1, 1]} : vector<2x8x192xf32> to vector<2x1x192xf32>
    %48 = vector.shape_cast %47 : vector<2x1x192xf32> to vector<2x192xf32>
    %49 = arith.select %43, %46, %48 : vector<2x192xi1>, vector<2x192xf32>
    %50 = arith.truncf %44 : vector<2x64xf32> to vector<2x64xbf16>
    %cst_22 = arith.constant dense<0.000000e+00> : vector<2x192xf32>
    %51 = tpu.matmul %50, %27, %cst_22 {dimension_numbers = #tpu.dot_dimension_numbers<[1], [0], [0], [1], [0, 0, 1, 1], [], []>} : vector<2x64xbf16>, vector<64x192xbf16>, vector<2x192xf32> -> vector<2x192xf32>
    %52 = vector.broadcast %28 : vector<1x192xf32> to vector<2x192xf32>
    %53 = arith.addf %51, %52 : vector<2x192xf32>
    %54 = vector.extract_strided_slice %49 {offsets = [0, 0], sizes = [2, 128], strides = [1, 1]} : vector<2x192xf32> to vector<2x128xf32>
    %55 = vector.extract_strided_slice %53 {offsets = [0, 0], sizes = [2, 128], strides = [1, 1]} : vector<2x192xf32> to vector<2x128xf32>
    %56 = arith.addf %54, %55 : vector<2x128xf32>
    %57 = arith.negf %56 : vector<2x128xf32>
    %58 = math.exp %57 : vector<2x128xf32>
    %cst_23 = arith.constant 1.000000e+00 : f32
    %59 = vector.broadcast %cst_23 : f32 to vector<2x128xf32>
    %60 = arith.addf %59, %58 : vector<2x128xf32>
    %61 = arith.divf %59, %60 : vector<2x128xf32>
    %62 = vector.extract_strided_slice %61 {offsets = [0, 0], sizes = [2, 64], strides = [1, 1]} : vector<2x128xf32> to vector<2x64xf32>
    %63 = vector.extract_strided_slice %61 {offsets = [0, 64], sizes = [2, 64], strides = [1, 1]} : vector<2x128xf32> to vector<2x64xf32>
    %64 = vector.extract_strided_slice %49 {offsets = [0, 128], sizes = [2, 64], strides = [1, 1]} : vector<2x192xf32> to vector<2x64xf32>
    %65 = vector.extract_strided_slice %53 {offsets = [0, 128], sizes = [2, 64], strides = [1, 1]} : vector<2x192xf32> to vector<2x64xf32>
    %66 = arith.mulf %62, %65 : vector<2x64xf32>
    %67 = arith.addf %64, %66 : vector<2x64xf32>
    %68 = math.tanh %67 : vector<2x64xf32>
    %cst_24 = arith.constant 1.000000e+00 : f32
    %69 = vector.broadcast %cst_24 : f32 to vector<2x64xf32>
    %70 = arith.subf %69, %63 : vector<2x64xf32>
    %71 = arith.mulf %70, %68 : vector<2x64xf32>
    %72 = arith.mulf %63, %44 : vector<2x64xf32>
    %73 = arith.addf %71, %72 : vector<2x64xf32>
    %74 = vector.extract_strided_slice %73 {offsets = [0, 0], sizes = [2, 32], strides = [1, 1]} : vector<2x64xf32> to vector<2x32xf32>
    %c0_25 = arith.constant 0 : index
    %c0_26 = arith.constant 0 : index
    %75 = vector.load %arg12[%c0_25, %c0_26] : memref<16x64xf32, #tpu.memory_space<vmem>>, vector<2x32xf32>
    tpu.vector_store %arg12[%c0_25, %c0_26], %74 {strides = array<i32>} : memref<16x64xf32, #tpu.memory_space<vmem>>, vector<2x32xf32>,
    %76 = vector.extract_strided_slice %73 {offsets = [0, 32], sizes = [2, 32], strides = [1, 1]} : vector<2x64xf32> to vector<2x32xf32>
    %c14 = arith.constant 14 : index
    %c32 = arith.constant 32 : index
    %77 = vector.load %arg12[%c14, %c32] : memref<16x64xf32, #tpu.memory_space<vmem>>, vector<2x32xf32>
    tpu.vector_store %arg12[%c14, %c32], %76 {strides = array<i32>} : memref<16x64xf32, #tpu.memory_space<vmem>>, vector<2x32xf32>,
    %78 = vector.extract_strided_slice %26 {offsets = [0, 1, 0], sizes = [2, 1, 192], strides = [1, 1, 1]} : vector<2x8x192xf32> to vector<2x1x192xf32>
    %79 = vector.shape_cast %78 : vector<2x1x192xf32> to vector<2x192xf32>
    %80 = vector.extract_strided_slice %26 {offsets = [0, 6, 0], sizes = [2, 1, 192], strides = [1, 1, 1]} : vector<2x8x192xf32> to vector<2x1x192xf32>
    %81 = vector.shape_cast %80 : vector<2x1x192xf32> to vector<2x192xf32>
    %82 = arith.select %43, %79, %81 : vector<2x192xi1>, vector<2x192xf32>
    %83 = arith.truncf %73 : vector<2x64xf32> to vector<2x64xbf16>
    %cst_27 = arith.constant dense<0.000000e+00> : vector<2x192xf32>
    %84 = tpu.matmul %83, %27, %cst_27 {dimension_numbers = #tpu.dot_dimension_numbers<[1], [0], [0], [1], [0, 0, 1, 1], [], []>} : vector<2x64xbf16>, vector<64x192xbf16>, vector<2x192xf32> -> vector<2x192xf32>
    %85 = vector.broadcast %28 : vector<1x192xf32> to vector<2x192xf32>
    %86 = arith.addf %84, %85 : vector<2x192xf32>
    %87 = vector.extract_strided_slice %82 {offsets = [0, 0], sizes = [2, 128], strides = [1, 1]} : vector<2x192xf32> to vector<2x128xf32>
    %88 = vector.extract_strided_slice %86 {offsets = [0, 0], sizes = [2, 128], strides = [1, 1]} : vector<2x192xf32> to vector<2x128xf32>
    %89 = arith.addf %87, %88 : vector<2x128xf32>
    %90 = arith.negf %89 : vector<2x128xf32>
    %91 = math.exp %90 : vector<2x128xf32>
    %cst_28 = arith.constant 1.000000e+00 : f32
    %92 = vector.broadcast %cst_28 : f32 to vector<2x128xf32>
    %93 = arith.addf %92, %91 : vector<2x128xf32>
    %94 = arith.divf %92, %93 : vector<2x128xf32>
    %95 = vector.extract_strided_slice %94 {offsets = [0, 0], sizes = [2, 64], strides = [1, 1]} : vector<2x128xf32> to vector<2x64xf32>
    %96 = vector.extract_strided_slice %94 {offsets = [0, 64], sizes = [2, 64], strides = [1, 1]} : vector<2x128xf32> to vector<2x64xf32>
    %97 = vector.extract_strided_slice %82 {offsets = [0, 128], sizes = [2, 64], strides = [1, 1]} : vector<2x192xf32> to vector<2x64xf32>
    %98 = vector.extract_strided_slice %86 {offsets = [0, 128], sizes = [2, 64], strides = [1, 1]} : vector<2x192xf32> to vector<2x64xf32>
    %99 = arith.mulf %95, %98 : vector<2x64xf32>
    %100 = arith.addf %97, %99 : vector<2x64xf32>
    %101 = math.tanh %100 : vector<2x64xf32>
    %cst_29 = arith.constant 1.000000e+00 : f32
    %102 = vector.broadcast %cst_29 : f32 to vector<2x64xf32>
    %103 = arith.subf %102, %96 : vector<2x64xf32>
    %104 = arith.mulf %103, %101 : vector<2x64xf32>
    %105 = arith.mulf %96, %73 : vector<2x64xf32>
    %106 = arith.addf %104, %105 : vector<2x64xf32>
    %107 = vector.extract_strided_slice %106 {offsets = [0, 0], sizes = [2, 32], strides = [1, 1]} : vector<2x64xf32> to vector<2x32xf32>
    %c2_30 = arith.constant 2 : index
    %c0_31 = arith.constant 0 : index
    %108 = vector.load %arg12[%c2_30, %c0_31] : memref<16x64xf32, #tpu.memory_space<vmem>>, vector<2x32xf32>
    tpu.vector_store %arg12[%c2_30, %c0_31], %107 {strides = array<i32>} : memref<16x64xf32, #tpu.memory_space<vmem>>, vector<2x32xf32>,
    %109 = vector.extract_strided_slice %106 {offsets = [0, 32], sizes = [2, 32], strides = [1, 1]} : vector<2x64xf32> to vector<2x32xf32>
    %c12 = arith.constant 12 : index
    %c32_32 = arith.constant 32 : index
    %110 = vector.load %arg12[%c12, %c32_32] : memref<16x64xf32, #tpu.memory_space<vmem>>, vector<2x32xf32>
    tpu.vector_store %arg12[%c12, %c32_32], %109 {strides = array<i32>} : memref<16x64xf32, #tpu.memory_space<vmem>>, vector<2x32xf32>,
    %111 = vector.extract_strided_slice %26 {offsets = [0, 2, 0], sizes = [2, 1, 192], strides = [1, 1, 1]} : vector<2x8x192xf32> to vector<2x1x192xf32>
    %112 = vector.shape_cast %111 : vector<2x1x192xf32> to vector<2x192xf32>
    %113 = vector.extract_strided_slice %26 {offsets = [0, 5, 0], sizes = [2, 1, 192], strides = [1, 1, 1]} : vector<2x8x192xf32> to vector<2x1x192xf32>
    %114 = vector.shape_cast %113 : vector<2x1x192xf32> to vector<2x192xf32>
    %115 = arith.select %43, %112, %114 : vector<2x192xi1>, vector<2x192xf32>
    %116 = arith.truncf %106 : vector<2x64xf32> to vector<2x64xbf16>
    %cst_33 = arith.constant dense<0.000000e+00> : vector<2x192xf32>
    %117 = tpu.matmul %116, %27, %cst_33 {dimension_numbers = #tpu.dot_dimension_numbers<[1], [0], [0], [1], [0, 0, 1, 1], [], []>} : vector<2x64xbf16>, vector<64x192xbf16>, vector<2x192xf32> -> vector<2x192xf32>
    %118 = vector.broadcast %28 : vector<1x192xf32> to vector<2x192xf32>
    %119 = arith.addf %117, %118 : vector<2x192xf32>
    %120 = vector.extract_strided_slice %115 {offsets = [0, 0], sizes = [2, 128], strides = [1, 1]} : vector<2x192xf32> to vector<2x128xf32>
    %121 = vector.extract_strided_slice %119 {offsets = [0, 0], sizes = [2, 128], strides = [1, 1]} : vector<2x192xf32> to vector<2x128xf32>
    %122 = arith.addf %120, %121 : vector<2x128xf32>
    %123 = arith.negf %122 : vector<2x128xf32>
    %124 = math.exp %123 : vector<2x128xf32>
    %cst_34 = arith.constant 1.000000e+00 : f32
    %125 = vector.broadcast %cst_34 : f32 to vector<2x128xf32>
    %126 = arith.addf %125, %124 : vector<2x128xf32>
    %127 = arith.divf %125, %126 : vector<2x128xf32>
    %128 = vector.extract_strided_slice %127 {offsets = [0, 0], sizes = [2, 64], strides = [1, 1]} : vector<2x128xf32> to vector<2x64xf32>
    %129 = vector.extract_strided_slice %127 {offsets = [0, 64], sizes = [2, 64], strides = [1, 1]} : vector<2x128xf32> to vector<2x64xf32>
    %130 = vector.extract_strided_slice %115 {offsets = [0, 128], sizes = [2, 64], strides = [1, 1]} : vector<2x192xf32> to vector<2x64xf32>
    %131 = vector.extract_strided_slice %119 {offsets = [0, 128], sizes = [2, 64], strides = [1, 1]} : vector<2x192xf32> to vector<2x64xf32>
    %132 = arith.mulf %128, %131 : vector<2x64xf32>
    %133 = arith.addf %130, %132 : vector<2x64xf32>
    %134 = math.tanh %133 : vector<2x64xf32>
    %cst_35 = arith.constant 1.000000e+00 : f32
    %135 = vector.broadcast %cst_35 : f32 to vector<2x64xf32>
    %136 = arith.subf %135, %129 : vector<2x64xf32>
    %137 = arith.mulf %136, %134 : vector<2x64xf32>
    %138 = arith.mulf %129, %106 : vector<2x64xf32>
    %139 = arith.addf %137, %138 : vector<2x64xf32>
    %140 = vector.extract_strided_slice %139 {offsets = [0, 0], sizes = [2, 32], strides = [1, 1]} : vector<2x64xf32> to vector<2x32xf32>
    %c4 = arith.constant 4 : index
    %c0_36 = arith.constant 0 : index
    %141 = vector.load %arg12[%c4, %c0_36] : memref<16x64xf32, #tpu.memory_space<vmem>>, vector<2x32xf32>
    tpu.vector_store %arg12[%c4, %c0_36], %140 {strides = array<i32>} : memref<16x64xf32, #tpu.memory_space<vmem>>, vector<2x32xf32>,
    %142 = vector.extract_strided_slice %139 {offsets = [0, 32], sizes = [2, 32], strides = [1, 1]} : vector<2x64xf32> to vector<2x32xf32>
    %c10 = arith.constant 10 : index
    %c32_37 = arith.constant 32 : index
    %143 = vector.load %arg12[%c10, %c32_37] : memref<16x64xf32, #tpu.memory_space<vmem>>, vector<2x32xf32>
    tpu.vector_store %arg12[%c10, %c32_37], %142 {strides = array<i32>} : memref<16x64xf32, #tpu.memory_space<vmem>>, vector<2x32xf32>,
    %144 = vector.extract_strided_slice %26 {offsets = [0, 3, 0], sizes = [2, 1, 192], strides = [1, 1, 1]} : vector<2x8x192xf32> to vector<2x1x192xf32>
    %145 = vector.shape_cast %144 : vector<2x1x192xf32> to vector<2x192xf32>
    %146 = vector.extract_strided_slice %26 {offsets = [0, 4, 0], sizes = [2, 1, 192], strides = [1, 1, 1]} : vector<2x8x192xf32> to vector<2x1x192xf32>
    %147 = vector.shape_cast %146 : vector<2x1x192xf32> to vector<2x192xf32>
    %148 = arith.select %43, %145, %147 : vector<2x192xi1>, vector<2x192xf32>
    %149 = arith.truncf %139 : vector<2x64xf32> to vector<2x64xbf16>
    %cst_38 = arith.constant dense<0.000000e+00> : vector<2x192xf32>
    %150 = tpu.matmul %149, %27, %cst_38 {dimension_numbers = #tpu.dot_dimension_numbers<[1], [0], [0], [1], [0, 0, 1, 1], [], []>} : vector<2x64xbf16>, vector<64x192xbf16>, vector<2x192xf32> -> vector<2x192xf32>
    %151 = vector.broadcast %28 : vector<1x192xf32> to vector<2x192xf32>
    %152 = arith.addf %150, %151 : vector<2x192xf32>
    %153 = vector.extract_strided_slice %148 {offsets = [0, 0], sizes = [2, 128], strides = [1, 1]} : vector<2x192xf32> to vector<2x128xf32>
    %154 = vector.extract_strided_slice %152 {offsets = [0, 0], sizes = [2, 128], strides = [1, 1]} : vector<2x192xf32> to vector<2x128xf32>
    %155 = arith.addf %153, %154 : vector<2x128xf32>
    %156 = arith.negf %155 : vector<2x128xf32>
    %157 = math.exp %156 : vector<2x128xf32>
    %cst_39 = arith.constant 1.000000e+00 : f32
    %158 = vector.broadcast %cst_39 : f32 to vector<2x128xf32>
    %159 = arith.addf %158, %157 : vector<2x128xf32>
    %160 = arith.divf %158, %159 : vector<2x128xf32>
    %161 = vector.extract_strided_slice %160 {offsets = [0, 0], sizes = [2, 64], strides = [1, 1]} : vector<2x128xf32> to vector<2x64xf32>
    %162 = vector.extract_strided_slice %160 {offsets = [0, 64], sizes = [2, 64], strides = [1, 1]} : vector<2x128xf32> to vector<2x64xf32>
    %163 = vector.extract_strided_slice %148 {offsets = [0, 128], sizes = [2, 64], strides = [1, 1]} : vector<2x192xf32> to vector<2x64xf32>
    %164 = vector.extract_strided_slice %152 {offsets = [0, 128], sizes = [2, 64], strides = [1, 1]} : vector<2x192xf32> to vector<2x64xf32>
    %165 = arith.mulf %161, %164 : vector<2x64xf32>
    %166 = arith.addf %163, %165 : vector<2x64xf32>
    %167 = math.tanh %166 : vector<2x64xf32>
    %cst_40 = arith.constant 1.000000e+00 : f32
    %168 = vector.broadcast %cst_40 : f32 to vector<2x64xf32>
    %169 = arith.subf %168, %162 : vector<2x64xf32>
    %170 = arith.mulf %169, %167 : vector<2x64xf32>
    %171 = arith.mulf %162, %139 : vector<2x64xf32>
    %172 = arith.addf %170, %171 : vector<2x64xf32>
    %173 = vector.extract_strided_slice %172 {offsets = [0, 0], sizes = [2, 32], strides = [1, 1]} : vector<2x64xf32> to vector<2x32xf32>
    %c6 = arith.constant 6 : index
    %c0_41 = arith.constant 0 : index
    %174 = vector.load %arg12[%c6, %c0_41] : memref<16x64xf32, #tpu.memory_space<vmem>>, vector<2x32xf32>
    tpu.vector_store %arg12[%c6, %c0_41], %173 {strides = array<i32>} : memref<16x64xf32, #tpu.memory_space<vmem>>, vector<2x32xf32>,
    %175 = vector.extract_strided_slice %172 {offsets = [0, 32], sizes = [2, 32], strides = [1, 1]} : vector<2x64xf32> to vector<2x32xf32>
    %c8 = arith.constant 8 : index
    %c32_42 = arith.constant 32 : index
    %176 = vector.load %arg12[%c8, %c32_42] : memref<16x64xf32, #tpu.memory_space<vmem>>, vector<2x32xf32>
    tpu.vector_store %arg12[%c8, %c32_42], %175 {strides = array<i32>} : memref<16x64xf32, #tpu.memory_space<vmem>>, vector<2x32xf32>,
    %177 = vector.extract_strided_slice %26 {offsets = [0, 4, 0], sizes = [2, 1, 192], strides = [1, 1, 1]} : vector<2x8x192xf32> to vector<2x1x192xf32>
    %178 = vector.shape_cast %177 : vector<2x1x192xf32> to vector<2x192xf32>
    %179 = vector.extract_strided_slice %26 {offsets = [0, 3, 0], sizes = [2, 1, 192], strides = [1, 1, 1]} : vector<2x8x192xf32> to vector<2x1x192xf32>
    %180 = vector.shape_cast %179 : vector<2x1x192xf32> to vector<2x192xf32>
    %181 = arith.select %43, %178, %180 : vector<2x192xi1>, vector<2x192xf32>
    %182 = arith.truncf %172 : vector<2x64xf32> to vector<2x64xbf16>
    %cst_43 = arith.constant dense<0.000000e+00> : vector<2x192xf32>
    %183 = tpu.matmul %182, %27, %cst_43 {dimension_numbers = #tpu.dot_dimension_numbers<[1], [0], [0], [1], [0, 0, 1, 1], [], []>} : vector<2x64xbf16>, vector<64x192xbf16>, vector<2x192xf32> -> vector<2x192xf32>
    %184 = vector.broadcast %28 : vector<1x192xf32> to vector<2x192xf32>
    %185 = arith.addf %183, %184 : vector<2x192xf32>
    %186 = vector.extract_strided_slice %181 {offsets = [0, 0], sizes = [2, 128], strides = [1, 1]} : vector<2x192xf32> to vector<2x128xf32>
    %187 = vector.extract_strided_slice %185 {offsets = [0, 0], sizes = [2, 128], strides = [1, 1]} : vector<2x192xf32> to vector<2x128xf32>
    %188 = arith.addf %186, %187 : vector<2x128xf32>
    %189 = arith.negf %188 : vector<2x128xf32>
    %190 = math.exp %189 : vector<2x128xf32>
    %cst_44 = arith.constant 1.000000e+00 : f32
    %191 = vector.broadcast %cst_44 : f32 to vector<2x128xf32>
    %192 = arith.addf %191, %190 : vector<2x128xf32>
    %193 = arith.divf %191, %192 : vector<2x128xf32>
    %194 = vector.extract_strided_slice %193 {offsets = [0, 0], sizes = [2, 64], strides = [1, 1]} : vector<2x128xf32> to vector<2x64xf32>
    %195 = vector.extract_strided_slice %193 {offsets = [0, 64], sizes = [2, 64], strides = [1, 1]} : vector<2x128xf32> to vector<2x64xf32>
    %196 = vector.extract_strided_slice %181 {offsets = [0, 128], sizes = [2, 64], strides = [1, 1]} : vector<2x192xf32> to vector<2x64xf32>
    %197 = vector.extract_strided_slice %185 {offsets = [0, 128], sizes = [2, 64], strides = [1, 1]} : vector<2x192xf32> to vector<2x64xf32>
    %198 = arith.mulf %194, %197 : vector<2x64xf32>
    %199 = arith.addf %196, %198 : vector<2x64xf32>
    %200 = math.tanh %199 : vector<2x64xf32>
    %cst_45 = arith.constant 1.000000e+00 : f32
    %201 = vector.broadcast %cst_45 : f32 to vector<2x64xf32>
    %202 = arith.subf %201, %195 : vector<2x64xf32>
    %203 = arith.mulf %202, %200 : vector<2x64xf32>
    %204 = arith.mulf %195, %172 : vector<2x64xf32>
    %205 = arith.addf %203, %204 : vector<2x64xf32>
    %206 = vector.extract_strided_slice %205 {offsets = [0, 0], sizes = [2, 32], strides = [1, 1]} : vector<2x64xf32> to vector<2x32xf32>
    %c8_46 = arith.constant 8 : index
    %c0_47 = arith.constant 0 : index
    %207 = vector.load %arg12[%c8_46, %c0_47] : memref<16x64xf32, #tpu.memory_space<vmem>>, vector<2x32xf32>
    tpu.vector_store %arg12[%c8_46, %c0_47], %206 {strides = array<i32>} : memref<16x64xf32, #tpu.memory_space<vmem>>, vector<2x32xf32>,
    %208 = vector.extract_strided_slice %205 {offsets = [0, 32], sizes = [2, 32], strides = [1, 1]} : vector<2x64xf32> to vector<2x32xf32>
    %c6_48 = arith.constant 6 : index
    %c32_49 = arith.constant 32 : index
    %209 = vector.load %arg12[%c6_48, %c32_49] : memref<16x64xf32, #tpu.memory_space<vmem>>, vector<2x32xf32>
    tpu.vector_store %arg12[%c6_48, %c32_49], %208 {strides = array<i32>} : memref<16x64xf32, #tpu.memory_space<vmem>>, vector<2x32xf32>,
    %210 = vector.extract_strided_slice %26 {offsets = [0, 5, 0], sizes = [2, 1, 192], strides = [1, 1, 1]} : vector<2x8x192xf32> to vector<2x1x192xf32>
    %211 = vector.shape_cast %210 : vector<2x1x192xf32> to vector<2x192xf32>
    %212 = vector.extract_strided_slice %26 {offsets = [0, 2, 0], sizes = [2, 1, 192], strides = [1, 1, 1]} : vector<2x8x192xf32> to vector<2x1x192xf32>
    %213 = vector.shape_cast %212 : vector<2x1x192xf32> to vector<2x192xf32>
    %214 = arith.select %43, %211, %213 : vector<2x192xi1>, vector<2x192xf32>
    %215 = arith.truncf %205 : vector<2x64xf32> to vector<2x64xbf16>
    %cst_50 = arith.constant dense<0.000000e+00> : vector<2x192xf32>
    %216 = tpu.matmul %215, %27, %cst_50 {dimension_numbers = #tpu.dot_dimension_numbers<[1], [0], [0], [1], [0, 0, 1, 1], [], []>} : vector<2x64xbf16>, vector<64x192xbf16>, vector<2x192xf32> -> vector<2x192xf32>
    %217 = vector.broadcast %28 : vector<1x192xf32> to vector<2x192xf32>
    %218 = arith.addf %216, %217 : vector<2x192xf32>
    %219 = vector.extract_strided_slice %214 {offsets = [0, 0], sizes = [2, 128], strides = [1, 1]} : vector<2x192xf32> to vector<2x128xf32>
    %220 = vector.extract_strided_slice %218 {offsets = [0, 0], sizes = [2, 128], strides = [1, 1]} : vector<2x192xf32> to vector<2x128xf32>
    %221 = arith.addf %219, %220 : vector<2x128xf32>
    %222 = arith.negf %221 : vector<2x128xf32>
    %223 = math.exp %222 : vector<2x128xf32>
    %cst_51 = arith.constant 1.000000e+00 : f32
    %224 = vector.broadcast %cst_51 : f32 to vector<2x128xf32>
    %225 = arith.addf %224, %223 : vector<2x128xf32>
    %226 = arith.divf %224, %225 : vector<2x128xf32>
    %227 = vector.extract_strided_slice %226 {offsets = [0, 0], sizes = [2, 64], strides = [1, 1]} : vector<2x128xf32> to vector<2x64xf32>
    %228 = vector.extract_strided_slice %226 {offsets = [0, 64], sizes = [2, 64], strides = [1, 1]} : vector<2x128xf32> to vector<2x64xf32>
    %229 = vector.extract_strided_slice %214 {offsets = [0, 128], sizes = [2, 64], strides = [1, 1]} : vector<2x192xf32> to vector<2x64xf32>
    %230 = vector.extract_strided_slice %218 {offsets = [0, 128], sizes = [2, 64], strides = [1, 1]} : vector<2x192xf32> to vector<2x64xf32>
    %231 = arith.mulf %227, %230 : vector<2x64xf32>
    %232 = arith.addf %229, %231 : vector<2x64xf32>
    %233 = math.tanh %232 : vector<2x64xf32>
    %cst_52 = arith.constant 1.000000e+00 : f32
    %234 = vector.broadcast %cst_52 : f32 to vector<2x64xf32>
    %235 = arith.subf %234, %228 : vector<2x64xf32>
    %236 = arith.mulf %235, %233 : vector<2x64xf32>
    %237 = arith.mulf %228, %205 : vector<2x64xf32>
    %238 = arith.addf %236, %237 : vector<2x64xf32>
    %239 = vector.extract_strided_slice %238 {offsets = [0, 0], sizes = [2, 32], strides = [1, 1]} : vector<2x64xf32> to vector<2x32xf32>
    %c10_53 = arith.constant 10 : index
    %c0_54 = arith.constant 0 : index
    %240 = vector.load %arg12[%c10_53, %c0_54] : memref<16x64xf32, #tpu.memory_space<vmem>>, vector<2x32xf32>
    tpu.vector_store %arg12[%c10_53, %c0_54], %239 {strides = array<i32>} : memref<16x64xf32, #tpu.memory_space<vmem>>, vector<2x32xf32>,
    %241 = vector.extract_strided_slice %238 {offsets = [0, 32], sizes = [2, 32], strides = [1, 1]} : vector<2x64xf32> to vector<2x32xf32>
    %c4_55 = arith.constant 4 : index
    %c32_56 = arith.constant 32 : index
    %242 = vector.load %arg12[%c4_55, %c32_56] : memref<16x64xf32, #tpu.memory_space<vmem>>, vector<2x32xf32>
    tpu.vector_store %arg12[%c4_55, %c32_56], %241 {strides = array<i32>} : memref<16x64xf32, #tpu.memory_space<vmem>>, vector<2x32xf32>,
    %243 = vector.extract_strided_slice %26 {offsets = [0, 6, 0], sizes = [2, 1, 192], strides = [1, 1, 1]} : vector<2x8x192xf32> to vector<2x1x192xf32>
    %244 = vector.shape_cast %243 : vector<2x1x192xf32> to vector<2x192xf32>
    %245 = vector.extract_strided_slice %26 {offsets = [0, 1, 0], sizes = [2, 1, 192], strides = [1, 1, 1]} : vector<2x8x192xf32> to vector<2x1x192xf32>
    %246 = vector.shape_cast %245 : vector<2x1x192xf32> to vector<2x192xf32>
    %247 = arith.select %43, %244, %246 : vector<2x192xi1>, vector<2x192xf32>
    %248 = arith.truncf %238 : vector<2x64xf32> to vector<2x64xbf16>
    %cst_57 = arith.constant dense<0.000000e+00> : vector<2x192xf32>
    %249 = tpu.matmul %248, %27, %cst_57 {dimension_numbers = #tpu.dot_dimension_numbers<[1], [0], [0], [1], [0, 0, 1, 1], [], []>} : vector<2x64xbf16>, vector<64x192xbf16>, vector<2x192xf32> -> vector<2x192xf32>
    %250 = vector.broadcast %28 : vector<1x192xf32> to vector<2x192xf32>
    %251 = arith.addf %249, %250 : vector<2x192xf32>
    %252 = vector.extract_strided_slice %247 {offsets = [0, 0], sizes = [2, 128], strides = [1, 1]} : vector<2x192xf32> to vector<2x128xf32>
    %253 = vector.extract_strided_slice %251 {offsets = [0, 0], sizes = [2, 128], strides = [1, 1]} : vector<2x192xf32> to vector<2x128xf32>
    %254 = arith.addf %252, %253 : vector<2x128xf32>
    %255 = arith.negf %254 : vector<2x128xf32>
    %256 = math.exp %255 : vector<2x128xf32>
    %cst_58 = arith.constant 1.000000e+00 : f32
    %257 = vector.broadcast %cst_58 : f32 to vector<2x128xf32>
    %258 = arith.addf %257, %256 : vector<2x128xf32>
    %259 = arith.divf %257, %258 : vector<2x128xf32>
    %260 = vector.extract_strided_slice %259 {offsets = [0, 0], sizes = [2, 64], strides = [1, 1]} : vector<2x128xf32> to vector<2x64xf32>
    %261 = vector.extract_strided_slice %259 {offsets = [0, 64], sizes = [2, 64], strides = [1, 1]} : vector<2x128xf32> to vector<2x64xf32>
    %262 = vector.extract_strided_slice %247 {offsets = [0, 128], sizes = [2, 64], strides = [1, 1]} : vector<2x192xf32> to vector<2x64xf32>
    %263 = vector.extract_strided_slice %251 {offsets = [0, 128], sizes = [2, 64], strides = [1, 1]} : vector<2x192xf32> to vector<2x64xf32>
    %264 = arith.mulf %260, %263 : vector<2x64xf32>
    %265 = arith.addf %262, %264 : vector<2x64xf32>
    %266 = math.tanh %265 : vector<2x64xf32>
    %cst_59 = arith.constant 1.000000e+00 : f32
    %267 = vector.broadcast %cst_59 : f32 to vector<2x64xf32>
    %268 = arith.subf %267, %261 : vector<2x64xf32>
    %269 = arith.mulf %268, %266 : vector<2x64xf32>
    %270 = arith.mulf %261, %238 : vector<2x64xf32>
    %271 = arith.addf %269, %270 : vector<2x64xf32>
    %272 = vector.extract_strided_slice %271 {offsets = [0, 0], sizes = [2, 32], strides = [1, 1]} : vector<2x64xf32> to vector<2x32xf32>
    %c12_60 = arith.constant 12 : index
    %c0_61 = arith.constant 0 : index
    %273 = vector.load %arg12[%c12_60, %c0_61] : memref<16x64xf32, #tpu.memory_space<vmem>>, vector<2x32xf32>
    tpu.vector_store %arg12[%c12_60, %c0_61], %272 {strides = array<i32>} : memref<16x64xf32, #tpu.memory_space<vmem>>, vector<2x32xf32>,
    %274 = vector.extract_strided_slice %271 {offsets = [0, 32], sizes = [2, 32], strides = [1, 1]} : vector<2x64xf32> to vector<2x32xf32>
    %c2_62 = arith.constant 2 : index
    %c32_63 = arith.constant 32 : index
    %275 = vector.load %arg12[%c2_62, %c32_63] : memref<16x64xf32, #tpu.memory_space<vmem>>, vector<2x32xf32>
    tpu.vector_store %arg12[%c2_62, %c32_63], %274 {strides = array<i32>} : memref<16x64xf32, #tpu.memory_space<vmem>>, vector<2x32xf32>,
    %276 = vector.extract_strided_slice %26 {offsets = [0, 7, 0], sizes = [2, 1, 192], strides = [1, 1, 1]} : vector<2x8x192xf32> to vector<2x1x192xf32>
    %277 = vector.shape_cast %276 : vector<2x1x192xf32> to vector<2x192xf32>
    %278 = vector.extract_strided_slice %26 {offsets = [0, 0, 0], sizes = [2, 1, 192], strides = [1, 1, 1]} : vector<2x8x192xf32> to vector<2x1x192xf32>
    %279 = vector.shape_cast %278 : vector<2x1x192xf32> to vector<2x192xf32>
    %280 = arith.select %43, %277, %279 : vector<2x192xi1>, vector<2x192xf32>
    %281 = arith.truncf %271 : vector<2x64xf32> to vector<2x64xbf16>
    %cst_64 = arith.constant dense<0.000000e+00> : vector<2x192xf32>
    %282 = tpu.matmul %281, %27, %cst_64 {dimension_numbers = #tpu.dot_dimension_numbers<[1], [0], [0], [1], [0, 0, 1, 1], [], []>} : vector<2x64xbf16>, vector<64x192xbf16>, vector<2x192xf32> -> vector<2x192xf32>
    %283 = vector.broadcast %28 : vector<1x192xf32> to vector<2x192xf32>
    %284 = arith.addf %282, %283 : vector<2x192xf32>
    %285 = vector.extract_strided_slice %280 {offsets = [0, 0], sizes = [2, 128], strides = [1, 1]} : vector<2x192xf32> to vector<2x128xf32>
    %286 = vector.extract_strided_slice %284 {offsets = [0, 0], sizes = [2, 128], strides = [1, 1]} : vector<2x192xf32> to vector<2x128xf32>
    %287 = arith.addf %285, %286 : vector<2x128xf32>
    %288 = arith.negf %287 : vector<2x128xf32>
    %289 = math.exp %288 : vector<2x128xf32>
    %cst_65 = arith.constant 1.000000e+00 : f32
    %290 = vector.broadcast %cst_65 : f32 to vector<2x128xf32>
    %291 = arith.addf %290, %289 : vector<2x128xf32>
    %292 = arith.divf %290, %291 : vector<2x128xf32>
    %293 = vector.extract_strided_slice %292 {offsets = [0, 0], sizes = [2, 64], strides = [1, 1]} : vector<2x128xf32> to vector<2x64xf32>
    %294 = vector.extract_strided_slice %292 {offsets = [0, 64], sizes = [2, 64], strides = [1, 1]} : vector<2x128xf32> to vector<2x64xf32>
    %295 = vector.extract_strided_slice %280 {offsets = [0, 128], sizes = [2, 64], strides = [1, 1]} : vector<2x192xf32> to vector<2x64xf32>
    %296 = vector.extract_strided_slice %284 {offsets = [0, 128], sizes = [2, 64], strides = [1, 1]} : vector<2x192xf32> to vector<2x64xf32>
    %297 = arith.mulf %293, %296 : vector<2x64xf32>
    %298 = arith.addf %295, %297 : vector<2x64xf32>
    %299 = math.tanh %298 : vector<2x64xf32>
    %cst_66 = arith.constant 1.000000e+00 : f32
    %300 = vector.broadcast %cst_66 : f32 to vector<2x64xf32>
    %301 = arith.subf %300, %294 : vector<2x64xf32>
    %302 = arith.mulf %301, %299 : vector<2x64xf32>
    %303 = arith.mulf %294, %271 : vector<2x64xf32>
    %304 = arith.addf %302, %303 : vector<2x64xf32>
    %305 = vector.extract_strided_slice %304 {offsets = [0, 0], sizes = [2, 32], strides = [1, 1]} : vector<2x64xf32> to vector<2x32xf32>
    %c14_67 = arith.constant 14 : index
    %c0_68 = arith.constant 0 : index
    %306 = vector.load %arg12[%c14_67, %c0_68] : memref<16x64xf32, #tpu.memory_space<vmem>>, vector<2x32xf32>
    tpu.vector_store %arg12[%c14_67, %c0_68], %305 {strides = array<i32>} : memref<16x64xf32, #tpu.memory_space<vmem>>, vector<2x32xf32>,
    %307 = vector.extract_strided_slice %304 {offsets = [0, 32], sizes = [2, 32], strides = [1, 1]} : vector<2x64xf32> to vector<2x32xf32>
    %c0_69 = arith.constant 0 : index
    %c32_70 = arith.constant 32 : index
    %308 = vector.load %arg12[%c0_69, %c32_70] : memref<16x64xf32, #tpu.memory_space<vmem>>, vector<2x32xf32>
    tpu.vector_store %arg12[%c0_69, %c32_70], %307 {strides = array<i32>} : memref<16x64xf32, #tpu.memory_space<vmem>>, vector<2x32xf32>,
    %c0_71 = arith.constant 0 : index
    %c0_72 = arith.constant 0 : index
    %309 = vector.load %arg12[%c0_71, %c0_72] : memref<16x64xf32, #tpu.memory_space<vmem>>, vector<16x64xf32>
    %cst_73 = arith.constant 0.000000e+00 : f32
    %310 = vector.broadcast %cst_73 : f32 to vector<16x64xf32>
    %311 = arith.maximumf %309, %310 : vector<16x64xf32>
    %312 = arith.truncf %311 : vector<16x64xf32> to vector<16x64xbf16>
    %c0_74 = arith.constant 0 : index
    %c0_75 = arith.constant 0 : index
    %313 = vector.load %arg7[%c0_74, %c0_75] : memref<64x64xbf16, #tpu.memory_space<vmem>>, vector<64x64xbf16>
    %cst_76 = arith.constant dense<0.000000e+00> : vector<16x64xf32>
    %314 = tpu.matmul %312, %313, %cst_76 {dimension_numbers = #tpu.dot_dimension_numbers<[1], [0], [0], [1], [0, 0, 1, 1], [], []>} : vector<16x64xbf16>, vector<64x64xbf16>, vector<16x64xf32> -> vector<16x64xf32>
    %c0_77 = arith.constant 0 : index
    %c0_78 = arith.constant 0 : index
    %315 = vector.load %arg8[%c0_77, %c0_78] : memref<1x64xf32, #tpu.memory_space<vmem>>, vector<1x64xf32>
    %316 = vector.broadcast %315 : vector<1x64xf32> to vector<16x64xf32>
    %317 = arith.addf %314, %316 : vector<16x64xf32>
    %cst_79 = arith.constant 0.000000e+00 : f32
    %318 = vector.broadcast %cst_79 : f32 to vector<16x64xf32>
    %319 = arith.maximumf %317, %318 : vector<16x64xf32>
    %320 = arith.truncf %319 : vector<16x64xf32> to vector<16x64xbf16>
    %c0_80 = arith.constant 0 : index
    %c0_81 = arith.constant 0 : index
    %321 = vector.load %arg9[%c0_80, %c0_81] : memref<64x4xbf16, #tpu.memory_space<vmem>>, vector<64x4xbf16>
    %cst_82 = arith.constant dense<0.000000e+00> : vector<16x4xf32>
    %322 = tpu.matmul %320, %321, %cst_82 {dimension_numbers = #tpu.dot_dimension_numbers<[1], [0], [0], [1], [0, 0, 1, 1], [], []>} : vector<16x64xbf16>, vector<64x4xbf16>, vector<16x4xf32> -> vector<16x4xf32>
    %c0_83 = arith.constant 0 : index
    %c0_84 = arith.constant 0 : index
    %323 = vector.load %arg10[%c0_83, %c0_84] : memref<1x4xf32, #tpu.memory_space<vmem>>, vector<1x4xf32>
    %324 = vector.broadcast %323 : vector<1x4xf32> to vector<16x4xf32>
    %325 = arith.addf %322, %324 : vector<16x4xf32>
    %326 = vector.shape_cast %325 : vector<16x4xf32> to vector<8x2x4xf32>
    %cst_85 = arith.constant dense<0.000000e+00> : vector<2x4xf32>
    %327 = vector.multi_reduction <add>, %326, %cst_85 [0] : vector<8x2x4xf32> to vector<2x4xf32>
    %c0_86 = arith.constant 0 : index
    %c0_87 = arith.constant 0 : index
    %328 = vector.load %arg11[%c0_86, %c0_87] : memref<2x4xf32, #tpu.memory_space<vmem>>, vector<2x4xf32>
    tpu.vector_store %arg11[%c0_86, %c0_87], %327 {strides = array<i32>} : memref<2x4xf32, #tpu.memory_space<vmem>>, vector<2x4xf32>,
    return
  }
}

</mosaic_0001>

<bundles_post_ra>
// kernel: forward_pallas.1
= control target key start
LH: loop header
LB: loop body
LE: loop exit
PB: predicated region body
PF: predicated region fallthrough
CT: control target
= control target key end

     0   :  { %s6599_s0 = inlined_call_operand.vmem [shape: bf16[48,3072], index: 0, kind: input, shape index: {}]   ;;  %s6600_s1 = inlined_call_operand.vmem [shape: bf16[3072,64], index: 1, kind: input, shape index: {}]   ;;  %s6601_s2 = inlined_call_operand.vmem [shape: f32[1,64], index: 2, kind: input, shape index: {}]   ;;  %s6602_s3 = inlined_call_operand.vmem [shape: bf16[3,64,192], index: 3, kind: input, shape index: {}]   ;;  %s6603_s4 = inlined_call_operand.vmem [shape: f32[1,192], index: 4, kind: input, shape index: {}]   ;;  %s6604_s5 = inlined_call_operand.vmem [shape: bf16[64,192], index: 5, kind: input, shape index: {}]   ;;  %s6605_s6 = inlined_call_operand.vmem [shape: f32[1,192], index: 6, kind: input, shape index: {}]   ;;  %s6606_s7 = inlined_call_operand.vmem [shape: bf16[64,64], index: 7, kind: input, shape index: {}]   ;;  %s6607_s8 = inlined_call_operand.vmem [shape: f32[1,64], index: 8, kind: input, shape index: {}]   ;;  %s6608_s9 = inlined_call_operand.vmem [shape: bf16[64,4], index: 9, kind: input, shape index: {}]   ;;  %s6609_s10 = inlined_call_operand.vmem [shape: f32[1,4], index: 10, kind: input, shape index: {}]   ;;  %s6610_s11 = inlined_call_operand.hbm [shape: f32[2,4], index: 11, kind: output, shape index: {}]  }
   0x1   :  { %v4783_v0 = vld [vmem:[%s6600_s1 + $0x78] sm:$0xff]   ;;  %v4787_v4 = vld [vmem:[%s6600_s1 + $0x70] sm:$0xff]   ;;  %v4791_v8 = vld [vmem:[%s6600_s1 + $0x68] sm:$0xff]  }
   0x2   :  { %v4784_v1 = vld [vmem:[%s6600_s1 + $0xf8] sm:$0xff]   ;;  %4335 = vmatprep.subr.bf16.mxu0 %v4783_v0  ;;  %v4788_v5 = vld [vmem:[%s6600_s1 + $0xf0] sm:$0xff]   ;;  %v4792_v9 = vld [vmem:[%s6600_s1 + $0xe8] sm:$0xff]  }
   0x3   :  { %v4785_v2 = vld [vmem:[%s6600_s1 + $0x38] sm:$0xff]   ;;  %4369 = vmatprep.subr.bf16.mxu1 %v4784_v1  ;;  %v4789_v6 = vld [vmem:[%s6600_s1 + $0x30] sm:$0xff]   ;;  %v4793_v10 = vld [vmem:[%s6600_s1 + $0x28] sm:$0xff]  }
   0x4   :  { %v4786_v3 = vld [vmem:[%s6600_s1 + $0xb8] sm:$0xff]   ;;  %4336 = vmatpush3.bf16.msra.mxu0 %v4785_v2  ;;  %v4790_v7 = vld [vmem:[%s6600_s1 + $0xb0] sm:$0xff]   ;;  %v4794_v11 = vld [vmem:[%s6600_s1 + $0xa8] sm:$0xff]  }
   0x5   :  { %4370 = vmatpush3.bf16.msra.mxu1 %v4786_v3  ;;  %4337 = vmatprep.subr.bf16.mxu0 %v4787_v4  ;;  %v4795_v12 = vld [vmem:[%s6600_s1 + $0x60] sm:$0xff]   ;;  %v4799_v16 = vld [vmem:[%s6600_s1 + $0x58] sm:$0xff]   ;;  %v4803_v20 = vld [vmem:[%s6600_s1 + $0x50] sm:$0xff]  }
   0x6   :  { %4371 = vmatprep.subr.bf16.mxu1 %v4788_v5  ;;  %v4796_v13 = vld [vmem:[%s6600_s1 + $0xe0] sm:$0xff]   ;;  %v4800_v17 = vld [vmem:[%s6600_s1 + $0xd8] sm:$0xff]   ;;  %v4804_v21 = vld [vmem:[%s6600_s1 + $0xd0] sm:$0xff]  }
   0x7   :  { %v4797_v14 = vld [vmem:[%s6600_s1 + $0x20] sm:$0xff]   ;;  %v4801_v18 = vld [vmem:[%s6600_s1 + $0x18] sm:$0xff]   ;;  %v4805_v22 = vld [vmem:[%s6600_s1 + $0x10] sm:$0xff]  }
   0x8   :  { %4338 = vmatpush3.bf16.msra.mxu0 %v4789_v6  ;;  %v4798_v15 = vld [vmem:[%s6600_s1 + $0xa0] sm:$0xff]   ;;  %v4802_v19 = vld [vmem:[%s6600_s1 + $0x98] sm:$0xff]   ;;  %v4806_v23 = vld [vmem:[%s6600_s1 + $0x90] sm:$0xff]  }
   0x9   :  { %4372 = vmatpush3.bf16.msra.mxu1 %v4790_v7  ;;  %4339 = vmatprep.subr.bf16.mxu0 %v4791_v8  ;;  %v4807_v24 = vld [vmem:[%s6600_s1 + $0x48] sm:$0xff]   ;;  %v4811_v28 = vld [vmem:[%s6600_s1 + $0x40] sm:$0xff]   ;;  %v4815_v40 = vld [vmem:[%s6600_s1 + $0x178] sm:$0xff]  }
   0xa   :  { %4373 = vmatprep.subr.bf16.mxu1 %v4792_v9  ;;  %v4808_v25 = vld [vmem:[%s6600_s1 + $0xc8] sm:$0xff]   ;;  %v4812_v29 = vld [vmem:[%s6600_s1 + $0xc0] sm:$0xff]   ;;  %v4816_v41 = vld [vmem:[%s6600_s1 + $0x1f8] sm:$0xff]  }
   0xb   :  { %v4809_v26 = vld [vmem:[%s6600_s1 + $0x8] sm:$0xff]   ;;  %v4813_v30 = vld [vmem:[%s6600_s1] sm:$0xff]   ;;  %v4817_v42 = vld [vmem:[%s6600_s1 + $0x138] sm:$0xff]  }
   0xc   :  { %4340 = vmatpush3.bf16.msra.mxu0 %v4793_v10  ;;  %v4810_v27 = vld [vmem:[%s6600_s1 + $0x88] sm:$0xff]   ;;  %v4814_v31 = vld [vmem:[%s6600_s1 + $0x80] sm:$0xff]   ;;  %v4818_v43 = vld [vmem:[%s6600_s1 + $0x1b8] sm:$0xff]  }
   0xd   :  { %4374 = vmatpush3.bf16.msra.mxu1 %v4794_v11  ;;  %4341 = vmatprep.subr.bf16.mxu0 %v4795_v12  ;;  %v40_v32 = vld [vmem:[%s6599_s0] sm:$0xff]  ;;  %v41_v34 = vld [vmem:[%s6599_s0 + $0x8] sm:$0xff]  ;;  %v4819_v44 = vld [vmem:[%s6600_s1 + $0x170] sm:$0xff]  }
   0xe   :  { %4375 = vmatprep.subr.bf16.mxu1 %v4796_v13  ;;  %v52_v33 = vld [vmem:[%s6599_s0 + $0x60] sm:$0xff]  ;;  %v53_v37 = vld [vmem:[%s6599_s0 + $0x68] sm:$0xff]  ;;  %v4820_v45 = vld [vmem:[%s6600_s1 + $0x1f0] sm:$0xff]  }
   0xf   :  { %v3993_v35 = vcombine.low %v40_v32, %v52_v33  ;;  %v3994_v36 = vcombine.high %v40_v32, %v52_v33  ;;  %v3995_v38 = vcombine.low %v41_v34, %v53_v37  ;;  %v3996_v39 = vcombine.high %v41_v34, %v53_v37  ;;  %v4821_v46 = vld [vmem:[%s6600_s1 + $0x130] sm:$0xff]   ;;  %v4823_v48 = vld [vmem:[%s6600_s1 + $0x168] sm:$0xff]   ;;  %v64_v52 = vld [vmem:[%s6599_s0 + $0xc0] sm:$0xff] }
  0x10   :  { %4342 = vmatpush3.bf16.msra.mxu0 %v4797_v14  ;;  %v4822_v47 = vld [vmem:[%s6600_s1 + $0x1b0] sm:$0xff]   ;;  %v4824_v49 = vld [vmem:[%s6600_s1 + $0x1e8] sm:$0xff]   ;;  %v76_v53 = vld [vmem:[%s6599_s0 + $0x120] sm:$0xff] }
  0x11   :  { %4376 = vmatpush3.bf16.msra.mxu1 %v4798_v15  ;;  %4343 = vmatprep.subr.bf16.mxu0 %v4799_v16  ;;  %v4825_v50 = vld [vmem:[%s6600_s1 + $0x128] sm:$0xff]   ;;  %v4018_v54 = vcombine.high %v64_v52, %v76_v53  ;;  %v4017_v55 = vcombine.low %v64_v52, %v76_v53  ;;  %v4827_v59 = vld [vmem:[%s6600_s1 + $0x160] sm:$0xff]   ;;  %v4831_v0 = vld [vmem:[%s6600_s1 + $0x158] sm:$0xff]  }
  0x12   :  { %4377 = vmatprep.subr.bf16.mxu1 %v4800_v17  ;;  %2047 = vmatprep.mubr.bf16.mxu0 %v3994_v36  ;;  %v4826_v51 = vld [vmem:[%s6600_s1 + $0x1a8] sm:$0xff]   ;;  %v4828_v61 = vld [vmem:[%s6600_s1 + $0x1e0] sm:$0xff]   ;;  %v4832_v1 = vld [vmem:[%s6600_s1 + $0x1d8] sm:$0xff]  }
  0x13   :  { %2104 = vmatprep.mubr.bf16.mxu1 %v3996_v39  ;;  %v65_v56 = vld [vmem:[%s6599_s0 + $0xc8] sm:$0xff]  ;;  %v4829_v62 = vld [vmem:[%s6600_s1 + $0x120] sm:$0xff]   ;;  %v4833_v2 = vld [vmem:[%s6600_s1 + $0x118] sm:$0xff]  }
  0x14   :  { %4344 = vmatpush3.bf16.msra.mxu0 %v4801_v18  ;;  %v77_v57 = vld [vmem:[%s6599_s0 + $0x128] sm:$0xff]  ;;  %v4830_v63 = vld [vmem:[%s6600_s1 + $0x1a0] sm:$0xff]   ;;  %v4834_v3 = vld [vmem:[%s6600_s1 + $0x198] sm:$0xff]  }
  0x15   :  { %4378 = vmatpush3.bf16.msra.mxu1 %v4802_v19  ;;  %4345 = vmatprep.subr.bf16.mxu0 %v4803_v20  ;;  %v4020_v58 = vcombine.high %v65_v56, %v77_v57  ;;  %v4019_v60 = vcombine.low %v65_v56, %v77_v57  ;;  %v88_v4 = vld [vmem:[%s6599_s0 + $0x180] sm:$0xff]  ;;  %v89_v6 = vld [vmem:[%s6599_s0 + $0x188] sm:$0xff]  ;;  %v4835_v11 = vld [vmem:[%s6600_s1 + $0x150] sm:$0xff]  }
  0x16   :  { %4379 = vmatprep.subr.bf16.mxu1 %v4804_v21  ;;  %v100_v5 = vld [vmem:[%s6599_s0 + $0x1e0] sm:$0xff]  ;;  %v101_v7 = vld [vmem:[%s6599_s0 + $0x1e8] sm:$0xff]  ;;  %v4836_v13 = vld [vmem:[%s6600_s1 + $0x1d0] sm:$0xff]  }
  0x17   :  { %v4042_v8 = vcombine.high %v88_v4, %v100_v5  ;;  %v4041_v9 = vcombine.low %v88_v4, %v100_v5  ;;  %v4044_v10 = vcombine.high %v89_v6, %v101_v7  ;;  %v4043_v12 = vcombine.low %v89_v6, %v101_v7  ;;  %v4837_v14 = vld [vmem:[%s6600_s1 + $0x110] sm:$0xff]   ;;  %v4839_v16 = vld [vmem:[%s6600_s1 + $0x148] sm:$0xff]   ;;  %v4843_v20 = vld [vmem:[%s6600_s1 + $0x140] sm:$0xff]  }
  0x18   :  { %4346 = vmatpush3.bf16.msra.mxu0 %v4805_v22  ;;  %v4838_v15 = vld [vmem:[%s6600_s1 + $0x190] sm:$0xff]   ;;  %v4840_v17 = vld [vmem:[%s6600_s1 + $0x1c8] sm:$0xff]   ;;  %v4844_v21 = vld [vmem:[%s6600_s1 + $0x1c0] sm:$0xff]  }
  0x19   :  { %4380 = vmatpush3.bf16.msra.mxu1 %v4806_v23  ;;  %4347 = vmatprep.subr.bf16.mxu0 %v4807_v24  ;;  %v4841_v18 = vld [vmem:[%s6600_s1 + $0x108] sm:$0xff]   ;;  %v4845_v22 = vld [vmem:[%s6600_s1 + $0x100] sm:$0xff]   ;;  %v42_v24 = vld [vmem:[%s6599_s0 + $0x10] sm:$0xff] }
  0x1a   :  { %4381 = vmatprep.subr.bf16.mxu1 %v4808_v25  ;;  %v4842_v19 = vld [vmem:[%s6600_s1 + $0x188] sm:$0xff]   ;;  %v4846_v23 = vld [vmem:[%s6600_s1 + $0x180] sm:$0xff]   ;;  %v54_v25 = vld [vmem:[%s6599_s0 + $0x70] sm:$0xff] }
  0x1b   :  { %v4847_v32 = vld [vmem:[%s6600_s1 + $0x278] sm:$0xff]   ;;  %v4851_v36 = vld [vmem:[%s6600_s1 + $0x270] sm:$0xff]   ;;  %v4859_v52 = vld [vmem:[%s6600_s1 + $0x260] sm:$0xff]  }
  0x1c   :  { %4348 = vmatpush3.bf16.msra.mxu0 %v4809_v26  ;;  %v43_v26 = vld [vmem:[%s6599_s0 + $0x18] sm:$0xff]  ;;  %v4852_v37 = vld [vmem:[%s6600_s1 + $0x2f0] sm:$0xff]   ;;  %v4860_v53 = vld [vmem:[%s6600_s1 + $0x2e0] sm:$0xff]  }
  0x1d   :  { %4382 = vmatpush3.bf16.msra.mxu1 %v4810_v27  ;;  %4349 = vmatprep.subr.bf16.mxu0 %v4811_v28  ;;  %v3997_v27 = vcombine.low %v42_v24, %v54_v25  ;;  %v3998_v28 = vcombine.high %v42_v24, %v54_v25  ;;  %v4848_v33 = vld [vmem:[%s6600_s1 + $0x2f8] sm:$0xff]   ;;  %v4854_v39 = vld [vmem:[%s6600_s1 + $0x2b0] sm:$0xff]  }
  0x1e   :  { %4383 = vmatprep.subr.bf16.mxu1 %v4812_v29  ;;  %v55_v29 = vld [vmem:[%s6599_s0 + $0x78] sm:$0xff]  ;;  %v90_v56 = vld [vmem:[%s6599_s0 + $0x190] sm:$0xff] }
  0x1f   :  { %v4849_v34 = vld [vmem:[%s6600_s1 + $0x238] sm:$0xff]   ;;  %v102_v57 = vld [vmem:[%s6599_s0 + $0x1f0] sm:$0xff] }
  0x20   :  { %4350 = vmatpush3.bf16.msra.mxu0 %v4813_v30  ;;  %v3999_v30 = vcombine.low %v43_v26, %v55_v29  ;;  %v4867_v4 = vld [vmem:[%s6600_s1 + $0x250] sm:$0xff]   ;;  %v4879_v24 = vld [vmem:[%s6600_s1 + $0x378] sm:$0xff]  }
  0x21   :  { %4384 = vmatpush3.bf16.msra.mxu1 %v4814_v31  ;;  %4403 = vmatprep.subr.bf16.mxu0 %v4815_v40  ;;  %v4000_v31 = vcombine.high %v43_v26, %v55_v29  ;;  %v66_v40 = vld [vmem:[%s6599_s0 + $0xd0] sm:$0xff]  ;;  %v4880_v25 = vld [vmem:[%s6600_s1 + $0x3f8] sm:$0xff]  }
  0x22   :  { %4437 = vmatprep.subr.bf16.mxu1 %v4816_v41  ;;  %v78_v41 = vld [vmem:[%s6599_s0 + $0x130] sm:$0xff]  ;;  %v4881_v26 = vld [vmem:[%s6600_s1 + $0x338] sm:$0xff]  }
  0x23   :  { %2048 = vmatmul.mubr.bf16.vlgmr.msra.gmra.mxu0 %v3993_v35  ;;  %v4850_v35 = vld [vmem:[%s6600_s1 + $0x2b8] sm:$0xff]   ;;  %v4868_v5 = vld [vmem:[%s6600_s1 + $0x2d0] sm:$0xff]  }
  0x24   :  { %2105 = vmatmul.mubr.bf16.vlgmr.msra.gmra.mxu1 %v3995_v38  ;;  %4404 = vmatpush3.bf16.msra.mxu0 %v4817_v42  ;;  %v4853_v38 = vld [vmem:[%s6600_s1 + $0x230] sm:$0xff]   ;;  %v4022_v42 = vcombine.high %v66_v40, %v78_v41 }
  0x25   :  { %4438 = vmatpush3.bf16.msra.mxu1 %v4818_v43  ;;  %4405 = vmatprep.subr.bf16.mxu0 %v4819_v44  ;;  %v4021_v43 = vcombine.low %v66_v40, %v78_v41  ;;  %v4855_v44 = vld [vmem:[%s6600_s1 + $0x268] sm:$0xff]   ;;  %v4869_v6 = vld [vmem:[%s6600_s1 + $0x210] sm:$0xff]  }
  0x26   :  { %4439 = vmatprep.subr.bf16.mxu1 %v4820_v45  ;;  %2055 = vmatprep.mubr.bf16.mxu0 %v4018_v54  ;;  %v4856_v45 = vld [vmem:[%s6600_s1 + $0x2e8] sm:$0xff]   ;;  %v4861_v54 = vld [vmem:[%s6600_s1 + $0x220] sm:$0xff]   ;;  %v4870_v7 = vld [vmem:[%s6600_s1 + $0x290] sm:$0xff]  }
  0x27   :  { %2112 = vmatprep.mubr.bf16.mxu1 %v4020_v58  ;;  %v4046_v58 = vcombine.high %v90_v56, %v102_v57  ;;  %v4884_v29 = vld [vmem:[%s6600_s1 + $0x3f0] sm:$0xff]   ;;  %v4889_v41 = vld [vmem:[%s6600_s1 + $0x328] sm:$0xff]  }
  0x28   :  { %4406 = vmatpush3.bf16.msra.mxu0 %v4821_v46  ;;  %v67_v46 = vld [vmem:[%s6599_s0 + $0xd8] sm:$0xff] }
  0x29   :  { %4440 = vmatpush3.bf16.msra.mxu1 %v4822_v47  ;;  %4407 = vmatprep.subr.bf16.mxu0 %v4823_v48  ;;  %v79_v47 = vld [vmem:[%s6599_s0 + $0x138] sm:$0xff] }
  0x2a   :  { %4441 = vmatprep.subr.bf16.mxu1 %v4824_v49  ;;  %v4024_v48 = vcombine.high %v67_v46, %v79_v47  ;;  %v4857_v49 = vld [vmem:[%s6600_s1 + $0x228] sm:$0xff]  }
  0x2b   :  { %2056 = vmatmul.mubr.bf16.gmra.mxu0 %v4017_v55  ;;  %v4862_v55 = vld [vmem:[%s6600_s1 + $0x2a0] sm:$0xff]  }
  0x2c   :  { %4408 = vmatpush3.bf16.msra.mxu0 %v4825_v50  ;;  %2113 = vmatmul.mubr.bf16.gmra.mxu1 %v4019_v60  ;;  %v4023_v50 = vcombine.low %v67_v46, %v79_v47  ;;  %v4863_v60 = vld [vmem:[%s6600_s1 + $0x258] sm:$0xff]   ;;  %v4893_v46 = vld [vmem:[%s6600_s1 + $0x320] sm:$0xff]  }
  0x2d   :  { %4442 = vmatpush3.bf16.msra.mxu1 %v4826_v51  ;;  %4409 = vmatprep.subr.bf16.mxu0 %v4827_v59  ;;  %v4858_v51 = vld [vmem:[%s6600_s1 + $0x2a8] sm:$0xff]   ;;  %v4045_v59 = vcombine.low %v90_v56, %v102_v57  ;;  %v4894_v47 = vld [vmem:[%s6600_s1 + $0x3a0] sm:$0xff]   ;;  %v4897_v57 = vld [vmem:[%s6600_s1 + $0x318] sm:$0xff]  }
  0x2e   :  { %4443 = vmatprep.subr.bf16.mxu1 %v4828_v61  ;;  %2063 = vmatprep.mubr.bf16.mxu0 %v4042_v8  ;;  %v4864_v61 = vld [vmem:[%s6600_s1 + $0x2d8] sm:$0xff]   ;;  %v4871_v8 = vld [vmem:[%s6600_s1 + $0x248] sm:$0xff]  }
  0x2f   :  { %2120 = vmatprep.mubr.bf16.mxu1 %v4044_v10  ;;  %v4873_v10 = vld [vmem:[%s6600_s1 + $0x208] sm:$0xff]  }
  0x30   :  { %4410 = vmatpush3.bf16.msra.mxu0 %v4829_v62  ;;  %v91_v62 = vld [vmem:[%s6599_s0 + $0x198] sm:$0xff] }
  0x31   :  { %4444 = vmatpush3.bf16.msra.mxu1 %v4830_v63  ;;  %4411 = vmatprep.subr.bf16.mxu0 %v4831_v0  ;;  %v103_v63 = vld [vmem:[%s6599_s0 + $0x1f8] sm:$0xff] }
  0x32   :  { %4445 = vmatprep.subr.bf16.mxu1 %v4832_v1  ;;  %v4048_v0 = vcombine.high %v91_v62, %v103_v63  ;;  %v4865_v1 = vld [vmem:[%s6600_s1 + $0x218] sm:$0xff]  }
  0x33   :  { %2064 = vmatmul.mubr.bf16.gmra.mxu0 %v4041_v9  ;;  %v4872_v9 = vld [vmem:[%s6600_s1 + $0x2c8] sm:$0xff]  }
  0x34   :  { %4412 = vmatpush3.bf16.msra.mxu0 %v4833_v2  ;;  %2121 = vmatmul.mubr.bf16.gmra.mxu1 %v4043_v12  ;;  %v4047_v2 = vcombine.low %v91_v62, %v103_v63  ;;  %v4875_v12 = vld [vmem:[%s6600_s1 + $0x240] sm:$0xff]   ;;  %v4901_v62 = vld [vmem:[%s6600_s1 + $0x310] sm:$0xff]  }
  0x35   :  { %4446 = vmatpush3.bf16.msra.mxu1 %v4834_v3  ;;  %4413 = vmatprep.subr.bf16.mxu0 %v4835_v11  ;;  %v4866_v3 = vld [vmem:[%s6600_s1 + $0x298] sm:$0xff]   ;;  %v4874_v11 = vld [vmem:[%s6600_s1 + $0x288] sm:$0xff]   ;;  %v4902_v63 = vld [vmem:[%s6600_s1 + $0x390] sm:$0xff]  }
  0x36   :  { %4447 = vmatprep.subr.bf16.mxu1 %v4836_v13  ;;  %2161 = vmatprep.mubr.bf16.mxu0 %v3998_v28  ;;  %v4876_v13 = vld [vmem:[%s6600_s1 + $0x2c0] sm:$0xff]   ;;  %v4883_v28 = vld [vmem:[%s6600_s1 + $0x370] sm:$0xff]  }
  0x37   :  { %2218 = vmatprep.mubr.bf16.mxu1 %v4000_v31  ;;  %v4886_v31 = vld [vmem:[%s6600_s1 + $0x3b0] sm:$0xff]  }
  0x38   :  { %4414 = vmatpush3.bf16.msra.mxu0 %v4837_v14  ;;  %v4877_v14 = vld [vmem:[%s6600_s1 + $0x200] sm:$0xff]  }
  0x39   :  { %4448 = vmatpush3.bf16.msra.mxu1 %v4838_v15  ;;  %4415 = vmatprep.subr.bf16.mxu0 %v4839_v16  ;;  %v4878_v15 = vld [vmem:[%s6600_s1 + $0x280] sm:$0xff]  }
  0x3a   :  { %4449 = vmatprep.subr.bf16.mxu1 %v4840_v17  ;;  %v44_v16 = vld [vmem:[%s6599_s0 + $0x20] sm:$0xff] }
  0x3b   :  { %v56_v17 = vld [vmem:[%s6599_s0 + $0x80] sm:$0xff] }
  0x3c   :  { %4416 = vmatpush3.bf16.msra.mxu0 %v4841_v18  ;;  %v45_v18 = vld [vmem:[%s6599_s0 + $0x28] sm:$0xff] }
  0x3d   :  { %4450 = vmatpush3.bf16.msra.mxu1 %v4842_v19  ;;  %4417 = vmatprep.subr.bf16.mxu0 %v4843_v20  ;;  %v4001_v19 = vcombine.low %v44_v16, %v56_v17  ;;  %v4002_v20 = vcombine.high %v44_v16, %v56_v17  ;;  %v4911_v16 = vld [vmem:[%s6600_s1 + $0x478] sm:$0xff]  }
  0x3e   :  { %4451 = vmatprep.subr.bf16.mxu1 %v4844_v21  ;;  %v57_v21 = vld [vmem:[%s6599_s0 + $0x88] sm:$0xff]  ;;  %v4912_v17 = vld [vmem:[%s6600_s1 + $0x4f8] sm:$0xff]  }
  0x40   :  { %4418 = vmatpush3.bf16.msra.mxu0 %v4845_v22  ;;  %v4003_v22 = vcombine.low %v45_v18, %v57_v21 }
  0x41   :  { %4452 = vmatpush3.bf16.msra.mxu1 %v4846_v23  ;;  %4471 = vmatprep.subr.bf16.mxu0 %v4847_v32  ;;  %v4004_v23 = vcombine.high %v45_v18, %v57_v21  ;;  %v68_v32 = vld [vmem:[%s6599_s0 + $0xe0] sm:$0xff]  ;;  %v4913_v18 = vld [vmem:[%s6600_s1 + $0x438] sm:$0xff]   ;;  %v4916_v21 = vld [vmem:[%s6600_s1 + $0x4f0] sm:$0xff]  }
  0x42   :  { %4505 = vmatprep.subr.bf16.mxu1 %v4848_v33  ;;  %v80_v33 = vld [vmem:[%s6599_s0 + $0x140] sm:$0xff] }
  0x43   :  { %2162 = vmatmul.mubr.bf16.vlgmr.msra.gmra.mxu0 %v3997_v27  ;;  %v4882_v27 = vld [vmem:[%s6600_s1 + $0x3b8] sm:$0xff]  }
  0x44   :  { %2219 = vmatmul.mubr.bf16.vlgmr.msra.gmra.mxu1 %v3999_v30  ;;  %4472 = vmatpush3.bf16.msra.mxu0 %v4849_v34  ;;  %v4885_v30 = vld [vmem:[%s6600_s1 + $0x330] sm:$0xff]   ;;  %v4026_v34 = vcombine.high %v68_v32, %v80_v33 }
  0x45   :  { %4506 = vmatpush3.bf16.msra.mxu1 %v4850_v35  ;;  %4473 = vmatprep.subr.bf16.mxu0 %v4851_v36  ;;  %v4025_v35 = vcombine.low %v68_v32, %v80_v33  ;;  %v4887_v36 = vld [vmem:[%s6600_s1 + $0x368] sm:$0xff]  }
  0x46   :  { %4507 = vmatprep.subr.bf16.mxu1 %v4852_v37  ;;  %2169 = vmatprep.mubr.bf16.mxu0 %v4022_v42  ;;  %v4888_v37 = vld [vmem:[%s6600_s1 + $0x3e8] sm:$0xff]  }
  0x47   :  { %2226 = vmatprep.mubr.bf16.mxu1 %v4024_v48  ;;  %v92_v48 = vld [vmem:[%s6599_s0 + $0x1a0] sm:$0xff]  ;;  %v4921_v33 = vld [vmem:[%s6600_s1 + $0x428] sm:$0xff]  }
  0x48   :  { %4474 = vmatpush3.bf16.msra.mxu0 %v4853_v38  ;;  %v69_v38 = vld [vmem:[%s6599_s0 + $0xe8] sm:$0xff] }
  0x49   :  { %4508 = vmatpush3.bf16.msra.mxu1 %v4854_v39  ;;  %4475 = vmatprep.subr.bf16.mxu0 %v4855_v44  ;;  %v81_v39 = vld [vmem:[%s6599_s0 + $0x148] sm:$0xff]  ;;  %v4891_v44 = vld [vmem:[%s6600_s1 + $0x360] sm:$0xff]  }
  0x4a   :  { %4509 = vmatprep.subr.bf16.mxu1 %v4856_v45  ;;  %v4028_v40 = vcombine.high %v69_v38, %v81_v39  ;;  %v4027_v42 = vcombine.low %v69_v38, %v81_v39  ;;  %v4892_v45 = vld [vmem:[%s6600_s1 + $0x3e0] sm:$0xff]  }
  0x4b   :  { %2170 = vmatmul.mubr.bf16.gmra.mxu0 %v4021_v43  ;;  %v4890_v43 = vld [vmem:[%s6600_s1 + $0x3a8] sm:$0xff]   ;;  %v4925_v38 = vld [vmem:[%s6600_s1 + $0x420] sm:$0xff]  }
  0x4c   :  { %4476 = vmatpush3.bf16.msra.mxu0 %v4857_v49  ;;  %2227 = vmatmul.mubr.bf16.gmra.mxu1 %v4023_v50  ;;  %v104_v49 = vld [vmem:[%s6599_s0 + $0x200] sm:$0xff] }
  0x4d   :  { %4510 = vmatpush3.bf16.msra.mxu1 %v4858_v51  ;;  %4477 = vmatprep.subr.bf16.mxu0 %v4859_v52  ;;  %v4050_v50 = vcombine.high %v92_v48, %v104_v49  ;;  %v4049_v51 = vcombine.low %v92_v48, %v104_v49  ;;  %v4895_v52 = vld [vmem:[%s6600_s1 + $0x358] sm:$0xff]   ;;  %v4926_v39 = vld [vmem:[%s6600_s1 + $0x4a0] sm:$0xff]  }
  0x4e   :  { %4511 = vmatprep.subr.bf16.mxu1 %v4860_v53  ;;  %2177 = vmatprep.mubr.bf16.mxu0 %v4046_v58  ;;  %v4896_v53 = vld [vmem:[%s6600_s1 + $0x3d8] sm:$0xff]  }
  0x4f   :  { %2234 = vmatprep.mubr.bf16.mxu1 %v4048_v0  ;;  %v4903_v0 = vld [vmem:[%s6600_s1 + $0x348] sm:$0xff]   ;;  %v4929_v49 = vld [vmem:[%s6600_s1 + $0x418] sm:$0xff]  }
  0x50   :  { %4478 = vmatpush3.bf16.msra.mxu0 %v4861_v54  ;;  %v93_v54 = vld [vmem:[%s6599_s0 + $0x1a8] sm:$0xff] }
  0x51   :  { %4512 = vmatpush3.bf16.msra.mxu1 %v4862_v55  ;;  %4479 = vmatprep.subr.bf16.mxu0 %v4863_v60  ;;  %v105_v55 = vld [vmem:[%s6599_s0 + $0x208] sm:$0xff]  ;;  %v4899_v60 = vld [vmem:[%s6600_s1 + $0x350] sm:$0xff]  }
  0x52   :  { %4513 = vmatprep.subr.bf16.mxu1 %v4864_v61  ;;  %v4052_v56 = vcombine.high %v93_v54, %v105_v55  ;;  %v4051_v58 = vcombine.low %v93_v54, %v105_v55  ;;  %v4900_v61 = vld [vmem:[%s6600_s1 + $0x3d0] sm:$0xff]  }
  0x53   :  { %2178 = vmatmul.mubr.bf16.gmra.mxu0 %v4045_v59  ;;  %v4898_v59 = vld [vmem:[%s6600_s1 + $0x398] sm:$0xff]   ;;  %v4933_v54 = vld [vmem:[%s6600_s1 + $0x410] sm:$0xff]  }
  0x54   :  { %4480 = vmatpush3.bf16.msra.mxu0 %v4865_v1  ;;  %2235 = vmatmul.mubr.bf16.gmra.mxu1 %v4047_v2  ;;  %v4904_v1 = vld [vmem:[%s6600_s1 + $0x3c8] sm:$0xff]   ;;  %v4934_v55 = vld [vmem:[%s6600_s1 + $0x490] sm:$0xff]  }
  0x55   :  { %4514 = vmatpush3.bf16.msra.mxu1 %v4866_v3  ;;  %4481 = vmatprep.subr.bf16.mxu0 %v4867_v4  ;;  %v4905_v2 = vld [vmem:[%s6600_s1 + $0x308] sm:$0xff]   ;;  %v4907_v4 = vld [vmem:[%s6600_s1 + $0x340] sm:$0xff]  }
  0x56   :  { %4515 = vmatprep.subr.bf16.mxu1 %v4868_v5  ;;  %2275 = vmatprep.mubr.bf16.mxu0 %v4002_v20  ;;  %v4906_v3 = vld [vmem:[%s6600_s1 + $0x388] sm:$0xff]   ;;  %v4908_v5 = vld [vmem:[%s6600_s1 + $0x3c0] sm:$0xff]   ;;  %v4915_v20 = vld [vmem:[%s6600_s1 + $0x470] sm:$0xff]  }
  0x57   :  { %2332 = vmatprep.mubr.bf16.mxu1 %v4004_v23  ;;  %v4918_v23 = vld [vmem:[%s6600_s1 + $0x4b0] sm:$0xff]  }
  0x58   :  { %4482 = vmatpush3.bf16.msra.mxu0 %v4869_v6  ;;  %v4909_v6 = vld [vmem:[%s6600_s1 + $0x300] sm:$0xff]  }
  0x59   :  { %4516 = vmatpush3.bf16.msra.mxu1 %v4870_v7  ;;  %4483 = vmatprep.subr.bf16.mxu0 %v4871_v8  ;;  %v4910_v7 = vld [vmem:[%s6600_s1 + $0x380] sm:$0xff]   ;;  %v46_v8 = vld [vmem:[%s6599_s0 + $0x30] sm:$0xff] }
  0x5a   :  { %4517 = vmatprep.subr.bf16.mxu1 %v4872_v9  ;;  %v58_v9 = vld [vmem:[%s6599_s0 + $0x90] sm:$0xff] }
  0x5c   :  { %4484 = vmatpush3.bf16.msra.mxu0 %v4873_v10  ;;  %v47_v10 = vld [vmem:[%s6599_s0 + $0x38] sm:$0xff] }
  0x5d   :  { %4518 = vmatpush3.bf16.msra.mxu1 %v4874_v11  ;;  %4485 = vmatprep.subr.bf16.mxu0 %v4875_v12  ;;  %v4005_v11 = vcombine.low %v46_v8, %v58_v9  ;;  %v4006_v12 = vcombine.high %v46_v8, %v58_v9  ;;  %v4943_v8 = vld [vmem:[%s6600_s1 + $0x578] sm:$0xff]  }
  0x5e   :  { %4519 = vmatprep.subr.bf16.mxu1 %v4876_v13  ;;  %v59_v13 = vld [vmem:[%s6599_s0 + $0x98] sm:$0xff] }
  0x5f   :  { %v4944_v9 = vld [vmem:[%s6600_s1 + $0x5f8] sm:$0xff]  }
  0x60   :  { %4486 = vmatpush3.bf16.msra.mxu0 %v4877_v14  ;;  %v4007_v14 = vcombine.low %v47_v10, %v59_v13 }
  0x61   :  { %4520 = vmatpush3.bf16.msra.mxu1 %v4878_v15  ;;  %4539 = vmatprep.subr.bf16.mxu0 %v4879_v24  ;;  %v4008_v15 = vcombine.high %v47_v10, %v59_v13  ;;  %v70_v24 = vld [vmem:[%s6599_s0 + $0xf0] sm:$0xff]  ;;  %v4945_v10 = vld [vmem:[%s6600_s1 + $0x538] sm:$0xff]  }
  0x62   :  { %4573 = vmatprep.subr.bf16.mxu1 %v4880_v25  ;;  %v82_v25 = vld [vmem:[%s6599_s0 + $0x150] sm:$0xff] }
  0x63   :  { %2276 = vmatmul.mubr.bf16.vlgmr.msra.gmra.mxu0 %v4001_v19  ;;  %v4914_v19 = vld [vmem:[%s6600_s1 + $0x4b8] sm:$0xff]   ;;  %v4948_v13 = vld [vmem:[%s6600_s1 + $0x5f0] sm:$0xff]  }
  0x64   :  { %2333 = vmatmul.mubr.bf16.vlgmr.msra.gmra.mxu1 %v4003_v22  ;;  %4540 = vmatpush3.bf16.msra.mxu0 %v4881_v26  ;;  %v4917_v22 = vld [vmem:[%s6600_s1 + $0x430] sm:$0xff]   ;;  %v4030_v26 = vcombine.high %v70_v24, %v82_v25 }
  0x65   :  { %4574 = vmatpush3.bf16.msra.mxu1 %v4882_v27  ;;  %4541 = vmatprep.subr.bf16.mxu0 %v4883_v28  ;;  %v4029_v27 = vcombine.low %v70_v24, %v82_v25  ;;  %v4919_v28 = vld [vmem:[%s6600_s1 + $0x468] sm:$0xff]  }
  0x66   :  { %4575 = vmatprep.subr.bf16.mxu1 %v4884_v29  ;;  %2283 = vmatprep.mubr.bf16.mxu0 %v4026_v34  ;;  %v4920_v29 = vld [vmem:[%s6600_s1 + $0x4e8] sm:$0xff]  }
  0x67   :  { %2340 = vmatprep.mubr.bf16.mxu1 %v4028_v40  ;;  %v94_v40 = vld [vmem:[%s6599_s0 + $0x1b0] sm:$0xff]  ;;  %v4953_v25 = vld [vmem:[%s6600_s1 + $0x528] sm:$0xff]  }
  0x68   :  { %4542 = vmatpush3.bf16.msra.mxu0 %v4885_v30  ;;  %v71_v30 = vld [vmem:[%s6599_s0 + $0xf8] sm:$0xff] }
  0x69   :  { %4576 = vmatpush3.bf16.msra.mxu1 %v4886_v31  ;;  %4543 = vmatprep.subr.bf16.mxu0 %v4887_v36  ;;  %v83_v31 = vld [vmem:[%s6599_s0 + $0x158] sm:$0xff]  ;;  %v4923_v36 = vld [vmem:[%s6600_s1 + $0x460] sm:$0xff]  }
  0x6a   :  { %4577 = vmatprep.subr.bf16.mxu1 %v4888_v37  ;;  %v4032_v32 = vcombine.high %v71_v30, %v83_v31  ;;  %v4031_v34 = vcombine.low %v71_v30, %v83_v31  ;;  %v4924_v37 = vld [vmem:[%s6600_s1 + $0x4e0] sm:$0xff]  }
  0x6b   :  { %2284 = vmatmul.mubr.bf16.gmra.mxu0 %v4025_v35  ;;  %v4922_v35 = vld [vmem:[%s6600_s1 + $0x4a8] sm:$0xff]   ;;  %v4957_v30 = vld [vmem:[%s6600_s1 + $0x520] sm:$0xff]  }
  0x6c   :  { %4544 = vmatpush3.bf16.msra.mxu0 %v4889_v41  ;;  %2341 = vmatmul.mubr.bf16.gmra.mxu1 %v4027_v42  ;;  %v106_v41 = vld [vmem:[%s6599_s0 + $0x210] sm:$0xff]  ;;  %v4958_v31 = vld [vmem:[%s6600_s1 + $0x5a0] sm:$0xff]  }
  0x6d   :  { %4578 = vmatpush3.bf16.msra.mxu1 %v4890_v43  ;;  %4545 = vmatprep.subr.bf16.mxu0 %v4891_v44  ;;  %v4054_v42 = vcombine.high %v94_v40, %v106_v41  ;;  %v4053_v43 = vcombine.low %v94_v40, %v106_v41  ;;  %v4927_v44 = vld [vmem:[%s6600_s1 + $0x458] sm:$0xff]  }
  0x6e   :  { %4579 = vmatprep.subr.bf16.mxu1 %v4892_v45  ;;  %2291 = vmatprep.mubr.bf16.mxu0 %v4050_v50  ;;  %v4928_v45 = vld [vmem:[%s6600_s1 + $0x4d8] sm:$0xff]  }
  0x6f   :  { %2348 = vmatprep.mubr.bf16.mxu1 %v4052_v56  ;;  %v4935_v56 = vld [vmem:[%s6600_s1 + $0x448] sm:$0xff]   ;;  %v4961_v41 = vld [vmem:[%s6600_s1 + $0x518] sm:$0xff]  }
  0x70   :  { %4546 = vmatpush3.bf16.msra.mxu0 %v4893_v46  ;;  %v95_v46 = vld [vmem:[%s6599_s0 + $0x1b8] sm:$0xff] }
  0x71   :  { %4580 = vmatpush3.bf16.msra.mxu1 %v4894_v47  ;;  %4547 = vmatprep.subr.bf16.mxu0 %v4895_v52  ;;  %v107_v47 = vld [vmem:[%s6599_s0 + $0x218] sm:$0xff]  ;;  %v4931_v52 = vld [vmem:[%s6600_s1 + $0x450] sm:$0xff]  }
  0x72   :  { %4581 = vmatprep.subr.bf16.mxu1 %v4896_v53  ;;  %v4056_v48 = vcombine.high %v95_v46, %v107_v47  ;;  %v4055_v50 = vcombine.low %v95_v46, %v107_v47  ;;  %v4932_v53 = vld [vmem:[%s6600_s1 + $0x4d0] sm:$0xff]  }
  0x73   :  { %2292 = vmatmul.mubr.bf16.gmra.mxu0 %v4049_v51  ;;  %v4930_v51 = vld [vmem:[%s6600_s1 + $0x498] sm:$0xff]   ;;  %v4965_v46 = vld [vmem:[%s6600_s1 + $0x510] sm:$0xff]  }
  0x74   :  { %4548 = vmatpush3.bf16.msra.mxu0 %v4897_v57  ;;  %2349 = vmatmul.mubr.bf16.gmra.mxu1 %v4051_v58  ;;  %v4936_v57 = vld [vmem:[%s6600_s1 + $0x4c8] sm:$0xff]   ;;  %v4966_v47 = vld [vmem:[%s6600_s1 + $0x590] sm:$0xff]  }
  0x75   :  { %4582 = vmatpush3.bf16.msra.mxu1 %v4898_v59  ;;  %4549 = vmatprep.subr.bf16.mxu0 %v4899_v60  ;;  %v4937_v58 = vld [vmem:[%s6600_s1 + $0x408] sm:$0xff]   ;;  %v4939_v60 = vld [vmem:[%s6600_s1 + $0x440] sm:$0xff]  }
  0x76   :  { %4583 = vmatprep.subr.bf16.mxu1 %v4900_v61  ;;  %2389 = vmatprep.mubr.bf16.mxu0 %v4006_v12  ;;  %v4938_v59 = vld [vmem:[%s6600_s1 + $0x488] sm:$0xff]   ;;  %v4940_v61 = vld [vmem:[%s6600_s1 + $0x4c0] sm:$0xff]   ;;  %v4947_v12 = vld [vmem:[%s6600_s1 + $0x570] sm:$0xff]  }
  0x77   :  { %2446 = vmatprep.mubr.bf16.mxu1 %v4008_v15  ;;  %v4950_v15 = vld [vmem:[%s6600_s1 + $0x5b0] sm:$0xff]  }
  0x78   :  { %4550 = vmatpush3.bf16.msra.mxu0 %v4901_v62  ;;  %v4941_v62 = vld [vmem:[%s6600_s1 + $0x400] sm:$0xff]  }
  0x79   :  { %4584 = vmatpush3.bf16.msra.mxu1 %v4902_v63  ;;  %4551 = vmatprep.subr.bf16.mxu0 %v4903_v0  ;;  %v4942_v63 = vld [vmem:[%s6600_s1 + $0x480] sm:$0xff]  }
  0x7a   :  { %4585 = vmatprep.subr.bf16.mxu1 %v4904_v1  ;;  %v48_v0 = vld [vmem:[%s6599_s0 + $0x40] sm:$0xff] }
  0x7b   :  { %v60_v1 = vld [vmem:[%s6599_s0 + $0xa0] sm:$0xff] }
  0x7c   :  { %4552 = vmatpush3.bf16.msra.mxu0 %v4905_v2  ;;  %v49_v2 = vld [vmem:[%s6599_s0 + $0x48] sm:$0xff] }
  0x7d   :  { %4586 = vmatpush3.bf16.msra.mxu1 %v4906_v3  ;;  %4553 = vmatprep.subr.bf16.mxu0 %v4907_v4  ;;  %v4009_v3 = vcombine.low %v48_v0, %v60_v1  ;;  %v4010_v4 = vcombine.high %v48_v0, %v60_v1 }
  0x7e   :  { %4587 = vmatprep.subr.bf16.mxu1 %v4908_v5  ;;  %v61_v5 = vld [vmem:[%s6599_s0 + $0xa8] sm:$0xff] }
  0x80   :  { %4554 = vmatpush3.bf16.msra.mxu0 %v4909_v6  ;;  %v4011_v6 = vcombine.low %v49_v2, %v61_v5 }
  0x81   :  { %4588 = vmatpush3.bf16.msra.mxu1 %v4910_v7  ;;  %4607 = vmatprep.subr.bf16.mxu0 %v4911_v16  ;;  %v4012_v7 = vcombine.high %v49_v2, %v61_v5  ;;  %v72_v16 = vld [vmem:[%s6599_s0 + $0x100] sm:$0xff] }
  0x82   :  { %4641 = vmatprep.subr.bf16.mxu1 %v4912_v17  ;;  %v84_v17 = vld [vmem:[%s6599_s0 + $0x160] sm:$0xff] }
  0x83   :  { %2390 = vmatmul.mubr.bf16.vlgmr.msra.gmra.mxu0 %v4005_v11  ;;  %v4946_v11 = vld [vmem:[%s6600_s1 + $0x5b8] sm:$0xff]  }
  0x84   :  { %2447 = vmatmul.mubr.bf16.vlgmr.msra.gmra.mxu1 %v4007_v14  ;;  %4608 = vmatpush3.bf16.msra.mxu0 %v4913_v18  ;;  %v4949_v14 = vld [vmem:[%s6600_s1 + $0x530] sm:$0xff]   ;;  %v4034_v18 = vcombine.high %v72_v16, %v84_v17 }
  0x85   :  { %4642 = vmatpush3.bf16.msra.mxu1 %v4914_v19  ;;  %4609 = vmatprep.subr.bf16.mxu0 %v4915_v20  ;;  %v4033_v19 = vcombine.low %v72_v16, %v84_v17  ;;  %v4951_v20 = vld [vmem:[%s6600_s1 + $0x568] sm:$0xff]   ;;  %v3992_v16 = vld [vmem:[%s6601_s2] ss:$0 sm:$0xff] }
  0x86   :  { %4643 = vmatprep.subr.bf16.mxu1 %v4916_v21  ;;  %2397 = vmatprep.mubr.bf16.mxu0 %v4030_v26  ;;  %v4952_v21 = vld [vmem:[%s6600_s1 + $0x5e8] sm:$0xff]  }
  0x87   :  { %2454 = vmatprep.mubr.bf16.mxu1 %v4032_v32  ;;  %v96_v32 = vld [vmem:[%s6599_s0 + $0x1c0] sm:$0xff] }
  0x88   :  { %4610 = vmatpush3.bf16.msra.mxu0 %v4917_v22  ;;  %v73_v22 = vld [vmem:[%s6599_s0 + $0x108] sm:$0xff] }
  0x89   :  { %4644 = vmatpush3.bf16.msra.mxu1 %v4918_v23  ;;  %4611 = vmatprep.subr.bf16.mxu0 %v4919_v28  ;;  %v85_v23 = vld [vmem:[%s6599_s0 + $0x168] sm:$0xff]  ;;  %v4955_v28 = vld [vmem:[%s6600_s1 + $0x560] sm:$0xff]  }
  0x8a   :  { %4645 = vmatprep.subr.bf16.mxu1 %v4920_v29  ;;  %v4036_v24 = vcombine.high %v73_v22, %v85_v23  ;;  %v4035_v26 = vcombine.low %v73_v22, %v85_v23  ;;  %v4956_v29 = vld [vmem:[%s6600_s1 + $0x5e0] sm:$0xff]  }
  0x8b   :  { %2398 = vmatmul.mubr.bf16.gmra.mxu0 %v4029_v27  ;;  %v4954_v27 = vld [vmem:[%s6600_s1 + $0x5a8] sm:$0xff]  }
  0x8c   :  { %4612 = vmatpush3.bf16.msra.mxu0 %v4921_v33  ;;  %2455 = vmatmul.mubr.bf16.gmra.mxu1 %v4031_v34  ;;  %v108_v33 = vld [vmem:[%s6599_s0 + $0x220] sm:$0xff] }
  0x8d   :  { %4646 = vmatpush3.bf16.msra.mxu1 %v4922_v35  ;;  %4613 = vmatprep.subr.bf16.mxu0 %v4923_v36  ;;  %v4058_v34 = vcombine.high %v96_v32, %v108_v33  ;;  %v4057_v35 = vcombine.low %v96_v32, %v108_v33  ;;  %v4959_v36 = vld [vmem:[%s6600_s1 + $0x558] sm:$0xff]  }
  0x8e   :  { %4647 = vmatprep.subr.bf16.mxu1 %v4924_v37  ;;  %2405 = vmatprep.mubr.bf16.mxu0 %v4054_v42  ;;  %v4960_v37 = vld [vmem:[%s6600_s1 + $0x5d8] sm:$0xff]  }
  0x8f   :  { %2462 = vmatprep.mubr.bf16.mxu1 %v4056_v48  ;;  %v4967_v48 = vld [vmem:[%s6600_s1 + $0x548] sm:$0xff]  }
  0x90   :  { %4614 = vmatpush3.bf16.msra.mxu0 %v4925_v38  ;;  %v97_v38 = vld [vmem:[%s6599_s0 + $0x1c8] sm:$0xff] }
  0x91   :  { %4648 = vmatpush3.bf16.msra.mxu1 %v4926_v39  ;;  %4615 = vmatprep.subr.bf16.mxu0 %v4927_v44  ;;  %v109_v39 = vld [vmem:[%s6599_s0 + $0x228] sm:$0xff]  ;;  %v4963_v44 = vld [vmem:[%s6600_s1 + $0x550] sm:$0xff]  }
  0x92   :  { %4649 = vmatprep.subr.bf16.mxu1 %v4928_v45  ;;  %v4060_v40 = vcombine.high %v97_v38, %v109_v39  ;;  %v4059_v42 = vcombine.low %v97_v38, %v109_v39  ;;  %v4964_v45 = vld [vmem:[%s6600_s1 + $0x5d0] sm:$0xff]  }
  0x93   :  { %2406 = vmatmul.mubr.bf16.gmra.mxu0 %v4053_v43  ;;  %v4962_v43 = vld [vmem:[%s6600_s1 + $0x598] sm:$0xff]  }
  0x94   :  { %4616 = vmatpush3.bf16.msra.mxu0 %v4929_v49  ;;  %2463 = vmatmul.mubr.bf16.gmra.mxu1 %v4055_v50  ;;  %v4968_v49 = vld [vmem:[%s6600_s1 + $0x5c8] sm:$0xff]  }
  0x95   :  { %4650 = vmatpush3.bf16.msra.mxu1 %v4930_v51  ;;  %4617 = vmatprep.subr.bf16.mxu0 %v4931_v52  ;;  %v4969_v50 = vld [vmem:[%s6600_s1 + $0x508] sm:$0xff]   ;;  %v4971_v52 = vld [vmem:[%s6600_s1 + $0x540] sm:$0xff]  }
  0x96   :  { %4651 = vmatprep.subr.bf16.mxu1 %v4932_v53  ;;  %2503 = vmatprep.mubr.bf16.mxu0 %v4010_v4  ;;  %v4970_v51 = vld [vmem:[%s6600_s1 + $0x588] sm:$0xff]   ;;  %v4972_v53 = vld [vmem:[%s6600_s1 + $0x5c0] sm:$0xff]   ;;  %v87_v4 = vld [vmem:[%s6599_s0 + $0x178] sm:$0xff] }
  0x97   :  { %2560 = vmatprep.mubr.bf16.mxu1 %v4012_v7  ;;  %v110_v7 = vld [vmem:[%s6599_s0 + $0x230] sm:$0xff] }
  0x98   :  { %4618 = vmatpush3.bf16.msra.mxu0 %v4933_v54  ;;  %v4973_v54 = vld [vmem:[%s6600_s1 + $0x500] sm:$0xff]  }
  0x99   :  { %4652 = vmatpush3.bf16.msra.mxu1 %v4934_v55  ;;  %4619 = vmatprep.subr.bf16.mxu0 %v4935_v56  ;;  %v4974_v55 = vld [vmem:[%s6600_s1 + $0x580] sm:$0xff]   ;;  %v50_v56 = vld [vmem:[%s6599_s0 + $0x50] sm:$0xff] }
  0x9a   :  { %4653 = vmatprep.subr.bf16.mxu1 %v4936_v57  ;;  %v62_v57 = vld [vmem:[%s6599_s0 + $0xb0] sm:$0xff] }
  0x9c   :  { %4620 = vmatpush3.bf16.msra.mxu0 %v4937_v58  ;;  %v51_v58 = vld [vmem:[%s6599_s0 + $0x58] sm:$0xff] }
  0x9d   :  { %4654 = vmatpush3.bf16.msra.mxu1 %v4938_v59  ;;  %4621 = vmatprep.subr.bf16.mxu0 %v4939_v60  ;;  %v4013_v59 = vcombine.low %v50_v56, %v62_v57  ;;  %v4014_v60 = vcombine.high %v50_v56, %v62_v57 }
  0x9e   :  { %4655 = vmatprep.subr.bf16.mxu1 %v4940_v61  ;;  %v63_v61 = vld [vmem:[%s6599_s0 + $0xb8] sm:$0xff] }
  0x9f   :  { %v4015_v0 = vcombine.low %v51_v58, %v63_v61  ;;  %v4016_v1 = vcombine.high %v51_v58, %v63_v61 }
  0xa0   :  { %4622 = vmatpush3.bf16.msra.mxu0 %v4941_v62  ;;  %v74_v62 = vld [vmem:[%s6599_s0 + $0x110] sm:$0xff] }
  0xa1   :  { %4656 = vmatpush3.bf16.msra.mxu1 %v4942_v63  ;;  %4675 = vmatprep.subr.bf16.mxu0 %v4943_v8  ;;  %v86_v63 = vld [vmem:[%s6599_s0 + $0x170] sm:$0xff]  ;;  %v99_v8 = vld [vmem:[%s6599_s0 + $0x1d8] sm:$0xff] }
  0xa2   :  { %4709 = vmatprep.subr.bf16.mxu1 %v4944_v9  ;;  %v4038_v2 = vcombine.high %v74_v62, %v86_v63  ;;  %v111_v9 = vld [vmem:[%s6599_s0 + $0x238] sm:$0xff] }
  0xa3   :  { %2504 = vmatmul.mubr.bf16.vlgmr.msra.gmra.mxu0 %v4009_v3  ;;  %v75_v3 = vld [vmem:[%s6599_s0 + $0x118] sm:$0xff]  ;;  %v4063_v17 = vcombine.low %v99_v8, %v111_v9 }
  0xa4   :  { %2561 = vmatmul.mubr.bf16.vlgmr.msra.gmra.mxu1 %v4011_v6  ;;  %4676 = vmatpush3.bf16.msra.mxu0 %v4945_v10  ;;  %v4040_v5 = vcombine.high %v75_v3, %v87_v4  ;;  %v98_v6 = vld [vmem:[%s6599_s0 + $0x1d0] sm:$0xff]  ;;  %v4037_v10 = vcombine.low %v74_v62, %v86_v63 }
  0xa5   :  { %4710 = vmatpush3.bf16.msra.mxu1 %v4946_v11  ;;  %4677 = vmatprep.subr.bf16.mxu0 %v4947_v12  ;;  %v4039_v11 = vcombine.low %v75_v3, %v87_v4  ;;  %v4062_v12 = vcombine.high %v98_v6, %v110_v7 }
  0xa6   :  { %4711 = vmatprep.subr.bf16.mxu1 %v4948_v13  ;;  %2511 = vmatprep.mubr.bf16.mxu0 %v4034_v18  ;;  %v4064_v13 = vcombine.high %v99_v8, %v111_v9 }
  0xa7   :  { %2568 = vmatprep.mubr.bf16.mxu1 %v4036_v24 }
  0xa8   :  { %4678 = vmatpush3.bf16.msra.mxu0 %v4949_v14  ;;  %v4061_v14 = vcombine.low %v98_v6, %v110_v7 }
  0xa9   :  { %4712 = vmatpush3.bf16.msra.mxu1 %v4950_v15  ;;  %4679 = vmatprep.subr.bf16.mxu0 %v4951_v20 }
  0xaa   :  { %4713 = vmatprep.subr.bf16.mxu1 %v4952_v21 }
  0xab   :  { %2512 = vmatmul.mubr.bf16.gmra.mxu0 %v4033_v19 }
  0xac   :  { %4680 = vmatpush3.bf16.msra.mxu0 %v4953_v25  ;;  %2569 = vmatmul.mubr.bf16.gmra.mxu1 %v4035_v26 }
  0xad   :  { %4714 = vmatpush3.bf16.msra.mxu1 %v4954_v27  ;;  %4681 = vmatprep.subr.bf16.mxu0 %v4955_v28 }
  0xae   :  { %4715 = vmatprep.subr.bf16.mxu1 %v4956_v29  ;;  %2519 = vmatprep.mubr.bf16.mxu0 %v4058_v34 }
  0xaf   :  { %2576 = vmatprep.mubr.bf16.mxu1 %v4060_v40 }
  0xb0   :  { %4682 = vmatpush3.bf16.msra.mxu0 %v4957_v30 }
  0xb1   :  { %4716 = vmatpush3.bf16.msra.mxu1 %v4958_v31  ;;  %4683 = vmatprep.subr.bf16.mxu0 %v4959_v36 }
  0xb2   :  { %4717 = vmatprep.subr.bf16.mxu1 %v4960_v37 }
  0xb3   :  { %2520 = vmatmul.mubr.bf16.gmra.mxu0 %v4057_v35 }
  0xb4   :  { %4684 = vmatpush3.bf16.msra.mxu0 %v4961_v41  ;;  %2577 = vmatmul.mubr.bf16.gmra.mxu1 %v4059_v42 }
  0xb5   :  { %4718 = vmatpush3.bf16.msra.mxu1 %v4962_v43  ;;  %4685 = vmatprep.subr.bf16.mxu0 %v4963_v44 }
  0xb6   :  { %4719 = vmatprep.subr.bf16.mxu1 %v4964_v45  ;;  %2617 = vmatprep.mubr.bf16.mxu0 %v4014_v60 }
  0xb7   :  { %2674 = vmatprep.mubr.bf16.mxu1 %v4016_v1 }
  0xb8   :  { %4686 = vmatpush3.bf16.msra.mxu0 %v4965_v46 }
  0xb9   :  { %4720 = vmatpush3.bf16.msra.mxu1 %v4966_v47  ;;  %4687 = vmatprep.subr.bf16.mxu0 %v4967_v48 }
  0xba   :  { %4721 = vmatprep.subr.bf16.mxu1 %v4968_v49 }
  0xbc   :  { %4688 = vmatpush3.bf16.msra.mxu0 %v4969_v50 }
  0xbd   :  { %4722 = vmatpush3.bf16.msra.mxu1 %v4970_v51  ;;  %4689 = vmatprep.subr.bf16.mxu0 %v4971_v52 }
  0xbe   :  { %4723 = vmatprep.subr.bf16.mxu1 %v4972_v53 }
  0xc0   :  { %4690 = vmatpush3.bf16.msra.mxu0 %v4973_v54 }
  0xc1   :  { %4724 = vmatpush3.bf16.msra.mxu1 %v4974_v55 }
  0xc3   :  { %2618 = vmatmul.mubr.bf16.vlgmr.msra.gmra.mxu0 %v4013_v59 }
  0xc4   :  { %2675 = vmatmul.mubr.bf16.vlgmr.msra.gmra.mxu1 %v4015_v0  ;;  %2625 = vmatprep.mubr.bf16.mxu0 %v4038_v2 }
  0xc5   :  { %2682 = vmatprep.mubr.bf16.mxu1 %v4040_v5 }
  0xcb   :  { %2626 = vmatmul.mubr.bf16.gmra.mxu0 %v4037_v10 }
  0xcc   :  { %2683 = vmatmul.mubr.bf16.gmra.mxu1 %v4039_v11  ;;  %2633 = vmatprep.mubr.bf16.mxu0 %v4062_v12 }
  0xcd   :  { %2690 = vmatprep.mubr.bf16.mxu1 %v4064_v13 }
  0xd3   :  { %2634 = vmatmul.mubr.bf16.gmra.mxu0 %v4061_v14 }
  0xe3   :  { %v4351_v15 = vpop.f32.mrf.mxu0 }
  0xe4   :  { %v4385_v18 = vpop.f32.mrf.mxu1 }
  0xe5   :  { %v4352_v19 = vpop.f32.mrf.mxu0 }
  0xe6   :  { %v4353_v20 = vadd.f32 %v4352_v19, %v4351_v15  ;;  %v4386_v21 = vpop.f32.mrf.mxu1 }
  0xe7   :  { %v4387_v22 = vadd.f32 %v4386_v21, %v4385_v18  ;;  %v4354_v23 = vpop.f32.mrf.mxu0 }
  0xe8   :  { %16 = vsyncpa [#allocation4], 0  ;;  %2691 = vmatmul.mubr.bf16.gmra.mxu1 %v4063_v17  ;;  %v2050_v24 = vadd.f32 %v4353_v20, %v3992_v16  ;;  %v4388_v25 = vpop.f32.mrf.mxu1  ;;  %v4975_v19 = vld [vmem:[%s6602_s3 + $0x70] ss:$8 sps:$4 sm:$0xff]   ;;  %v4977_v20 = vld [vmem:[%s6602_s3 + $0x74] ss:$8 sps:$4 sm:$0xff]  }
  0xe9   :  { %v4355_v26 = vpop.f32.mrf.mxu0  ;;  %v4978_v21 = vld [vmem:[%s6602_s3 + $0x30] ss:$8 sps:$4 sm:$0xff]   ;;  %2770 = vmatprep.subr.bf16.mxu0 %v4977_v20  ;;  %vm2758_vm0 = vcmask 523264   ;;  %vm3042_vm4 = vcmask 1041409   ;;  %vm3175_vm8 = vcmask 254976   ;;  %vm3177_vm9 = vcmask 517376  }
  0xea   :  { %v2107_v27 = vadd.f32 %v4387_v22, %v2050_v24  ;;  %v4356_v28 = vadd.f32 %v4355_v26, %v4354_v23  ;;  %v4389_v29 = vpop.f32.mrf.mxu1  ;;  %v4980_v23 = vld [vmem:[%s6602_s3 + $0x34] ss:$8 sps:$4 sm:$0xff]   ;;  %2771 = vmatpush1.bf16.msra.mxu0 %v4975_v19  ;;  %vm5104_vm10 = vmmov 0   ;;  %vm3961_vm11 = vcmask 25600  }
  0xeb   :  { %v4390_v30 = vadd.f32 %v4389_v29, %v4388_v25  ;;  %v4357_v33 = vpop.f32.mrf.mxu0  ;;  %2856 = vmatprep.subr.bf16.mxu1 %v4980_v23 }
  0xec   :  { %v2053_v31 = vadd.f32 %v4356_v28, %v3992_v16  ;;  %v4391_v35 = vpop.f32.mrf.mxu1  ;;  %2857 = vmatpush1.bf16.msra.mxu1 %v4978_v21 }
  0xed   :  { %v4358_v34 = vpop.f32.mrf.mxu0 }
  0xee   :  { %v2110_v32 = vadd.f32 %v4390_v30, %v2053_v31  ;;  %v4359_v36 = vadd.f32 %v4358_v34, %v4357_v33  ;;  %v4392_v38 = vpop.f32.mrf.mxu1  ;;  %v4983_v34 = vld [vmem:[%s6602_s3 + $0x24] ss:$8 sps:$4 sm:$0xff]  }
  0xef   :  { %v4360_v37 = vpop.f32.mrf.mxu0  ;;  %v4393_v40 = vadd.f32 %v4392_v38, %v4391_v35  ;;  %2858 = vmatprep.subr.bf16.mxu1 %v4983_v34 }
  0xf0   :  { %v2058_v39 = vadd.f32 %v4359_v36, %v3992_v16  ;;  %v4394_v42 = vpop.f32.mrf.mxu1 }
  0xf1   :  { %v4361_v41 = vpop.f32.mrf.mxu0 }
  0xf2   :  { %v2115_v43 = vadd.f32 %v4393_v40, %v2058_v39  ;;  %v4362_v44 = vadd.f32 %v4361_v41, %v4360_v37  ;;  %v4395_v45 = vpop.f32.mrf.mxu1  ;;  %v4981_v37 = vld [vmem:[%s6602_s3 + $0x20] ss:$8 sps:$4 sm:$0xff]  }
  0xf3   :  { %v4396_v47 = vadd.f32 %v4395_v45, %v4394_v42  ;;  %v4363_v48 = vpop.f32.mrf.mxu0  ;;  %2859 = vmatpush1.bf16.msra.mxu1 %v4981_v37  ;;  %v4984_v45 = vld [vmem:[%s6602_s3 + $0x60] ss:$8 sps:$4 sm:$0xff]  }
  0xf4   :  { %v2061_v46 = vadd.f32 %v4362_v44, %v3992_v16  ;;  %v4397_v50 = vpop.f32.mrf.mxu1 }
  0xf5   :  { %v4364_v51 = vpop.f32.mrf.mxu0 }
  0xf6   :  { %v2118_v49 = vadd.f32 %v4396_v47, %v2061_v46  ;;  %v4365_v52 = vadd.f32 %v4364_v51, %v4363_v48  ;;  %v4398_v53 = vpop.f32.mrf.mxu1  ;;  %v4986_v46 = vld [vmem:[%s6602_s3 + $0x64] ss:$8 sps:$4 sm:$0xff]   ;;  %v4987_v47 = vld [vmem:[%s6602_s3 + $0x10] ss:$8 sps:$4 sm:$0xff]  }
  0xf7   :  { %v4366_v54 = vpop.f32.mrf.mxu0  ;;  %v4399_v55 = vadd.f32 %v4398_v53, %v4397_v50  ;;  %2772 = vmatprep.subr.bf16.mxu0 %v4986_v46 }
  0xf8   :  { %v2066_v56 = vadd.f32 %v4365_v52, %v3992_v16  ;;  %v4400_v57 = vpop.f32.mrf.mxu1  ;;  %2773 = vmatpush1.bf16.msra.mxu0 %v4984_v45 }
  0xf9   :  { %v4367_v58 = vpop.f32.mrf.mxu0 }
  0xfa   :  { %v2123_v59 = vadd.f32 %v4399_v55, %v2066_v56  ;;  %v4368_v60 = vadd.f32 %v4367_v58, %v4366_v54  ;;  %v4401_v61 = vpop.f32.mrf.mxu1  ;;  %v4995_v54 = vld [vmem:[%s6602_s3 + $0x4] ss:$8 sps:$4 sm:$0xff]   ;;  %v4993_v56 = vld [vmem:[%s6602_s3] ss:$8 sps:$4 sm:$0xff]  }
  0xfb   :  { %v4402_v62 = vadd.f32 %v4401_v61, %v4400_v57  ;;  %v4990_v61 = vld [vmem:[%s6602_s3 + $0x50] ss:$8 sps:$4 sm:$0xff]  }
  0xfc   :  { %v2069_v63 = vadd.f32 %v4368_v60, %v3992_v16  ;;  %v4992_v60 = vld [vmem:[%s6602_s3 + $0x54] ss:$8 sps:$4 sm:$0xff]  }
  0xfd   :  { %2774 = vmatprep.subr.bf16.mxu0 %v4992_v60 }
  0xfe   :  { %v5962_v0 = vadd.f32 %v4402_v62, %v2069_v63  ;;  %v6611_v63 = vmov 0   ;;  %2775 = vmatpush1.bf16.msra.mxu0 %v4990_v61 }
  0xff   :  { %2880 = vmatprep.mubr.bf16.mxu1 %v6611_v63  ;;  %2794 = vmatprep.mubr.bf16.mxu0 %v6611_v63 }
 0x103   :  { %v4419_v1 = vpop.f32.mrf.mxu0 }
 0x104   :  { %v4453_v2 = vpop.f32.mrf.mxu1 }
 0x105   :  { %v4420_v3 = vpop.f32.mrf.mxu0 }
 0x106   :  { %v4421_v4 = vadd.f32 %v4420_v3, %v4419_v1  ;;  %v4454_v5 = vpop.f32.mrf.mxu1  ;;  %v4996_v1 = vld [vmem:[%s6602_s3 + $0x40] ss:$8 sps:$4 sm:$0xff]  }
 0x107   :  { %v4455_v6 = vadd.f32 %v4454_v5, %v4453_v2  ;;  %v4422_v7 = vpop.f32.mrf.mxu0 }
 0x108   :  { %v2164_v8 = vadd.f32 %v4421_v4, %v2107_v27  ;;  %v4456_v9 = vpop.f32.mrf.mxu1  ;;  %v5001_v4 = vld [vmem:[%s6602_s3 + $0xb4] ss:$8 sps:$4 sm:$0xff]  }
 0x109   :  { %v4423_v10 = vpop.f32.mrf.mxu0 }
 0x10a   :  { %v5964_v11 = vadd.f32 %v4455_v6, %v2164_v8  ;;  %v4424_v12 = vadd.f32 %v4423_v10, %v4422_v7  ;;  %v4457_v13 = vpop.f32.mrf.mxu1 }
 0x10b   :  { %v4458_v14 = vadd.f32 %v4457_v13, %v4456_v9  ;;  %v4425_v17 = vpop.f32.mrf.mxu0 }
 0x10c   :  { %v2167_v15 = vadd.f32 %v4424_v12, %v2110_v32  ;;  %v4459_v24 = vpop.f32.mrf.mxu1  ;;  %v6032_v12 = vld [vmem:[%s6604_s5 + $0x34] ss:$8 sps:$4 sm:$0xff]  }
 0x10d   :  { %v4426_v18 = vpop.f32.mrf.mxu0  ;;  %6615 = vst [vmem:[#allocation6_spill] sm:$0xff] %v6032_v12 }
 0x10e   :  { %v5966_v16 = vadd.f32 %v4458_v14, %v2167_v15  ;;  %v4427_v22 = vadd.f32 %v4426_v18, %v4425_v17  ;;  %v4460_v27 = vpop.f32.mrf.mxu1 }
 0x10f   :  { %v4428_v25 = vpop.f32.mrf.mxu0  ;;  %v4461_v29 = vadd.f32 %v4460_v27, %v4459_v24 }
 0x110   :  { %v2172_v26 = vadd.f32 %v4427_v22, %v2115_v43  ;;  %v4462_v31 = vpop.f32.mrf.mxu1  ;;  %v4989_v43 = vld [vmem:[%s6602_s3 + $0x14] ss:$8 sps:$4 sm:$0xff]  }
 0x111   :  { %v4429_v28 = vpop.f32.mrf.mxu0  ;;  %2860 = vmatprep.subr.bf16.mxu1 %v4989_v43 }
 0x112   :  { %v4430_v30 = vadd.f32 %v4429_v28, %v4428_v25  ;;  %v5980_v32 = vadd.f32 %v4461_v29, %v2172_v26  ;;  %v4463_v36 = vpop.f32.mrf.mxu1  ;;  %2861 = vmatpush1.bf16.msra.mxu1 %v4987_v47 }
 0x113   :  { %v4431_v35 = vpop.f32.mrf.mxu0  ;;  %v4464_v38 = vadd.f32 %v4463_v36, %v4462_v31  ;;  %2862 = vmatprep.subr.bf16.mxu1 %v4995_v54 }
 0x114   :  { %v2175_v33 = vadd.f32 %v4430_v30, %v2118_v49  ;;  %v4465_v42 = vpop.f32.mrf.mxu1 }
 0x115   :  { %v4432_v39 = vpop.f32.mrf.mxu0 }
 0x116   :  { %v5988_v40 = vadd.f32 %v4464_v38, %v2175_v33  ;;  %v4433_v41 = vadd.f32 %v4432_v39, %v4431_v35  ;;  %v4466_v49 = vpop.f32.mrf.mxu1  ;;  %2863 = vmatpush1.bf16.msra.mxu1 %v4993_v56 }
 0x117   :  { %v4434_v44 = vpop.f32.mrf.mxu0  ;;  %v4467_v50 = vadd.f32 %v4466_v49, %v4465_v42  ;;  %3120 = vmatprep.subr.bf16.mxu1 %v6032_v12 }
 0x118   :  { %v2180_v48 = vadd.f32 %v4433_v41, %v2123_v59  ;;  %v4468_v53 = vpop.f32.mrf.mxu1 }
 0x119   :  { %v4435_v51 = vpop.f32.mrf.mxu0 }
 0x11a   :  { %v4436_v52 = vadd.f32 %v4435_v51, %v4434_v44  ;;  %v2237_v55 = vadd.f32 %v4467_v50, %v2180_v48  ;;  %v4469_v58 = vpop.f32.mrf.mxu1 }
 0x11b   :  { %v4470_v59 = vadd.f32 %v4469_v58, %v4468_v53 }
 0x11c   :  { %v2183_v57 = vadd.f32 %v4436_v52, %v5962_v0  ;;  %v4998_v0 = vld [vmem:[%s6602_s3 + $0x44] ss:$8 sps:$4 sm:$0xff]  }
 0x11d   :  { %2776 = vmatprep.subr.bf16.mxu0 %v4998_v0 }
 0x11e   :  { %v2240_v62 = vadd.f32 %v4470_v59, %v2183_v57  ;;  %2777 = vmatpush1.bf16.msra.mxu0 %v4996_v1 }
 0x11f   :  { %2952 = vmatprep.subr.bf16.mxu0 %v5001_v4 }
 0x123   :  { %v4487_v2 = vpop.f32.mrf.mxu0 }
 0x124   :  { %v4521_v3 = vpop.f32.mrf.mxu1 }
 0x125   :  { %v4488_v5 = vpop.f32.mrf.mxu0 }
 0x126   :  { %v4489_v6 = vadd.f32 %v4488_v5, %v4487_v2  ;;  %v4522_v7 = vpop.f32.mrf.mxu1 }
 0x127   :  { %v4523_v8 = vadd.f32 %v4522_v7, %v4521_v3  ;;  %v6026_v9 = vpop.f32.mrf.mxu0 }
 0x128   :  { %v2278_v10 = vadd.f32 %v4489_v6, %v5964_v11  ;;  %v6038_v15 = vpop.f32.mrf.mxu1 }
 0x129   :  { %v6034_v13 = vpop.f32.mrf.mxu0 }
 0x12a   :  { %v6036_v14 = vadd.f32 %v4523_v8, %v2278_v10  ;;  %v6041_v18 = vpop.f32.mrf.mxu1 }
 0x12b   :  { %v4493_v17 = vpop.f32.mrf.mxu0 }
 0x12c   :  { %v4527_v21 = vpop.f32.mrf.mxu1 }
 0x12d   :  { %v4494_v19 = vpop.f32.mrf.mxu0 }
 0x12e   :  { %v4495_v20 = vadd.f32 %v4494_v19, %v4493_v17  ;;  %v4528_v23 = vpop.f32.mrf.mxu1 }
 0x12f   :  { %v6043_v11 = vpop.f32.mrf.mxu0  ;;  %v4529_v25 = vadd.f32 %v4528_v23, %v4527_v21 }
 0x130   :  { %v2286_v22 = vadd.f32 %v4495_v20, %v5980_v32  ;;  %v6048_v26 = vpop.f32.mrf.mxu1 }
 0x131   :  { %v6046_v24 = vpop.f32.mrf.mxu0 }
 0x132   :  { %v6050_v27 = vadd.f32 %v4529_v25, %v2286_v22  ;;  %v6052_v29 = vpop.f32.mrf.mxu1  ;;  %v4498_v12 = vadd.f32 %v6046_v24, %v6043_v11 }
 0x133   :  { %v4499_v28 = vpop.f32.mrf.mxu0 }
 0x134   :  { %v4533_v33 = vpop.f32.mrf.mxu1 }
 0x135   :  { %v4500_v30 = vpop.f32.mrf.mxu0 }
 0x136   :  { %v4501_v31 = vadd.f32 %v4500_v30, %v4499_v28  ;;  %v4534_v36 = vpop.f32.mrf.mxu1 }
 0x137   :  { %v4502_v34 = vpop.f32.mrf.mxu0  ;;  %v4535_v37 = vadd.f32 %v4534_v36, %v4533_v33 }
 0x138   :  { %v2294_v35 = vadd.f32 %v4501_v31, %v2237_v55  ;;  %v4536_v39 = vpop.f32.mrf.mxu1 }
 0x139   :  { %v4503_v38 = vpop.f32.mrf.mxu0 }
 0x13a   :  { %v4504_v32 = vadd.f32 %v4503_v38, %v4502_v34  ;;  %v6054_v41 = vadd.f32 %v4535_v37, %v2294_v35  ;;  %v4537_v43 = vpop.f32.mrf.mxu1  ;;  %v4492_v37 = vadd.f32 %v6034_v13, %v6026_v9 }
 0x13b   :  { %v4538_v44 = vadd.f32 %v4537_v43, %v4536_v39 }
 0x13c   :  { %v2297_v42 = vadd.f32 %v4504_v32, %v2240_v62  ;;  %v2281_v39 = vadd.f32 %v4492_v37, %v5966_v16 }
 0x13e   :  { %v6056_v45 = vadd.f32 %v4538_v44, %v2297_v42  ;;  %v4526_v44 = vadd.f32 %v6041_v18, %v6038_v15 }
 0x143   :  { %v4555_v46 = vpop.f32.mrf.mxu0 }
 0x144   :  { %v4589_v47 = vpop.f32.mrf.mxu1 }
 0x145   :  { %v4556_v48 = vpop.f32.mrf.mxu0 }
 0x146   :  { %v4590_v49 = vpop.f32.mrf.mxu1  ;;  %v4557_v42 = vadd.f32 %v4556_v48, %v4555_v46  ;;  %v2289_v46 = vadd.f32 %v4498_v12, %v5988_v40  ;;  %v4532_v48 = vadd.f32 %v6052_v29, %v6048_v26 }
 0x147   :  { %v4558_v50 = vpop.f32.mrf.mxu0  ;;  %v4591_v13 = vadd.f32 %v4590_v49, %v4589_v47 }
 0x148   :  { %v4592_v52 = vpop.f32.mrf.mxu1  ;;  %v2392_v9 = vadd.f32 %v4557_v42, %v6036_v14 }
 0x149   :  { %v4559_v51 = vpop.f32.mrf.mxu0 }
 0x14a   :  { %v4593_v54 = vpop.f32.mrf.mxu1  ;;  %v4560_v63 = vadd.f32 %v4559_v51, %v4558_v50  ;;  %v2449_v50 = vadd.f32 %v4591_v13, %v2392_v9 }
 0x14b   :  { %v4561_v53 = vpop.f32.mrf.mxu0  ;;  %v4594_v51 = vadd.f32 %v4593_v54, %v4592_v52 }
 0x14c   :  { %v6058_v56 = vpop.f32.mrf.mxu1 }
 0x14d   :  { %v4562_v55 = vpop.f32.mrf.mxu0 }
 0x14e   :  { %v4596_v58 = vpop.f32.mrf.mxu1  ;;  %v4563_v15 = vadd.f32 %v4562_v55, %v4561_v53 }
 0x14f   :  { %v4564_v57 = vpop.f32.mrf.mxu0  ;;  %v4597_v40 = vadd.f32 %v4596_v58, %v6058_v56 }
 0x150   :  { %v6060_v59 = vpop.f32.mrf.mxu1 }
 0x151   :  { %v4565_v60 = vpop.f32.mrf.mxu0 }
 0x152   :  { %v6062_v61 = vpop.f32.mrf.mxu1  ;;  %v4566_v37 = vadd.f32 %v4565_v60, %v4564_v57 }
 0x153   :  { %v6064_v62 = vpop.f32.mrf.mxu0  ;;  %v4600_v52 = vadd.f32 %v6062_v61, %v6060_v59 }
 0x154   :  { %v6066_v0 = vpop.f32.mrf.mxu1 }
 0x155   :  { %v6068_v1 = vpop.f32.mrf.mxu0 }
 0x156   :  { %v6070_v2 = vpop.f32.mrf.mxu1 }
 0x157   :  { %v6072_v3 = vpop.f32.mrf.mxu0 }
 0x158   :  { %v6074_v4 = vpop.f32.mrf.mxu1 }
 0x159   :  { %v6076_v5 = vpop.f32.mrf.mxu0 }
 0x15a   :  { %v6078_v6 = vpop.f32.mrf.mxu1  ;;  %v4572_v9 = vadd.f32 %v6076_v5, %v6072_v3 }
 0x15b   :  { %6616 = vst [vmem:[#allocation7_spill] sm:$0xff] %v6078_v6  ;;  %v2338_v6 = vadd.f32 %v4526_v44, %v2281_v39 }
 0x163   :  { %v4623_v7 = vpop.f32.mrf.mxu0 }
 0x164   :  { %v4657_v8 = vpop.f32.mrf.mxu1 }
 0x165   :  { %v4624_v10 = vpop.f32.mrf.mxu0 }
 0x166   :  { %v4658_v17 = vpop.f32.mrf.mxu1  ;;  %v4625_v16 = vadd.f32 %v4624_v10, %v4623_v7 }
 0x167   :  { %v4626_v19 = vpop.f32.mrf.mxu0  ;;  %v4659_v49 = vadd.f32 %v4658_v17, %v4657_v8  ;;  %v4569_v17 = vadd.f32 %v6068_v1, %v6064_v62  ;;  %v4603_v1 = vadd.f32 %v6070_v2, %v6066_v0  ;;  %v6133_v0 = vld [vmem:[%s6604_s5 + $0x30] ss:$8 sps:$4 sm:$0xff]  }
 0x168   :  { %v4660_v21 = vpop.f32.mrf.mxu1  ;;  %v2506_v47 = vadd.f32 %v4625_v16, %v2449_v50 }
 0x169   :  { %v4627_v20 = vpop.f32.mrf.mxu0  ;;  %v2408_v62 = vadd.f32 %v4569_v17, %v6054_v41 }
 0x16a   :  { %v4661_v23 = vpop.f32.mrf.mxu1  ;;  %v4628_v11 = vadd.f32 %v4627_v20, %v4626_v19  ;;  %v2563_v60 = vadd.f32 %v4659_v49, %v2506_v47 }
 0x16b   :  { %v4629_v22 = vpop.f32.mrf.mxu0  ;;  %v4662_v7 = vadd.f32 %v4661_v23, %v4660_v21 }
 0x16c   :  { %v6080_v28 = vpop.f32.mrf.mxu1 }
 0x16d   :  { %v4630_v25 = vpop.f32.mrf.mxu0 }
 0x16e   :  { %v4664_v31 = vpop.f32.mrf.mxu1  ;;  %v4631_v54 = vadd.f32 %v4630_v25, %v4629_v22 }
 0x16f   :  { %v4632_v30 = vpop.f32.mrf.mxu0  ;;  %v4665_v22 = vadd.f32 %v4664_v31, %v6080_v28  ;;  %v2411_v28 = vadd.f32 %v4572_v9, %v6056_v45  ;;  %v6620_v31 = vld [vmem:[#allocation7_spill] sm:$0xff]  ;;  %v6138_v45 = vld [vmem:[%s6604_s5 + $0x24] ss:$8 sps:$4 sm:$0xff]  }
 0x170   :  { %v6082_v33 = vpop.f32.mrf.mxu1 }
 0x171   :  { %v4633_v34 = vpop.f32.mrf.mxu0 }
 0x172   :  { %v6084_v35 = vpop.f32.mrf.mxu1 }
 0x173   :  { %v6086_v36 = vpop.f32.mrf.mxu0  ;;  %v4668_v16 = vadd.f32 %v6084_v35, %v6082_v33 }
 0x174   :  { %6617 = vst [vmem:[#allocation8_spill] sm:$0xff] %v6086_v36  ;;  %v6090_v38 = vpop.f32.mrf.mxu1 }
 0x175   :  { %6618 = vst [vmem:[#allocation9_spill] sm:$0xff] %v6090_v38  ;;  %v6092_v32 = vpop.f32.mrf.mxu0 }
 0x176   :  { %6619 = vst [vmem:[#allocation10_spill] sm:$0xff] %v6092_v32  ;;  %v6095_v43 = vpop.f32.mrf.mxu1  ;;  %v2395_v32 = vadd.f32 %v4560_v63, %v2338_v6  ;;  %v2346_v63 = vadd.f32 %v4532_v48, %v2289_v46  ;;  %v2400_v6 = vadd.f32 %v4563_v15, %v6050_v27  ;;  %v4634_v27 = vadd.f32 %v4633_v34, %v4632_v30 }
 0x177   :  { %v6101_v36 = vpop.f32.mrf.mxu0  ;;  %v4606_v15 = vadd.f32 %v6620_v31, %v6074_v4 }
 0x178   :  { %v6104_v38 = vpop.f32.mrf.mxu1  ;;  %v2452_v14 = vadd.f32 %v4594_v51, %v2395_v32  ;;  %v2403_v55 = vadd.f32 %v4566_v37, %v2346_v63  ;;  %v2457_v8 = vadd.f32 %v4597_v40, %v2400_v6  ;;  %v2465_v37 = vadd.f32 %v4603_v1, %v2408_v62  ;;  %v5010_v1 = vld [vmem:[%s6602_s3 + $0x94] ss:$8 sps:$4 sm:$0xff]  }
 0x179   :  { %v4639_v18 = vpop.f32.mrf.mxu0  ;;  %v2468_v63 = vadd.f32 %v4606_v15, %v2411_v28 }
 0x17a   :  { %v6109_v24 = vpop.f32.mrf.mxu1  ;;  %v2509_v26 = vadd.f32 %v4628_v11, %v2452_v14  ;;  %v2460_v44 = vadd.f32 %v4600_v52, %v2403_v55  ;;  %v2514_v59 = vadd.f32 %v4631_v54, %v2457_v8  ;;  %v4640_v4 = vadd.f32 %v4639_v18, %v6101_v36  ;;  %v6155_v54 = vld [vmem:[%s6604_s5 + $0x14] ss:$8 sps:$4 sm:$0xff]  }
 0x17b   :  { %v6621_v50 = vld [vmem:[#allocation8_spill] sm:$0xff] }
 0x17c   :  { %v2566_v56 = vadd.f32 %v4662_v7, %v2509_v26  ;;  %v2517_v30 = vadd.f32 %v4634_v27, %v2460_v44  ;;  %v2571_v2 = vadd.f32 %v4665_v22, %v2514_v59  ;;  %v6623_v26 = vmov 0   ;;  %v6624_v36 = vld [vmem:[#allocation9_spill] sm:$0xff] }
 0x17d   :  { %v6622_v51 = vld [vmem:[#allocation10_spill] sm:$0xff]  ;;  %v4671_v18 = vadd.f32 %v6095_v43, %v6624_v36  ;;  %v4674_v7 = vadd.f32 %v6109_v24, %v6104_v38  ;;  %v5004_v38 = vld [vmem:[%s6602_s3 + $0xa4] ss:$8 sps:$4 sm:$0xff]  }
 0x17e   :  { %v4637_v41 = vadd.f32 %v6622_v51, %v6621_v50  ;;  %v2574_v14 = vadd.f32 %v4668_v16, %v2517_v30  ;;  %v6175_v44 = vld [vmem:[%s6604_s5 + $0x4] ss:$8 sps:$4 sm:$0xff]   ;;  %v5008_v16 = vld [vmem:[%s6602_s3 + $0x90] ss:$8 sps:$4 sm:$0xff]   ;;  %v2993_v51 = vlaneseq }
 0x180   :  { %v2522_v6 = vadd.f32 %v4637_v41, %v2465_v37 }
 0x183   :  { %v4691_v39 = vpop.f32.mrf.mxu0 }
 0x184   :  { %v4725_v42 = vpop.f32.mrf.mxu1 }
 0x185   :  { %v4692_v12 = vpop.f32.mrf.mxu0 }
 0x186   :  { %v4693_v29 = vadd.f32 %v4692_v12, %v4691_v39  ;;  %v4726_v53 = vpop.f32.mrf.mxu1  ;;  %v6146_v12 = vld [vmem:[%s6604_s5 + $0x20] ss:$8 sps:$4 sm:$0xff]  }
 0x187   :  { %v4694_v57 = vpop.f32.mrf.mxu0  ;;  %v4727_v21 = vadd.f32 %v4726_v53, %v4725_v42 }
 0x188   :  { %v4728_v10 = vpop.f32.mrf.mxu1  ;;  %v2620_v58 = vadd.f32 %v4693_v29, %v2563_v60 }
 0x189   :  { %v4695_v19 = vpop.f32.mrf.mxu0 }
 0x18a   :  { %v4696_v20 = vadd.f32 %v4695_v19, %v4694_v57  ;;  %v4729_v32 = vpop.f32.mrf.mxu1  ;;  %v2677_v46 = vadd.f32 %v4727_v21, %v2620_v58  ;;  %v2525_v57 = vadd.f32 %v4640_v4, %v2468_v63  ;;  %v4999_v19 = vld [vmem:[%s6602_s3 + $0xb0] ss:$8 sps:$4 sm:$0xff]   ;;  %v2579_v58 = vadd.f32 %v4671_v18, %v2522_v6 }
 0x18b   :  { %v4697_v61 = vpop.f32.mrf.mxu0  ;;  %v4730_v25 = vadd.f32 %v4729_v32, %v4728_v10  ;;  %v3017_v63 = vand.u32 127, %v2993_v51 }
 0x18c   :  { %v2623_v23 = vadd.f32 %v4696_v20, %v2566_v56  ;;  %v4731_v13 = vpop.f32.mrf.mxu1  ;;  %v6166_v56 = vld [vmem:[%s6604_s5 + $0x10] ss:$8 sps:$4 sm:$0xff]   ;;  %v2582_v9 = vadd.f32 %v4674_v7, %v2525_v57 }
 0x18d   :  { %v4698_v34 = vpop.f32.mrf.mxu0  ;;  %vm3021_vm1 = vcmp.ge.s32.totalorder %v3017_v63, 64  ;;  %vm3023_vm2 = vcmp.lt.s32.totalorder %v3017_v63, 96  ;;  %vm3019_vm3 = vcmp.lt.s32.totalorder %v3017_v63, 32 }
 0x18e   :  { %v2680_v3 = vadd.f32 %v4730_v25, %v2623_v23  ;;  %v4699_v5 = vadd.f32 %v4698_v34, %v4697_v61  ;;  %v4732_v48 = vpop.f32.mrf.mxu1  ;;  %v5002_v25 = vld [vmem:[%s6602_s3 + $0xa0] ss:$8 sps:$4 sm:$0xff]   ;;  %vm3025_vm6 = vmand %vm3021_vm1, %vm3023_vm2 }
 0x18f   :  { %v4700_v11 = vpop.f32.mrf.mxu0  ;;  %v4733_v29 = vadd.f32 %v4732_v48, %v4731_v13  ;;  %v6185_v13 = vld [vmem:[%s6604_s5] ss:$8 sps:$4 sm:$0xff]   ;;  %vm6263_vm7 = vmor %vm3019_vm3, %vm3025_vm6 }
 0x190   :  { %v2699_v33 = vpack.c.bf16 %v2680_v3, %v2677_v46  ;;  %v4734_v35 = vpop.f32.mrf.mxu1  ;;  %v2628_v47 = vadd.f32 %v4699_v5, %v2571_v2  ;;  %v5016_v3 = vld [vmem:[%s6602_s3 + $0x84] ss:$8 sps:$4 sm:$0xff]   ;;  %v6625_v5 = vld [vmem:[#allocation6_spill] sm:$0xff]  ;;  %v5014_v48 = vld [vmem:[%s6602_s3 + $0x80] ss:$8 sps:$4 sm:$0xff]   ;;  %v6224_v2 = vshrl.u32 %v2993_v51, 7 }
 0x191   :  { %v4701_v39 = vpop.f32.mrf.mxu0 }
 0x192   :  { %v4702_v49 = vadd.f32 %v4701_v39, %v4700_v11  ;;  %v4735_v42 = vpop.f32.mrf.mxu1  ;;  %4282 = vmatmul.mubr.msk.bf16.vlgmr.msra.gmra.mxu1 %vm2758_vm0, %v2699_v33  ;;  %v2685_v10 = vadd.f32 %v4733_v29, %v2628_v47  ;;  %v2995_v4 = vsub.s32 0, %v6224_v2  ;;  %v2991_v39 = vld [vmem:[%s6603_s4] sm:$0x3]  ;;  %v2999_v47 = vsub.s32 1, %v6224_v2  ;;  %s5102_s4 = smov 64  }
 0x193   :  { %v4703_v40 = vpop.f32.mrf.mxu0  ;;  %3121 = vmatpush1.bf16.msra.mxu1 %v6133_v0  ;;  %3144 = vmatprep.mubr.bf16.mxu1 %v6623_v26  ;;  %v4736_v55 = vadd.f32 %v4735_v42, %v4734_v35  ;;  %v6236_v42 = vld [vmem:[%s6605_s6] sm:$0x3]  ;;  %v6238_v29 = vadd.s32 128, %v3017_v63 }
 0x194   :  { %v2631_v53 = vadd.f32 %v4702_v49, %v2574_v14  ;;  %3122 = vmatprep.subr.bf16.mxu1 %v6138_v45  ;;  %v2996_v36 = vrot.slane %v2991_v39, %v2995_v4  ;;  %v3000_v57 = vrot.slane %v2991_v39, %v2999_v47 }
 0x195   :  { %v4704_v60 = vpop.f32.mrf.mxu0  ;;  %vm3032_vm5 = vcmp.lt.s32.totalorder %v6238_v29, 160 }
 0x196   :  { %v2688_v8 = vadd.f32 %v4736_v55, %v2631_v53  ;;  %v4705_v17 = vadd.f32 %v4704_v60, %v4703_v40 }
 0x197   :  { %v4706_v27 = vpop.f32.mrf.mxu0  ;;  %3123 = vmatpush1.bf16.msra.mxu1 %v6146_v12 }
 0x198   :  { %v2708_v20 = vpack.c.bf16 %v2688_v8, %v2685_v10  ;;  %3124 = vmatprep.subr.bf16.mxu1 %v6155_v54  ;;  %v2636_v59 = vadd.f32 %v4705_v17, %v2579_v58 }
 0x199   :  { %v4707_v24 = vpop.f32.mrf.mxu0 }
 0x19a   :  { %v4708_v22 = vadd.f32 %v4707_v24, %v4706_v27  ;;  %4273 = vmatmul.mubr.msk.bf16.vlgmr.msra.gmra.mxu0 %vm2758_vm0, %v2708_v20 }
 0x19b   :  { %2953 = vmatpush1.bf16.msra.mxu0 %v4999_v19  ;;  %3125 = vmatpush1.bf16.msra.mxu1 %v6166_v56 }
 0x19c   :  { %v2639_v62 = vadd.f32 %v4708_v22, %v2582_v9  ;;  %2954 = vmatprep.subr.bf16.mxu0 %v5004_v38  ;;  %2976 = vmatprep.mubr.bf16.mxu0 %v6623_v26 }
 0x19d   :  { %3126 = vmatprep.subr.bf16.mxu1 %v6175_v44 }
 0x19f   :  { %2955 = vmatpush1.bf16.msra.mxu0 %v5002_v25  ;;  %3127 = vmatpush1.bf16.msra.mxu1 %v6185_v13 }
 0x1a0   :  { %2956 = vmatprep.subr.bf16.mxu0 %v5010_v1  ;;  %3300 = vmatprep.subr.bf16.mxu1 %v6625_v5 }
 0x1a2   :  { %3145 = vmatmul.mubr.bf16.vlgmr.msra.gmra.mxu1 %v6623_v26 }
 0x1a3   :  { %2957 = vmatpush1.bf16.msra.mxu0 %v5008_v16  ;;  %3301 = vmatpush1.bf16.msra.mxu1 %v6133_v0 }
 0x1a4   :  { %2958 = vmatprep.subr.bf16.mxu0 %v5016_v3  ;;  %3302 = vmatprep.subr.bf16.mxu1 %v6138_v45 }
 0x1a5   :  { %3324 = vmatprep.mubr.bf16.mxu1 %v6623_v26 }
 0x1a7   :  { %2959 = vmatpush1.bf16.msra.mxu0 %v5014_v48  ;;  %3303 = vmatpush1.bf16.msra.mxu1 %v6146_v12 }
 0x1a8   :  { %v4737_v52 = vpop.f32.mrf.mxu1  ;;  %3210 = vmatprep.subr.bf16.mxu0 %v6625_v5  ;;  %3304 = vmatprep.subr.bf16.mxu1 %v6155_v54 }
 0x1aa   :  { %v4738_v43 = vpop.f32.mrf.mxu1 }
 0x1ab   :  { %v4739_v61 = vadd.f32 %v4738_v43, %v4737_v52  ;;  %3305 = vmatpush1.bf16.msra.mxu1 %v6166_v56  ;;  %v6241_v52 = vrot.slane %v6236_v42, %v2995_v4 }
 0x1ac   :  { %v4740_v32 = vpop.f32.mrf.mxu1  ;;  %3306 = vmatprep.subr.bf16.mxu1 %v6175_v44 }
 0x1ad   :  { %v2693_v30 = vadd.f32 %v4739_v61, %v2636_v59 }
 0x1ae   :  { %v4741_v21 = vpop.f32.mrf.mxu1 }
 0x1af   :  { %v4742_v23 = vadd.f32 %v4741_v21, %v4740_v32  ;;  %3307 = vmatpush1.bf16.msra.mxu1 %v6185_v13 }
 0x1b0   :  { %3464 = vmatprep.subr.bf16.mxu1 %v6625_v5 }
 0x1b1   :  { %v2696_v34 = vadd.f32 %v4742_v23, %v2639_v62 }
 0x1b3   :  { %v2891_v46 = vpack.c.bf16 %v2696_v34, %v2693_v30  ;;  %v5023_v34 = vld [vmem:[%s6606_s7 + $0x18] sm:$0xff]  }
 0x1b5   :  { %4299 = vmatmul.mubr.msk.bf16.vlgmr.msra.gmra.mxu0 %vm2758_vm0, %v2891_v46 }
 0x1b6   :  { %3211 = vmatpush1.bf16.msra.mxu0 %v6133_v0  ;;  %3234 = vmatprep.mubr.bf16.mxu0 %v6623_v26 }
 0x1b7   :  { %3212 = vmatprep.subr.bf16.mxu0 %v6138_v45 }
 0x1ba   :  { %3213 = vmatpush1.bf16.msra.mxu0 %v6146_v12 }
 0x1bb   :  { %3214 = vmatprep.subr.bf16.mxu0 %v6155_v54 }
 0x1be   :  { %3215 = vmatpush1.bf16.msra.mxu0 %v6166_v56 }
 0x1bf   :  { %3216 = vmatprep.subr.bf16.mxu0 %v6175_v44 }
 0x1c2   :  { %3217 = vmatpush1.bf16.msra.mxu0 %v6185_v13 }
 0x1c3   :  { %3390 = vmatprep.subr.bf16.mxu0 %v6625_v5 }
 0x252   :  { %v2882_v28 = vpop.f32.mrf.mxu1 }
 0x254   :  { %v2884_v31 = vpop.f32.mrf.mxu1 }
 0x256   :  { %v2886_v15 = vpop.f32.mrf.mxu1 }
 0x258   :  { %v2888_v41 = vpop.f32.mrf.mxu1 }
 0x25a   :  { %v2796_v50 = vpop.f32.mrf.mxu0 }
 0x25b   :  { %v2883_v40 = vadd.f32 %v2882_v28, %v2796_v50 }
 0x25c   :  { %v2798_v11 = vpop.f32.mrf.mxu0 }
 0x25d   :  { %v2885_v53 = vadd.f32 %v2884_v31, %v2798_v11 }
 0x25e   :  { %v2800_v35 = vpop.f32.mrf.mxu0 }
 0x25f   :  { %v2887_v7 = vadd.f32 %v2886_v15, %v2800_v35 }
 0x260   :  { %v2802_v49 = vpop.f32.mrf.mxu0 }
 0x261   :  { %v2889_v17 = vadd.f32 %v2888_v41, %v2802_v49 }
 0x262   :  { %v3146_v33 = vpop.f32.mrf.mxu1 }
 0x263   :  { %v3147_v20 = vadd.f32 %v3146_v33, %v6241_v52 }
 0x264   :  { %v6226_v37 = vpop.f32.mrf.mxu1 }
 0x266   :  { %v3150_v14 = vpop.f32.mrf.mxu1 }
 0x268   :  { %v3151_v6 = vpop.f32.mrf.mxu1 }
 0x275   :  { %v2978_v18 = vpop.f32.mrf.mxu0 }
 0x276   :  { %v2987_v55 = vadd.f32 %v2978_v18, %v2883_v40 }
 0x277   :  { %v2980_v60 = vpop.f32.mrf.mxu0 }
 0x278   :  { %v6245_v10 = vadd.f32 %v2996_v36, %v2987_v55  ;;  %v2988_v8 = vadd.f32 %v2980_v60, %v2885_v53 }
 0x279   :  { %v2982_v43 = vpop.f32.mrf.mxu0 }
 0x27a   :  { %v6248_v27 = vadd.f32 %v3000_v57, %v2988_v8  ;;  %v2989_v19 = vadd.f32 %v2982_v43, %v2887_v7  ;;  %v3048_v58 = vrot.slane %v6245_v10, 7  ;;  %v3179_v38 = vrot.slane %v6245_v10, 1 }
 0x27b   :  { %v2984_v32 = vpop.f32.mrf.mxu0  ;;  %v3185_v24 = vrot.slane %v6245_v10, 6  ;;  %v3267_v9 = vrot.slane %v6245_v10, 2  ;;  %v3275_v59 = vrot.slane %v6245_v10, 5  ;;  %v3357_v23 = vrot.slane %v6245_v10, 3 }
 0x27c   :  { %v3005_v61 = vadd.f32 %v2996_v36, %v2989_v19  ;;  %v2990_v22 = vadd.f32 %v2984_v32, %v2889_v17  ;;  %v3051_v21 = vrot.slane %v6248_v27, 7  ;;  %v3181_v25 = vrot.slane %v6248_v27, 1 }
 0x27d   :  { %v3188_v62 = vrot.slane %v6248_v27, 6  ;;  %v3270_v1 = vrot.slane %v6248_v27, 2  ;;  %v3278_v30 = vrot.slane %v6248_v27, 5  ;;  %v3365_v40 = vrot.slane %v6245_v10, 4 }
 0x27e   :  { %v3041_v16 = vrot.slane %v3005_v61, 7  ;;  %v3049_v46 = vrot.slane %v3005_v61, 6  ;;  %v3006_v3 = vadd.f32 %v3000_v57, %v2990_v22  ;;  %v6268_v48 = vsel %vm3042_vm4, %v3005_v61, %v3179_v38 }
 0x27f   :  { %v3186_v28 = vrot.slane %v3005_v61, 5  ;;  %v3268_v31 = vrot.slane %v3005_v61, 1  ;;  %v3276_v15 = vrot.slane %v3005_v61, 4  ;;  %v3358_v50 = vrot.slane %v3005_v61, 2 }
 0x280   :  { %v6272_v51 = vsel %vm3042_vm4, %v3041_v16, %v6245_v10  ;;  %v6275_v41 = vsel %vm3042_vm4, %v3049_v46, %v3048_v58  ;;  %v3044_v11 = vrot.slane %v3006_v3, 7  ;;  %v3052_v33 = vrot.slane %v3006_v3, 6 }
 0x281   :  { %v3056_v35 = vsel %vm6263_vm7, %v6272_v51, %v6275_v41  ;;  %v6282_v4 = vsel %vm3042_vm4, %v3186_v28, %v3185_v24  ;;  %v3182_v39 = vsel %vm3042_vm4, %v3006_v3, %v3181_v25  ;;  %v3189_v14 = vrot.slane %v3006_v3, 5 }
 0x282   :  { %v3153_v49 = vadd.f32 %v3147_v20, %v3056_v35  ;;  %v3045_v63 = vsel %vm3042_vm4, %v3044_v11, %v6248_v27  ;;  %v3193_v6 = vsel %vm6263_vm7, %v6268_v48, %v6282_v4  ;;  %v3053_v36 = vsel %vm3042_vm4, %v3052_v33, %v3051_v21 }
 0x283   :  { %v3190_v18 = vsel %vm3042_vm4, %v3189_v14, %v3188_v62  ;;  %v6295_v53 = vsel %vm3042_vm4, %v3268_v31, %v3267_v9  ;;  %v6298_v55 = vsel %vm3042_vm4, %v3276_v15, %v3275_v59  ;;  %v3271_v10 = vrot.slane %v3006_v3, 1 }
 0x284   :  { %v4308_v57 = vmul.f32 -1.442695, %v3153_v49  ;;  %v6302_v60 = vsel %vm3032_vm5, %v3182_v39, %v3190_v18  ;;  %v3283_v7 = vsel %vm6263_vm7, %v6295_v53, %v6298_v55  ;;  %v3279_v8 = vrot.slane %v3006_v3, 4 }
 0x285   :  { %v6309_v17 = vsel %vm3042_vm4, %v3358_v50, %v3357_v23  ;;  %v3366_v43 = vrot.slane %v3005_v61, 3  ;;  %v3360_v19 = vrot.slane %v6248_v27, 3  ;;  %v3272_v58 = vsel %vm3042_vm4, %v3271_v10, %v3270_v1 }
 0x286   :  { %5031 = vpow2.f32 %v4308_v57  ;;  %v3361_v20 = vrot.slane %v3006_v3, 2  ;;  %v3368_v32 = vrot.slane %v6248_v27, 4  ;;  %v3280_v38 = vsel %vm3042_vm4, %v3279_v8, %v3278_v30 }
 0x287   :  { %v6316_v24 = vsel %vm3042_vm4, %v3366_v43, %v3365_v40  ;;  %v3369_v9 = vrot.slane %v3006_v3, 3  ;;  %v3521_v59 = vsel %vm6263_vm7, %v6298_v55, %v6295_v53  ;;  %v6324_v61 = vsel %vm3032_vm5, %v3272_v58, %v3280_v38 }
 0x288   :  { %v3373_v27 = vsel %vm6263_vm7, %v6309_v17, %v6316_v24  ;;  %v3362_v22 = vsel %vm3042_vm4, %v3361_v20, %v3360_v19  ;;  %v3447_v21 = vsel %vm6263_vm7, %v6316_v24, %v6309_v17  ;;  %v6338_v25 = vsel %vm3032_vm5, %v3280_v38, %v3272_v58 }
 0x289   :  { %v3370_v23 = vsel %vm3042_vm4, %v3369_v9, %v3368_v32  ;;  %v3595_v62 = vsel %vm6263_vm7, %v6282_v4, %v6268_v48  ;;  %v6346_v1 = vsel %vm3032_vm5, %v3190_v18, %v3182_v39  ;;  %v3669_v46 = vsel %vm6263_vm7, %v6275_v41, %v6272_v51  ;;  %v5024_v41 = vld [vmem:[%s6606_s7 + $0x10] sm:$0xff]  }
 0x28a   :  { %v6350_v30 = vsel %vm3032_vm5, %v3362_v22, %v3370_v23  ;;  %v6354_v16 = vsel %vm3032_vm5, %v3370_v23, %v3362_v22  ;;  %v6362_v3 = vsel %vm3032_vm5, %v3053_v36, %v3045_v63  ;;  %v6367_v15 = vrot.slane %v6236_v42, %v2999_v47 }
 0x28b   :  { %v3057_v35 = vsel %vm3032_vm5, %v3045_v63, %v3053_v36  ;;  %v5103_v51 = vmov 0.0  }
 0x28c   :  { %v3149_v50 = vadd.f32 %v6226_v37, %v6367_v15 }
 0x293   :  { %v5032_v28 = vpop.eup %5031 }
 0x294   :  { %v3157_v31 = vadd.f32 1.0, %v5032_v28 }
 0x296   :  { %5033 = vrcp.f32 %v3157_v31 }
 0x2a3   :  { %v5034_v11 = vpop.eup %5033 }
 0x2a4   :  { %v3160_v33 = vmul.f32 %v5034_v11, %v3149_v50  ;;  %v3163_v49 = vsub.f32 1.0, %v5034_v11  ;;  %v3169_v18 = vmul.f32 0.0, %v5034_v11 }
 0x2a6   :  { %v3161_v39 = vadd.f32 %v3160_v33, %v3057_v35 }
 0x2a8   :  { %5035 = vtanh.f32 %v3161_v39 }
 0x2b5   :  { %v5036_v14 = vpop.eup %5035 }
 0x2b6   :  { %3165 = vrot.lane.b32.xlu0 %v5036_v14, %s5102_s4 }
 0x328   :  { %v3166_v40 = vpop.permute.xlu0 %3165 }
 0x329   :  { %v3168_v57 = vmul.f32 %v3166_v40, %v3163_v49 }
 0x32b   :  { %v6374_v47 = vadd.f32 %v3169_v18, %v3168_v57 }
 0x32d   :  { %v3195_v37 = vpack.c.bf16 %v6374_v47, %v6374_v47 }
 0x32f   :  { %3197 = vrot.lane.b32.xlu0 %v3195_v37, %s5102_s4 }
 0x3a1   :  { %v3198_v42 = vpop.permute.xlu0 %3197 }
 0x3a2   :  { %4309 = vmatmul.mubr.msk.bf16.vlgmr.msra.gmra.mxu0 %vm2758_vm0, %v3198_v42 }
 0x3a3   :  { %3391 = vmatpush1.bf16.msra.mxu0 %v6133_v0  ;;  %3414 = vmatprep.mubr.bf16.mxu0 %v6623_v26 }
 0x3a4   :  { %3392 = vmatprep.subr.bf16.mxu0 %v6138_v45 }
 0x3a7   :  { %3393 = vmatpush1.bf16.msra.mxu0 %v6146_v12 }
 0x3a8   :  { %3394 = vmatprep.subr.bf16.mxu0 %v6155_v54 }
 0x3ab   :  { %3395 = vmatpush1.bf16.msra.mxu0 %v6166_v56 }
 0x3ac   :  { %3396 = vmatprep.subr.bf16.mxu0 %v6175_v44 }
 0x3af   :  { %3397 = vmatpush1.bf16.msra.mxu0 %v6185_v13 }
 0x3b0   :  { %3538 = vmatprep.subr.bf16.mxu0 %v6625_v5 }
 0x462   :  { %v3236_v29 = vpop.f32.mrf.mxu0 }
 0x463   :  { %v3237_v63 = vadd.f32 %v3236_v29, %v6241_v52 }
 0x464   :  { %v3238_v36 = vpop.f32.mrf.mxu0 }
 0x465   :  { %v3243_v10 = vadd.f32 %v3237_v63, %v3193_v6  ;;  %v3239_v32 = vadd.f32 %v3238_v36, %v6367_v15 }
 0x466   :  { %v3240_v8 = vpop.f32.mrf.mxu0 }
 0x467   :  { %v4310_v43 = vmul.f32 -1.442695, %v3243_v10 }
 0x468   :  { %v3241_v19 = vpop.f32.mrf.mxu0 }
 0x469   :  { %5037 = vpow2.f32 %v4310_v43 }
 0x476   :  { %v5038_v58 = vpop.eup %5037 }
 0x477   :  { %v3247_v20 = vadd.f32 1.0, %v5038_v58 }
 0x479   :  { %5039 = vrcp.f32 %v3247_v20 }
 0x486   :  { %v5040_v38 = vpop.eup %5039 }
 0x487   :  { %v3250_v9 = vmul.f32 %v5040_v38, %v3239_v32  ;;  %v3253_v28 = vsub.f32 1.0, %v5040_v38  ;;  %v3259_v6 = vmul.f32 %v5040_v38, %v6374_v47 }
 0x489   :  { %v3251_v22 = vadd.f32 %v3250_v9, %v6302_v60 }
 0x48b   :  { %5041 = vtanh.f32 %v3251_v22 }
 0x498   :  { %v5042_v23 = vpop.eup %5041 }
 0x499   :  { %3255 = vrot.lane.b32.xlu1 %v5042_v23, %s5102_s4 }
 0x50b   :  { %v3256_v31 = vpop.permute.xlu1 %3255 }
 0x50c   :  { %v3258_v50 = vmul.f32 %v3256_v31, %v3253_v28 }
 0x50e   :  { %v6399_v11 = vadd.f32 %v3259_v6, %v3258_v50 }
 0x510   :  { %v3285_v33 = vpack.c.bf16 %v6399_v11, %v6399_v11 }
 0x512   :  { %3287 = vrot.lane.b32.xlu1 %v3285_v33, %s5102_s4 }
 0x584   :  { %v3288_v35 = vpop.permute.xlu1 %3287 }
 0x585   :  { %4311 = vmatmul.mubr.msk.bf16.vlgmr.msra.gmra.mxu1 %vm2758_vm0, %v3288_v35 }
 0x586   :  { %3465 = vmatpush1.bf16.msra.mxu1 %v6133_v0  ;;  %3488 = vmatprep.mubr.bf16.mxu1 %v6623_v26 }
 0x587   :  { %3466 = vmatprep.subr.bf16.mxu1 %v6138_v45 }
 0x58a   :  { %3467 = vmatpush1.bf16.msra.mxu1 %v6146_v12 }
 0x58b   :  { %3468 = vmatprep.subr.bf16.mxu1 %v6155_v54 }
 0x58e   :  { %3469 = vmatpush1.bf16.msra.mxu1 %v6166_v56 }
 0x58f   :  { %3470 = vmatprep.subr.bf16.mxu1 %v6175_v44 }
 0x592   :  { %3471 = vmatpush1.bf16.msra.mxu1 %v6185_v13 }
 0x593   :  { %3612 = vmatprep.subr.bf16.mxu1 %v6625_v5 }
 0x645   :  { %v3326_v60 = vpop.f32.mrf.mxu1 }
 0x646   :  { %v3327_v39 = vadd.f32 %v3326_v60, %v6241_v52 }
 0x647   :  { %v3328_v14 = vpop.f32.mrf.mxu1 }
 0x648   :  { %v3333_v49 = vadd.f32 %v3327_v39, %v3283_v7  ;;  %v3329_v29 = vadd.f32 %v3328_v14, %v6367_v15 }
 0x649   :  { %v3330_v40 = vpop.f32.mrf.mxu1 }
 0x64a   :  { %v4312_v18 = vmul.f32 -1.442695, %v3333_v49 }
 0x64b   :  { %v3331_v57 = vpop.f32.mrf.mxu1 }
 0x64c   :  { %5043 = vpow2.f32 %v4312_v18 }
 0x659   :  { %v5044_v37 = vpop.eup %5043 }
 0x65a   :  { %v3337_v42 = vadd.f32 1.0, %v5044_v37 }
 0x65c   :  { %5045 = vrcp.f32 %v3337_v42 }
 0x669   :  { %v5046_v63 = vpop.eup %5045 }
 0x66a   :  { %v3340_v36 = vmul.f32 %v5046_v63, %v3329_v29  ;;  %v3343_v43 = vsub.f32 1.0, %v5046_v63  ;;  %v3349_v7 = vmul.f32 %v5046_v63, %v6399_v11 }
 0x66c   :  { %v3341_v10 = vadd.f32 %v3340_v36, %v6324_v61 }
 0x66e   :  { %5047 = vtanh.f32 %v3341_v10 }
 0x67b   :  { %v5048_v8 = vpop.eup %5047 }
 0x67c   :  { %3345 = vrot.lane.b32.xlu0 %v5048_v8, %s5102_s4 }
 0x6ee   :  { %v3346_v19 = vpop.permute.xlu0 %3345 }
 0x6ef   :  { %v3348_v58 = vmul.f32 %v3346_v19, %v3343_v43 }
 0x6f1   :  { %v6424_v20 = vadd.f32 %v3349_v7, %v3348_v58 }
 0x6f3   :  { %v3375_v32 = vpack.c.bf16 %v6424_v20, %v6424_v20 }
 0x6f5   :  { %3377 = vrot.lane.b32.xlu1 %v3375_v32, %s5102_s4 }
 0x767   :  { %v3378_v38 = vpop.permute.xlu1 %3377 }
 0x768   :  { %4313 = vmatmul.mubr.msk.bf16.vlgmr.msra.gmra.mxu0 %vm2758_vm0, %v3378_v38 }
 0x769   :  { %3539 = vmatpush1.bf16.msra.mxu0 %v6133_v0  ;;  %3562 = vmatprep.mubr.bf16.mxu0 %v6623_v26 }
 0x76a   :  { %3540 = vmatprep.subr.bf16.mxu0 %v6138_v45 }
 0x76d   :  { %3541 = vmatpush1.bf16.msra.mxu0 %v6146_v12 }
 0x76e   :  { %3542 = vmatprep.subr.bf16.mxu0 %v6155_v54 }
 0x771   :  { %3543 = vmatpush1.bf16.msra.mxu0 %v6166_v56 }
 0x772   :  { %3544 = vmatprep.subr.bf16.mxu0 %v6175_v44 }
 0x775   :  { %3545 = vmatpush1.bf16.msra.mxu0 %v6185_v13 }
 0x776   :  { %3686 = vmatprep.subr.bf16.mxu0 %v6625_v5 }
 0x828   :  { %v3416_v61 = vpop.f32.mrf.mxu0 }
 0x829   :  { %v3417_v9 = vadd.f32 %v3416_v61, %v6241_v52 }
 0x82a   :  { %v3418_v22 = vpop.f32.mrf.mxu0 }
 0x82b   :  { %v3423_v23 = vadd.f32 %v3417_v9, %v3373_v27  ;;  %v3419_v35 = vadd.f32 %v3418_v22, %v6367_v15 }
 0x82c   :  { %v3420_v28 = vpop.f32.mrf.mxu0 }
 0x82d   :  { %v4314_v31 = vmul.f32 -1.442695, %v3423_v23 }
 0x82e   :  { %v3421_v6 = vpop.f32.mrf.mxu0 }
 0x82f   :  { %5049 = vpow2.f32 %v4314_v31 }
 0x83c   :  { %v5050_v50 = vpop.eup %5049 }
 0x83d   :  { %v3427_v33 = vadd.f32 1.0, %v5050_v50 }
 0x83f   :  { %5051 = vrcp.f32 %v3427_v33 }
 0x84c   :  { %v5052_v5 = vpop.eup %5051 }
 0x84d   :  { %v3430_v60 = vmul.f32 %v5052_v5, %v3419_v35  ;;  %v3433_v49 = vsub.f32 1.0, %v5052_v5  ;;  %v3439_v27 = vmul.f32 %v5052_v5, %v6424_v20 }
 0x84f   :  { %v3431_v39 = vadd.f32 %v3430_v60, %v6350_v30 }
 0x851   :  { %5053 = vtanh.f32 %v3431_v39 }
 0x85e   :  { %v5054_v14 = vpop.eup %5053 }
 0x85f   :  { %3435 = vrot.lane.b32.xlu0 %v5054_v14, %s5102_s4 }
 0x8d1   :  { %v3436_v40 = vpop.permute.xlu0 %3435 }
 0x8d2   :  { %v3438_v18 = vmul.f32 %v3436_v40, %v3433_v49 }
 0x8d4   :  { %v6449_v57 = vadd.f32 %v3439_v27, %v3438_v18 }
 0x8d6   :  { %v3449_v37 = vpack.c.bf16 %v6449_v57, %v6449_v57 }
 0x8d8   :  { %3451 = vrot.lane.b32.xlu1 %v3449_v37, %s5102_s4 }
 0x94a   :  { %v3452_v42 = vpop.permute.xlu1 %3451 }
 0x94b   :  { %4315 = vmatmul.mubr.msk.bf16.vlgmr.msra.gmra.mxu1 %vm2758_vm0, %v3452_v42 }
 0x94c   :  { %3613 = vmatpush1.bf16.msra.mxu1 %v6133_v0  ;;  %3636 = vmatprep.mubr.bf16.mxu1 %v6623_v26 }
 0x94d   :  { %3614 = vmatprep.subr.bf16.mxu1 %v6138_v45 }
 0x950   :  { %3615 = vmatpush1.bf16.msra.mxu1 %v6146_v12 }
 0x951   :  { %3616 = vmatprep.subr.bf16.mxu1 %v6155_v54 }
 0x954   :  { %3617 = vmatpush1.bf16.msra.mxu1 %v6166_v56 }
 0x955   :  { %3618 = vmatprep.subr.bf16.mxu1 %v6175_v44 }
 0x958   :  { %3619 = vmatpush1.bf16.msra.mxu1 %v6185_v13 }
 0x959   :  { %4753 = vmatprep.subr.bf16.mxu1 %v5103_v51 }
 0xa0b   :  { %v3490_v30 = vpop.f32.mrf.mxu1 }
 0xa0c   :  { %v3491_v29 = vadd.f32 %v3490_v30, %v6241_v52 }
 0xa0d   :  { %v3492_v63 = vpop.f32.mrf.mxu1 }
 0xa0e   :  { %v3497_v36 = vadd.f32 %v3491_v29, %v3447_v21  ;;  %v3493_v58 = vadd.f32 %v3492_v63, %v6367_v15 }
 0xa0f   :  { %v3494_v10 = vpop.f32.mrf.mxu1 }
 0xa10   :  { %v4316_v8 = vmul.f32 -1.442695, %v3497_v36 }
 0xa11   :  { %v3495_v43 = vpop.f32.mrf.mxu1 }
 0xa12   :  { %5055 = vpow2.f32 %v4316_v8 }
 0xa1f   :  { %v5056_v19 = vpop.eup %5055 }
 0xa20   :  { %v3501_v7 = vadd.f32 1.0, %v5056_v19 }
 0xa22   :  { %5057 = vrcp.f32 %v3501_v7 }
 0xa2f   :  { %v5058_v32 = vpop.eup %5057 }
 0xa30   :  { %v3504_v38 = vmul.f32 %v5058_v32, %v3493_v58  ;;  %v3507_v22 = vsub.f32 1.0, %v5058_v32  ;;  %v3513_v24 = vmul.f32 %v5058_v32, %v6449_v57 }
 0xa32   :  { %v3505_v61 = vadd.f32 %v3504_v38, %v6354_v16 }
 0xa34   :  { %5059 = vtanh.f32 %v3505_v61 }
 0xa41   :  { %v5060_v9 = vpop.eup %5059 }
 0xa42   :  { %3509 = vrot.lane.b32.xlu0 %v5060_v9, %s5102_s4 }
 0xab4   :  { %v3510_v17 = vpop.permute.xlu0 %3509 }
 0xab5   :  { %v3512_v21 = vmul.f32 %v3510_v17, %v3507_v22 }
 0xab7   :  { %v6473_v23 = vadd.f32 %v3513_v24, %v3512_v21 }
 0xab9   :  { %v3523_v28 = vpack.c.bf16 %v6473_v23, %v6473_v23 }
 0xabb   :  { %3525 = vrot.lane.b32.xlu1 %v3523_v28, %s5102_s4 }
 0xb2d   :  { %v3526_v31 = vpop.permute.xlu1 %3525 }
 0xb2e   :  { %4317 = vmatmul.mubr.msk.bf16.vlgmr.msra.gmra.mxu0 %vm2758_vm0, %v3526_v31 }
 0xb2f   :  { %3687 = vmatpush1.bf16.msra.mxu0 %v6133_v0  ;;  %3710 = vmatprep.mubr.bf16.mxu0 %v6623_v26 }
 0xb30   :  { %3688 = vmatprep.subr.bf16.mxu0 %v6138_v45 }
 0xb33   :  { %3689 = vmatpush1.bf16.msra.mxu0 %v6146_v12 }
 0xb34   :  { %3690 = vmatprep.subr.bf16.mxu0 %v6155_v54 }
 0xb37   :  { %3691 = vmatpush1.bf16.msra.mxu0 %v6166_v56 }
 0xb38   :  { %3692 = vmatprep.subr.bf16.mxu0 %v6175_v44 }
 0xb3b   :  { %3693 = vmatpush1.bf16.msra.mxu0 %v6185_v13 }
 0xb3c   :  { %4765 = vmatprep.subr.bf16.mxu0 %v5103_v51 }
 0xbee   :  { %v3564_v16 = vpop.f32.mrf.mxu0 }
 0xbef   :  { %v3565_v6 = vadd.f32 %v3564_v16, %v6241_v52 }
 0xbf0   :  { %v3566_v50 = vpop.f32.mrf.mxu0 }
 0xbf1   :  { %v3571_v0 = vadd.f32 %v3565_v6, %v3521_v59  ;;  %v3567_v44 = vadd.f32 %v3566_v50, %v6367_v15 }
 0xbf2   :  { %v3568_v45 = vpop.f32.mrf.mxu0 }
 0xbf3   :  { %v4318_v12 = vmul.f32 -1.442695, %v3571_v0 }
 0xbf4   :  { %v3569_v26 = vpop.f32.mrf.mxu0 }
 0xbf5   :  { %5061 = vpow2.f32 %v4318_v12 }
 0xc02   :  { %v5062_v54 = vpop.eup %5061 }
 0xc03   :  { %v3575_v56 = vadd.f32 1.0, %v5062_v54  ;;  %v5027_v54 = vld [vmem:[%s6608_s9 + $0x18] sm:$0xff]  }
 0xc05   :  { %5063 = vrcp.f32 %v3575_v56 }
 0xc12   :  { %v5064_v13 = vpop.eup %5063 }
 0xc13   :  { %v3578_v33 = vmul.f32 %v5064_v13, %v3567_v44  ;;  %v3581_v60 = vsub.f32 1.0, %v5064_v13  ;;  %v3587_v55 = vmul.f32 %v5064_v13, %v6473_v23 }
 0xc15   :  { %v3579_v35 = vadd.f32 %v3578_v33, %v6338_v25 }
 0xc17   :  { %5065 = vtanh.f32 %v3579_v35 }
 0xc24   :  { %v5066_v5 = vpop.eup %5065 }
 0xc25   :  { %3583 = vrot.lane.b32.xlu0 %v5066_v5, %s5102_s4 }
 0xc97   :  { %v3584_v53 = vpop.permute.xlu0 %3583 }
 0xc98   :  { %v3586_v59 = vmul.f32 %v3584_v53, %v3581_v60 }
 0xc9a   :  { %v6497_v39 = vadd.f32 %v3587_v55, %v3586_v59  ;;  %v5028_v59 = vld [vmem:[%s6608_s9 + $0x10] sm:$0xff]  }
 0xc9c   :  { %v3597_v14 = vpack.c.bf16 %v6497_v39, %v6497_v39 }
 0xc9e   :  { %3599 = vrot.lane.b32.xlu1 %v3597_v14, %s5102_s4  ;;  %v5030_v14 = vld [vmem:[%s6608_s9] sm:$0xff]  }
 0xd10   :  { %v3600_v49 = vpop.permute.xlu1 %3599 }
 0xd11   :  { %4319 = vmatmul.mubr.msk.bf16.vlgmr.msra.gmra.mxu1 %vm2758_vm0, %v3600_v49  ;;  %v4323_v49 = vld [vmem:[%s6607_s8] ss:$0 sm:$0xff]  ;;  %s5106_s8 = smov [#allocation3]  }
 0xd12   :  { %4754 = vmatpush3.bf16.msra.mxu1 %v5023_v34  ;;  %4761 = vmatprep.mubr.msk.bf16.mxu1 %vm5104_vm10, %v5103_v51 }
 0xd13   :  { %4755 = vmatprep.subr.bf16.mxu1 %v5103_v51 }
 0xd16   :  { %4756 = vmatpush3.bf16.msra.mxu1 %v5024_v41 }
 0xd17   :  { %4757 = vmatprep.subr.bf16.mxu1 %v5103_v51 }
 0xdd1   :  { %v3638_v25 = vpop.f32.mrf.mxu1 }
 0xdd2   :  { %v3639_v40 = vadd.f32 %v3638_v25, %v6241_v52 }
 0xdd3   :  { %v3640_v27 = vpop.f32.mrf.mxu1 }
 0xdd4   :  { %v3645_v18 = vadd.f32 %v3639_v40, %v3595_v62  ;;  %v3641_v36 = vadd.f32 %v3640_v27, %v6367_v15 }
 0xdd5   :  { %v3642_v37 = vpop.f32.mrf.mxu1 }
 0xdd6   :  { %v4320_v42 = vmul.f32 -1.442695, %v3645_v18 }
 0xdd7   :  { %v3643_v30 = vpop.f32.mrf.mxu1 }
 0xdd8   :  { %5067 = vpow2.f32 %v4320_v42 }
 0xde5   :  { %v5068_v29 = vpop.eup %5067 }
 0xde6   :  { %v3649_v63 = vadd.f32 1.0, %v5068_v29 }
 0xde8   :  { %5069 = vrcp.f32 %v3649_v63 }
 0xdf5   :  { %v5070_v10 = vpop.eup %5069 }
 0xdf6   :  { %v3652_v8 = vmul.f32 %v5070_v10, %v3641_v36  ;;  %v3655_v7 = vsub.f32 1.0, %v5070_v10  ;;  %v3661_v4 = vmul.f32 %v5070_v10, %v6497_v39  ;;  %v5105_v36 = vmov 1983009808  }
 0xdf7   :  { %v3921_v10 = vunpack.c.l.s4 %v5105_v36 }
 0xdf8   :  { %v3653_v43 = vadd.f32 %v3652_v8, %v6346_v1 }
 0xdf9   :  { %v3922_v8 = vunpack.c.0.s8 %v3921_v10 }
 0xdfa   :  { %5071 = vtanh.f32 %v3653_v43  ;;  %v4329_v43 = vld [vmem:[%s6609_s10] ss:$0 sm:$0xff]  ;;  %s3984_s10 = sshll.u32 %s5106_s8, 4  ;;  %s3985_s10 = int_to_ptr.vmem [resolvable:$true] %s3984_s10 }
 0xdfb   :  { %s5079_s27 = scalar_lea.vmem %s3985_s10, 32  ;;  %p5084_p1 = scmp.lt.s32.totalorder %s3985_s10, %s3985_s10 }
 0xdfc   :  { %p5080_p0 = scmp.ne.s32.totalorder %s3985_s10, %s5079_s27  ;;  %p5085_p2 = scmp.lt.s32.totalorder %s5079_s27, %s5079_s27 }
 0xdfe   :  { %p5086_p3 = por %p5085_p2, %p5084_p1 }
 0xe00   :  { %p5087_p4 = pnand %p5086_p3, %p5080_p0 }
 0xe07   :  { %v5072_v19 = vpop.eup %5071 }
 0xe08   :  { %3657 = vrot.lane.b32.xlu0 %v5072_v19, %s5102_s4  ;;  %v3925_v19 = vsub.s32 %v3922_v8, %v6224_v2 }
 0xe7a   :  { %v3658_v48 = vpop.permute.xlu0 %3657 }
 0xe7b   :  { %v3660_v62 = vmul.f32 %v3658_v48, %v3655_v7 }
 0xe7d   :  { %v3662_v58 = vadd.f32 %v3661_v4, %v3660_v62 }
 0xe7f   :  { %v3671_v32 = vpack.c.bf16 %v3662_v58, %v3662_v58 }
 0xe81   :  { %3673 = vrot.lane.b32.xlu1 %v3671_v32, %s5102_s4 }
 0xe85   :  { %3172 = vrot.lane.b32.xlu1 %v6374_v47, %s5102_s4 }
 0xe89   :  { %3352 = vrot.lane.b32.xlu1 %v6424_v20, %s5102_s4 }
 0xe8d   :  { %3516 = vrot.lane.b32.xlu1 %v6473_v23, %s5102_s4 }
 0xe91   :  { %3664 = vrot.lane.b32.xlu1 %v3662_v58, %s5102_s4 }
 0xef3   :  { %v3674_v1 = vpop.permute.xlu1 %3673 }
 0xef4   :  { %4321 = vmatmul.mubr.msk.bf16.vlgmr.msra.gmra.mxu0 %vm2758_vm0, %v3674_v1 }
 0xef5   :  { %4773 = vmatprep.mubr.msk.bf16.mxu0 %vm5104_vm10, %v5103_v51  ;;  %4766 = vmatpush3.bf16.msra.mxu0 %v5027_v54 }
 0xef6   :  { %4767 = vmatprep.subr.bf16.mxu0 %v5103_v51 }
 0xef7   :  { %v3173_v38 = vpop.permute.xlu1 %3172 }
 0xef8   :  { %3176 = vst.msk [vmem:[#allocation2] sm:$0x3] %vm3175_vm8, %v3173_v38 }
 0xef9   :  { %3178 = vst.msk [vmem:[#allocation2 + $0xe] sm:$0x3] %vm3177_vm9, %v3173_v38  ;;  %4768 = vmatpush3.bf16.msra.mxu0 %v5028_v59 }
 0xefa   :  { %4769 = vmatprep.subr.bf16.mxu0 %v5103_v51 }
 0xefb   :  { %v3353_v61 = vpop.permute.xlu1 %3352 }
 0xefc   :  { %3355 = vst.msk [vmem:[#allocation2 + $0x4] sm:$0x3] %vm3175_vm8, %v3353_v61 }
 0xefd   :  { %3356 = vst.msk [vmem:[#allocation2 + $0xa] sm:$0x3] %vm3177_vm9, %v3353_v61 }
 0xfb4   :  { %v3712_v47 = vpop.f32.mrf.mxu0 }
 0xfb5   :  { %v3713_v20 = vadd.f32 %v3712_v47, %v6241_v52 }
 0xfb6   :  { %v3714_v9 = vpop.f32.mrf.mxu0 }
 0xfb7   :  { %v3719_v22 = vadd.f32 %v3713_v20, %v3669_v46  ;;  %v3715_v31 = vadd.f32 %v3714_v9, %v6367_v15  ;;  %v5025_v46 = vld [vmem:[%s6606_s7 + $0x8] sm:$0xff]   ;;  %v3517_v15 = vpop.permute.xlu1 %3516 }
 0xfb8   :  { %v3716_v17 = vpop.f32.mrf.mxu0  ;;  %4758 = vmatpush3.bf16.msra.mxu1 %v5025_v46 }
 0xfb9   :  { %v4322_v24 = vmul.f32 -1.442695, %v3719_v22  ;;  %4759 = vmatprep.subr.bf16.mxu1 %v5103_v51 }
 0xfba   :  { %v3717_v21 = vpop.f32.mrf.mxu0 }
 0xfbb   :  { %5073 = vpow2.f32 %v4322_v24  ;;  %v3665_v56 = vpop.permute.xlu1 %3664 }
 0xfc8   :  { %v5074_v23 = vpop.eup %5073 }
 0xfc9   :  { %v3723_v28 = vadd.f32 1.0, %v5074_v23 }
 0xfcb   :  { %5075 = vrcp.f32 %v3723_v28 }
 0xfd8   :  { %v5076_v16 = vpop.eup %5075 }
 0xfd9   :  { %v3726_v6 = vmul.f32 %v5076_v16, %v3715_v31  ;;  %v3735_v0 = vmul.f32 %v5076_v16, %v3662_v58 }
 0xfdb   :  { %v3727_v52 = vadd.f32 %v3726_v6, %v6362_v3  ;;  %v5026_v3 = vld [vmem:[%s6606_s7] sm:$0xff]  }
 0xfdc   :  { %4760 = vmatpush3.bf16.msra.mxu1 %v5026_v3 }
 0xfdd   :  { %5077 = vtanh.f32 %v3727_v52 }
 0xfea   :  { %v5078_v50 = vpop.eup %5077 }
 0xfeb   :  { %3731 = vrot.lane.b32.xlu0 %v5078_v50, %s5102_s4 }
 0xfef   :  { %3262 = vrot.lane.b32.xlu0 %v6399_v11, %s5102_s4  ;;  %v3729_v11 = vsub.f32 1.0, %v5076_v16 }
 0xff3   :  { %3442 = vrot.lane.b32.xlu0 %v6449_v57, %s5102_s4 }
 0xff7   :  { %3590 = vrot.lane.b32.xlu0 %v6497_v39, %s5102_s4  ;;  %v5029_v39 = vld [vmem:[%s6608_s9 + $0x8] sm:$0xff]  }
 0xff8   :  { %4770 = vmatpush3.bf16.msra.mxu0 %v5029_v39 }
 0xff9   :  { %4771 = vmatprep.subr.bf16.mxu0 %v5103_v51 }
 0xffc   :  { %4772 = vmatpush3.bf16.msra.mxu0 %v5030_v14 }
0x105d   :  { %v3732_v57 = vpop.permute.xlu0 %3731 }
0x105e   :  { %v3734_v45 = vmul.f32 %v3732_v57, %v3729_v11 }
0x1060   :  { %v3736_v12 = vadd.f32 %v3735_v0, %v3734_v45 }
0x1061   :  { %v3263_v26 = vpop.permute.xlu0 %3262 }
0x1062   :  { %3265 = vst.msk [vmem:[#allocation2 + $0x2] sm:$0x3] %vm3175_vm8, %v3263_v26  ;;  %3738 = vrot.lane.b32.xlu0 %v3736_v12, %s5102_s4 }
0x1063   :  { %3266 = vst.msk [vmem:[#allocation2 + $0xc] sm:$0x3] %vm3177_vm9, %v3263_v26  ;;  %3668 = vst.msk [vmem:[#allocation2 + $0x2] sm:$0x3] %vm3177_vm9, %v3665_v56 }
0x1064   :  { %3667 = vst.msk [vmem:[#allocation2 + $0xc] sm:$0x3] %vm3175_vm8, %v3665_v56 }
0x1065   :  { %v3443_v44 = vpop.permute.xlu0 %3442 }
0x1066   :  { %3445 = vst.msk [vmem:[#allocation2 + $0x6] sm:$0x3] %vm3175_vm8, %v3443_v44 }
0x1067   :  { %3446 = vst.msk [vmem:[#allocation2 + $0x8] sm:$0x3] %vm3177_vm9, %v3443_v44  ;;  %3520 = vst.msk [vmem:[#allocation2 + $0x6] sm:$0x3] %vm3177_vm9, %v3517_v15 }
0x1068   :  { %3519 = vst.msk [vmem:[#allocation2 + $0x8] sm:$0x3] %vm3175_vm8, %v3517_v15 }
0x1069   :  { %v3591_v13 = vpop.permute.xlu0 %3590 }
0x106a   :  { %3593 = vst.msk [vmem:[#allocation2 + $0xa] sm:$0x3] %vm3175_vm8, %v3591_v13 }
0x106b   :  { %3594 = vst.msk [vmem:[#allocation2 + $0x4] sm:$0x3] %vm3177_vm9, %v3591_v13 }
0x10d4   :  { %v3739_v33 = vpop.permute.xlu0 %3738 }
0x10d5   :  { %3741 = vst.msk [vmem:[#allocation2 + $0xe] sm:$0x3] %vm3175_vm8, %v3739_v33 }
0x10d6   :  { %3742 = vst.msk [vmem:[#allocation2] sm:$0x3] %vm3177_vm9, %v3739_v33 }
0x10dc   :  { %v3744_v5 = vld [vmem:[#allocation2 + $0x8] sm:$0xff] }
0x10dd   :  { %v3743_v35 = vld [vmem:[#allocation2] sm:$0xff]  ;;  %v3746_v53 = vmax.f32 %v3744_v5, 0.0 }
0x10de   :  { %v3745_v60 = vmax.f32 %v3743_v35, 0.0 }
0x10e0   :  { %v3747_v55 = vpack.c.bf16 %v3746_v53, %v3745_v60 }
0x10e2   :  { %4762 = vmatmul.mubr.msk.bf16.vlgmr.msra.gmra.mxu1 %vm2758_vm0, %v3747_v55 }
0x11a2   :  { %v3824_v25 = vpop.f32.mrf.mxu1 }
0x11a3   :  { %v3825_v27 = vadd.f32 %v4323_v49, %v3824_v25 }
0x11a4   :  { %v4763_v40 = vpop.f32.mrf.mxu1 }
0x11a5   :  { %v3831_v30 = vmax.f32 %v3825_v27, 0.0 }
0x11a6   :  { %v3827_v18 = vpop.f32.mrf.mxu1 }
0x11a7   :  { %v3828_v37 = vadd.f32 %v4323_v49, %v3827_v18 }
0x11a8   :  { %v4764_v42 = vpop.f32.mrf.mxu1 }
0x11a9   :  { %v3832_v29 = vmax.f32 %v3828_v37, 0.0 }
0x11ab   :  { %v3833_v63 = vpack.c.bf16 %v3832_v29, %v3831_v30 }
0x11ad   :  { %4774 = vmatmul.mubr.msk.bf16.vlgmr.msra.gmra.mxu0 %vm2758_vm0, %v3833_v63 }
0x126d   :  { %v3910_v7 = vpop.f32.mrf.mxu0 }
0x126e   :  { %v3911_v48 = vadd.f32 %v4329_v43, %v3910_v7 }
0x126f   :  { %v4775_v4 = vpop.f32.mrf.mxu0 }
0x1270   :  { %v3919_v62 = vcombine.high %v3911_v48, %v3911_v48  ;;  %v3926_v58 = vrot.slane %v3911_v48, %v3925_v19 }
0x1271   :  { %v3913_v32 = vpop.f32.mrf.mxu0 }
0x1272   :  { %v3933_v1 = vrot.slane %v3919_v62, %v3925_v19  ;;  %v3934_v38 = vcombine.high %v3926_v58, %v3926_v58  ;;  %v3914_v61 = vadd.f32 %v4329_v43, %v3913_v32  ;;  %v3962_v9 = vsel %vm3961_vm11, %v3926_v58, 0.0 }
0x1273   :  { %v4776_v47 = vpop.f32.mrf.mxu0 }
0x1274   :  { %v3935_v20 = vcombine.high %v3933_v1, %v3933_v1  ;;  %v3963_v22 = vsel %vm3961_vm11, %v3934_v38, 0.0  ;;  %v3936_v17 = vcombine.high %v3914_v61, %v3914_v61  ;;  %v3943_v21 = vrot.slane %v3914_v61, %v3925_v19 }
0x1275   :  { %v3964_v24 = vadd.f32 %v3963_v22, %v3962_v9  ;;  %v3965_v2 = vsel %vm3961_vm11, %v3933_v1, 0.0 }
0x1276   :  { %v3950_v28 = vrot.slane %v3936_v17, %v3925_v19  ;;  %v3951_v31 = vcombine.high %v3943_v21, %v3943_v21  ;;  %v3967_v16 = vsel %vm3961_vm11, %v3935_v20, 0.0  ;;  %v3969_v52 = vsel %vm3961_vm11, %v3943_v21, 0.0 }
0x1277   :  { %v3966_v23 = vadd.f32 %v3965_v2, %v3964_v24 }
0x1278   :  { %v3952_v34 = vcombine.high %v3950_v28, %v3950_v28  ;;  %v3971_v51 = vsel %vm3961_vm11, %v3951_v31, 0.0  ;;  %v3973_v46 = vsel %vm3961_vm11, %v3950_v28, 0.0 }
0x1279   :  { %v3968_v6 = vadd.f32 %v3967_v16, %v3966_v23 }
0x127a   :  { %v3975_v15 = vsel %vm3961_vm11, %v3952_v34, 0.0 }
0x127b   :  { %v3970_v50 = vadd.f32 %v3969_v52, %v3968_v6 }
0x127d   :  { %v3972_v41 = vadd.f32 %v3971_v51, %v3970_v50 }
0x127f   :  { %v3974_v3 = vadd.f32 %v3973_v46, %v3972_v41 }
0x1281   :  { %v3976_v11 = vadd.f32 %v3975_v15, %v3974_v3 }
0x1283   :  { %3977 = vst.msk [vmem:[#allocation3] sm:$0x3] %vm3961_vm11, %v3976_v11 }
0x1284   :  { %5090 = shalt.err (!%p5087_p4)
}
0x1285   :  { %3987 = dma.vmem_to_hbm [thread:$0]  %s3985_s10, 32, %s6610_s11, [#allocation4]  }
0x1286   :  { %5099 = dma.done.wait [#allocation4], 32  }
0x1287   :  { %5100 = vsyncadd [#allocation4], 4294967264 }
0x1288   :  { %3991 = vsyncpa [#allocation4], 1 }

</bundles_post_ra>
